<compile_context>
chip_gen: v5e
topology: v5e:2x2
jax: 0.10.0
libtpu: 0.0.40
codegen_flags: <defaults>
</compile_context>

<pallas_src>
import functools

import jax
import jax.numpy as jnp
from jax.experimental import pallas as pl
from jax.experimental.pallas import tpu as pltpu

MXU_DTYPE = jnp.bfloat16      # matmul-input dtype; accumulation stays f32
ACT_DTYPE = jnp.bfloat16      # HBM streaming dtype for activations (x, y, linear LHS)


def _round_up(x, m):
    return (x + m - 1) // m * m


def _cdiv(a, b):
    return (a + b - 1) // b


_VMEM_LIMIT_CACHE = None


def _vmem_limit_bytes():
    """Generation-aware VMEM budget: ~48 MiB on v7x (64 MiB physical), ~96 MiB on v5e/v6e."""
    global _VMEM_LIMIT_CACHE
    if _VMEM_LIMIT_CACHE is None:
        cap = 128 * 1024 * 1024
        try:
            info = pltpu.get_tpu_info()
            cap = int(getattr(info, "vmem_capacity_bytes", cap) or cap)
        except Exception:
            pass
        _VMEM_LIMIT_CACHE = int(min(cap * 3 // 4, 100 * 1024 * 1024))
    return _VMEM_LIMIT_CACHE


# ---------------------------------------------------------------------------
# Fused GRU layer kernel: per time chunk, (1) project x -> gi into a VMEM scratch
# (off the serial path, one well-shaped matmul), (2) run the recurrence with the
# hidden state carried in a f32 VMEM scratch.  Gate order follows PyTorch (r, z, n),
# each gate in its own lane-aligned H_pad block.
# ---------------------------------------------------------------------------
def gru_chunk_kernel(x_ref, wih_ref, bih_ref, whh_ref, bhn_ref, h0_ref,
                     y_ref, h_scr, gi_scr, yf_scr, *, unroll):
    c = pl.program_id(0)

    @pl.when(c == 0)
    def _():
        h_scr[...] = h0_ref[...]

    tc, bp, g3 = gi_scr.shape
    hp = h_scr.shape[1]

    # Hoisted, time-parallel input projection for the whole chunk (biases for r,z folded).
    gi = jnp.dot(x_ref[...], wih_ref[...], preferred_element_type=jnp.float32)
    gi_scr[...] = (gi + bih_ref[...]).reshape(tc, bp, g3)      # tile-aligned split

    bhn = jnp.broadcast_to(bhn_ref[...], (bp, hp))             # hoisted broadcast

    def step(t, carry):
        h_prev = h_scr[...]                                    # (bp, hp) f32
        # W_hh is read from its ref per step (compiler decides residency; avoids
        # pinning ~24 vregs across the whole loop).
        gh = jnp.dot(h_prev.astype(MXU_DTYPE), whh_ref[...],
                     preferred_element_type=jnp.float32)       # (bp, 3*hp) f32
        gi_t = gi_scr[t]
        r = jax.nn.sigmoid(gi_t[:, 0:hp] + gh[:, 0:hp])
        z = jax.nn.sigmoid(gi_t[:, hp:2 * hp] + gh[:, hp:2 * hp])
        n = jnp.tanh(gi_t[:, 2 * hp:3 * hp] + r * (gh[:, 2 * hp:3 * hp] + bhn))
        h_new = (1.0 - z) * n + z * h_prev
        h_scr[...] = h_new
        yf_scr[t] = h_new                                      # f32 staging (lane-dense)
        return carry

    # TODO(synk): v5e/v6e could stage W_hh in the MXU once per chunk via
    # pltpu.matmul_push_rhs / matmul_acc_lhs / matmul_pop.
    jax.lax.fori_loop(0, tc, step, 0, unroll=unroll)

    # One bulk cast + lane-dense store of the whole chunk (bf16 HBM traffic).
    y_ref[...] = yf_scr[...].reshape(tc * bp, hp).astype(y_ref.dtype)


def gru_layer(x2d, w_ih, b_comb, w_hh, b_hn, h0, t_chunk, b_pad, h_pad):
    """x2d: (S_pad*B_pad, In_pad) bf16 time-major rows; returns y: (S_pad*B_pad, H_pad) bf16."""
    rows, in_pad = x2d.shape
    s_pad = rows // b_pad
    n_chunks = s_pad // t_chunk
    rows_per_chunk = t_chunk * b_pad
    g3 = 3 * h_pad
    unroll = max(1, min(8, t_chunk))
    kernel = functools.partial(gru_chunk_kernel, unroll=unroll)
    return pl.pallas_call(
        kernel,
        out_shape=jax.ShapeDtypeStruct((rows, h_pad), ACT_DTYPE),
        grid_spec=pltpu.PrefetchScalarGridSpec(
            num_scalar_prefetch=0,
            grid=(n_chunks,),
            in_specs=[
                pl.BlockSpec((rows_per_chunk, in_pad), lambda c: (c, 0)),
                pl.BlockSpec((in_pad, g3), lambda c: (0, 0)),
                pl.BlockSpec((1, g3), lambda c: (0, 0)),
                pl.BlockSpec((h_pad, g3), lambda c: (0, 0)),
                pl.BlockSpec((1, h_pad), lambda c: (0, 0)),
                pl.BlockSpec((b_pad, h_pad), lambda c: (0, 0)),
            ],
            out_specs=pl.BlockSpec((rows_per_chunk, h_pad), lambda c: (c, 0)),
            scratch_shapes=[
                pltpu.VMEM((b_pad, h_pad), jnp.float32),            # hidden carry
                pltpu.VMEM((t_chunk, b_pad, g3), jnp.float32),      # gi (fused projection)
                pltpu.VMEM((t_chunk, b_pad, h_pad), jnp.float32),   # y f32 staging
            ],
        ),
        # TODO(synk): on v7x the second TensorCore idles during this serial phase;
        # a leading "parallel" batch-split axis (own h scratch per core) would recover it.
        compiler_params=pltpu.CompilerParams(
            dimension_semantics=("arbitrary",),                     # true time recurrence
            vmem_limit_bytes=_vmem_limit_bytes()),
    )(x2d, w_ih, b_comb, w_hh, b_hn, h0)


# ---------------------------------------------------------------------------
# Output Linear: tiled over (rows, vocab), both axes parallel.  Grid order picked so
# the larger operand is streamed from HBM only once.
# ---------------------------------------------------------------------------
def linear_kernel(x_ref, w_ref, b_ref, o_ref):
    o_ref[...] = (jnp.dot(x_ref[...].astype(MXU_DTYPE), w_ref[...],
                          preferred_element_type=jnp.float32) + b_ref[...])


def linear(x, w_t, b):
    """x: (rows, H_pad) bf16, w_t: (H_pad, V_pad) bf16, b: (1, V_pad) f32."""
    rows, hp = x.shape
    vp = w_t.shape[1]
    tn = min(512, vp)
    assert vp % tn == 0
    n_col = vp // tn
    n_row = _cdiv(rows, 256)
    tm = _round_up(_cdiv(rows, n_row), 16)      # bf16 sublane packing -> multiple of 16
    rows_pad = n_row * tm
    x_p = jnp.pad(x, ((0, rows_pad - rows), (0, 0)))

    # Weight is re-fetched once per row tile in row-major order, activations once per
    # vocab tile in vocab-major order: pick the cheaper ordering.
    w_traffic = n_row * hp * vp
    x_traffic = n_col * rows_pad * hp
    if w_traffic <= x_traffic:
        grid = (n_row, n_col)
        x_map = lambda i, j: (i, 0)
        w_map = lambda i, j: (0, j)
        b_map = lambda i, j: (0, j)
        o_map = lambda i, j: (i, j)
    else:                                        # keep (hp, tn) weight block resident
        grid = (n_col, n_row)
        x_map = lambda j, i: (i, 0)
        w_map = lambda j, i: (0, j)
        b_map = lambda j, i: (0, j)
        o_map = lambda j, i: (i, j)

    out = pl.pallas_call(
        linear_kernel,
        out_shape=jax.ShapeDtypeStruct((rows_pad, vp), jnp.float32),
        grid_spec=pltpu.PrefetchScalarGridSpec(
            num_scalar_prefetch=0,
            grid=grid,
            in_specs=[
                pl.BlockSpec((tm, hp), x_map),
                pl.BlockSpec((hp, tn), w_map),
                pl.BlockSpec((1, tn), b_map),
            ],
            out_specs=pl.BlockSpec((tm, tn), o_map),
        ),
        compiler_params=pltpu.CompilerParams(
            dimension_semantics=("parallel", "parallel"),
            vmem_limit_bytes=_vmem_limit_bytes()),
    )(x_p, w_t, b)
    return out[:rows]


# ---------------------------------------------------------------------------
# Parameters: logical (f32, PyTorch-like) + packed (padded, lane-aligned, bf16).
# ---------------------------------------------------------------------------
def init_params(key, vocab_size, embedding_dim, hidden_dim, num_layers):
    params = {}
    k_emb, key = jax.random.split(key)
    params["embedding"] = jax.random.normal(
        k_emb, (vocab_size, embedding_dim), jnp.float32)      # nn.Embedding default N(0,1)

    bound = 1.0 / jnp.sqrt(hidden_dim)
    params["gru"] = []
    for layer in range(num_layers):
        in_dim = embedding_dim if layer == 0 else hidden_dim
        key, k1, k2, k3, k4 = jax.random.split(key, 5)
        params["gru"].append({
            # stored pre-transposed: (in, 3H) / (H, 3H); biases as (1, 3H); gate order r,z,n
            "w_ih_t": jax.random.uniform(k1, (in_dim, 3 * hidden_dim),
                                         jnp.float32, -bound, bound),
            "w_hh_t": jax.random.uniform(k2, (hidden_dim, 3 * hidden_dim),
                                         jnp.float32, -bound, bound),
            "b_ih": jax.random.uniform(k3, (1, 3 * hidden_dim), jnp.float32, -bound, bound),
            "b_hh": jax.random.uniform(k4, (1, 3 * hidden_dim), jnp.float32, -bound, bound),
        })

    key, k1, k2 = jax.random.split(key, 3)
    params["linear_w_t"] = jax.random.uniform(
        k1, (hidden_dim, vocab_size), jnp.float32, -bound, bound)
    params["linear_b"] = jax.random.uniform(
        k2, (1, vocab_size), jnp.float32, -bound, bound)
    return params


def _pack_gate_cols(w, h, h_pad, in_pad):
    """(in, 3H) packed (r,z,n) -> (in_pad, 3*H_pad), each gate in its own lane-aligned
    block of width H_pad (zeros elsewhere)."""
    out = jnp.zeros((in_pad, 3 * h_pad), w.dtype)
    for g in range(3):
        out = out.at[:w.shape[0], g * h_pad:g * h_pad + h].set(w[:, g * h:(g + 1) * h])
    return out


def pack_params(params, vocab_size, embedding_dim, hidden_dim, num_layers):
    h = hidden_dim
    h_pad = _round_up(h, 128)
    e_pad = _round_up(embedding_dim, 128)
    v128 = _round_up(vocab_size, 128)
    v_pad = _round_up(v128, min(512, v128))

    emb = (jnp.zeros((vocab_size, e_pad), jnp.float32)
           .at[:, :embedding_dim].set(params["embedding"]).astype(ACT_DTYPE))

    packed = {
        "embedding": emb,
        "dims": (vocab_size, embedding_dim, hidden_dim, num_layers, e_pad, h_pad, v_pad),
        "gru": [],
    }
    for layer, p in enumerate(params["gru"]):
        in_pad = e_pad if layer == 0 else h_pad
        w_ih = _pack_gate_cols(p["w_ih_t"], h, h_pad, in_pad).astype(MXU_DTYPE)
        w_hh = _pack_gate_cols(p["w_hh_t"], h, h_pad, h_pad).astype(MXU_DTYPE)
        b_ih, b_hh = p["b_ih"][0], p["b_hh"][0]
        # Fold b_hh into the hoisted projection bias for r and z; keep b_hh_n separate
        # (needed for n = tanh(W_in x + b_in + r*(W_hn h + b_hn))).
        b_comb = jnp.zeros((1, 3 * h_pad), jnp.float32)
        for g in range(3):
            bg = b_ih[g * h:(g + 1) * h]
            if g < 2:
                bg = bg + b_hh[g * h:(g + 1) * h]
            b_comb = b_comb.at[0, g * h_pad:g * h_pad + h].set(bg)
        b_hn = jnp.zeros((1, h_pad), jnp.float32).at[0, :h].set(b_hh[2 * h:3 * h])
        packed["gru"].append({"w_ih": w_ih, "w_hh": w_hh, "b_comb": b_comb, "b_hn": b_hn})

    packed["linear_w"] = (jnp.zeros((h_pad, v_pad), jnp.float32)
                          .at[:h, :vocab_size].set(params["linear_w_t"])
                          .astype(MXU_DTYPE))
    packed["linear_b"] = (jnp.zeros((1, v_pad), jnp.float32)
                          .at[0, :vocab_size].set(params["linear_b"][0]))
    return packed


def _pick_t_chunk(t_chunk_max, seq_len, b_pad, in_pad_max, h_pad):
    """Pick a chunk length: VMEM-aware, and split seq_len into equal chunks so wasted
    serial padding steps are at most n_chunks-1 total."""
    limit = int(_vmem_limit_bytes() * 0.7)
    tc = max(1, min(t_chunk_max, seq_len))

    def need(tcv):
        rows = tcv * b_pad
        return (2 * rows * in_pad_max * 2                 # x blocks (bf16, double-buffered)
                + 2 * rows * h_pad * 2                    # y blocks (bf16, double-buffered)
                + rows * 3 * h_pad * 4                    # gi scratch (f32)
                + rows * h_pad * 4                        # y staging scratch (f32)
                + 2 * 2 * (in_pad_max + h_pad) * 3 * h_pad  # weights (bf16, 2 buffers)
                + (1 << 20))

    while tc > 8 and need(tc) > limit:
        tc = (tc + 1) // 2
    n_chunks = _cdiv(seq_len, tc)
    tc = _cdiv(seq_len, n_chunks)
    if (tc * b_pad) % 16 != 0:        # bf16 block rows must be a multiple of 16
        tc += 1
    return tc, n_chunks


# ---------------------------------------------------------------------------
# PoetryModel forward
# ---------------------------------------------------------------------------
def poetry_model_forward(packed, input_ids, hidden=None, *, t_chunk=256):
    """input_ids: (seq_len, batch) int32.  Returns (logits (S*B, V), hidden (L, B, H))."""
    vocab, emb_dim, hid_dim, num_layers, e_pad, h_pad, _ = packed["dims"]
    seq_len, batch = input_ids.shape
    b_pad = _round_up(batch, 8)
    tc, n_chunks = _pick_t_chunk(t_chunk, seq_len, b_pad, max(e_pad, h_pad), h_pad)
    s_pad = tc * n_chunks

    if hidden is None:
        h0 = jnp.zeros((num_layers, b_pad, h_pad), jnp.float32)
    else:
        h0 = jnp.pad(hidden.astype(jnp.float32),
                     ((0, 0), (0, b_pad - batch), (0, h_pad - hid_dim)))

    # TODO(synk): embedding gather (nn.Embedding) stays as XLA glue (jnp.take), not Pallas.
    # TODO(synk): layer 0 could gather a precomputed (V, 3*H_pad) embedding@W_ih table
    # instead of the in-kernel projection when 3H <= E.
    embeds = jnp.take(packed["embedding"], input_ids, axis=0)          # (S, B, E_pad) bf16
    x3 = jnp.pad(embeds, ((0, s_pad - seq_len), (0, b_pad - batch), (0, 0)))
    x = x3.reshape(s_pad * b_pad, e_pad)                                # time-major rows

    h_finals = []
    for layer in range(num_layers):
        p = packed["gru"][layer]
        y = gru_layer(x, p["w_ih"], p["b_comb"], p["w_hh"], p["b_hn"],
                      h0[layer], tc, b_pad, h_pad)                      # (Sp*Bp, Hp) bf16
        y3 = y.reshape(s_pad, b_pad, h_pad)
        h_finals.append(y3[seq_len - 1, :batch, :hid_dim].astype(jnp.float32))
        x = y
    new_hidden = jnp.stack(h_finals, axis=0)                            # (L, B, H) f32

    y3 = x.reshape(s_pad, b_pad, h_pad)
    flat = y3[:seq_len, :batch, :].reshape(seq_len * batch, h_pad)      # bf16
    logits = linear(flat, packed["linear_w"], packed["linear_b"])[:, :vocab]
    return logits, new_hidden


# ---------------------------------------------------------------------------
# Pure-JAX reference (same math as nn.GRU; matmul inputs optionally cast to the
# kernel's MXU dtype so the structural correctness check can stay tight).
# ---------------------------------------------------------------------------
def reference_forward(params, input_ids, hidden=None, matmul_dtype=jnp.float32):
    seq_len, batch = input_ids.shape
    num_layers = len(params["gru"])
    hidden_dim = params["gru"][0]["w_hh_t"].shape[0]
    if hidden is None:
        hidden = jnp.zeros((num_layers, batch, hidden_dim), jnp.float32)

    def mm(a, b):
        return jnp.dot(a.astype(matmul_dtype), b.astype(matmul_dtype),
                       preferred_element_type=jnp.float32)

    x = jnp.take(params["embedding"], input_ids, axis=0)

    def cell(p, h_prev, x_t):
        gi = mm(x_t, p["w_ih_t"]) + p["b_ih"]
        gh = mm(h_prev, p["w_hh_t"]) + p["b_hh"]
        H = hidden_dim
        r = jax.nn.sigmoid(gi[:, :H] + gh[:, :H])
        z = jax.nn.sigmoid(gi[:, H:2 * H] + gh[:, H:2 * H])
        n = jnp.tanh(gi[:, 2 * H:] + r * gh[:, 2 * H:])
        return (1.0 - z) * n + z * h_prev

    h_finals = []
    for layer in range(num_layers):
        p = params["gru"][layer]

        def step(h, x_t, p=p):
            h_new = cell(p, h, x_t)
            return h_new, h_new

        h_n, ys = jax.lax.scan(step, hidden[layer], x)
        x = ys
        h_finals.append(h_n)
    logits = mm(x.reshape(seq_len * batch, hidden_dim),
                params["linear_w_t"]) + params["linear_b"]
    return logits, jnp.stack(h_finals, axis=0)


if __name__ == "__main__":
    vocab_size, embedding_dim, hidden_dim, num_layers = 64, 32, 32, 2
    seq_len, batch = 8, 2

    key = jax.random.PRNGKey(0)
    k_params, k_ids = jax.random.split(key)
    params = init_params(k_params, vocab_size, embedding_dim, hidden_dim, num_layers)
    packed = pack_params(params, vocab_size, embedding_dim, hidden_dim, num_layers)
    input_ids = jax.random.randint(k_ids, (seq_len, batch), 0, vocab_size, jnp.int32)

    logits, hidden = poetry_model_forward(packed, input_ids)
    jax.block_until_ready((logits, hidden))

    # Reference mirrors the kernel's bf16 MXU-input policy -> tight structural check
    # (bf16 activation storage in the kernel equals the reference's cast-at-matmul).
    ref_logits, ref_hidden = reference_forward(params, input_ids, matmul_dtype=MXU_DTYPE)
    assert logits.shape == (seq_len * batch, vocab_size)
    assert hidden.shape == (num_layers, batch, hidden_dim)
    assert jnp.allclose(logits, ref_logits, atol=1e-2, rtol=1e-2), (
        float(jnp.max(jnp.abs(logits - ref_logits))))
    assert jnp.allclose(hidden, ref_hidden, atol=1e-2, rtol=1e-2), (
        float(jnp.max(jnp.abs(hidden - ref_hidden))))

    print("KERNEL_OK")
</pallas_src>

<mosaic_0001>
module attributes {stable_mosaic.version = 11 : i64} {
  func.func @gru_chunk_kernel(%arg0: i32, %arg1: memref<64x128xbf16, #tpu.memory_space<vmem>>, %arg2: memref<128x384xbf16, #tpu.memory_space<vmem>>, %arg3: memref<1x384xf32, #tpu.memory_space<vmem>>, %arg4: memref<128x384xbf16, #tpu.memory_space<vmem>>, %arg5: memref<1x128xf32, #tpu.memory_space<vmem>>, %arg6: memref<8x128xf32, #tpu.memory_space<vmem>>, %arg7: memref<64x128xbf16, #tpu.memory_space<vmem>>, %arg8: memref<8x128xf32, #tpu.memory_space<vmem>>, %arg9: memref<8x8x384xf32, #tpu.memory_space<vmem>>, %arg10: memref<8x8x128xf32, #tpu.memory_space<vmem>>) attributes {dimension_semantics = [#tpu.dimension_semantics<arbitrary>], iteration_bounds = array<i64: 1>, scalar_prefetch = 0 : i64, scratch_operands = 3 : i64, tpu.core_type = #tpu.core_type<tc>, window_params = [{transform_indices = @transform_0, window_bounds = array<i64: 64, 128>}, {pipeline_mode = #tpu.pipeline_mode<synchronous>, transform_indices = @transform_1, window_bounds = array<i64: 128, 384>}, {pipeline_mode = #tpu.pipeline_mode<synchronous>, transform_indices = @transform_2, window_bounds = array<i64: 1, 384>}, {pipeline_mode = #tpu.pipeline_mode<synchronous>, transform_indices = @transform_3, window_bounds = array<i64: 128, 384>}, {pipeline_mode = #tpu.pipeline_mode<synchronous>, transform_indices = @transform_4, window_bounds = array<i64: 1, 128>}, {pipeline_mode = #tpu.pipeline_mode<synchronous>, transform_indices = @transform_5, window_bounds = array<i64: 8, 128>}, {transform_indices = @transform_6, window_bounds = array<i64: 64, 128>}]} {
    %c0_i32 = arith.constant 0 : i32
    %0 = arith.cmpi eq, %arg0, %c0_i32 : i32
    %1 = arith.extui %0 : i1 to i32
    %c0_i32_0 = arith.constant 0 : i32
    %2 = arith.cmpi ne, %1, %c0_i32_0 : i32
    scf.if %2 {
      %c0_129 = arith.constant 0 : index
      %c0_130 = arith.constant 0 : index
      %330 = vector.load %arg6[%c0_129, %c0_130] : memref<8x128xf32, #tpu.memory_space<vmem>>, vector<8x128xf32>
      %c0_131 = arith.constant 0 : index
      %c0_132 = arith.constant 0 : index
      %331 = vector.load %arg8[%c0_131, %c0_132] : memref<8x128xf32, #tpu.memory_space<vmem>>, vector<8x128xf32>
      tpu.vector_store %arg8[%c0_131, %c0_132], %330 {strides = array<i32>} : memref<8x128xf32, #tpu.memory_space<vmem>>, vector<8x128xf32>,
    } else {
    }
    %c0 = arith.constant 0 : index
    %c0_1 = arith.constant 0 : index
    %3 = vector.load %arg1[%c0, %c0_1] : memref<64x128xbf16, #tpu.memory_space<vmem>>, vector<64x128xbf16>
    %c0_2 = arith.constant 0 : index
    %c0_3 = arith.constant 0 : index
    %4 = vector.load %arg2[%c0_2, %c0_3] : memref<128x384xbf16, #tpu.memory_space<vmem>>, vector<128x384xbf16>
    %cst = arith.constant dense<0.000000e+00> : vector<64x384xf32>
    %5 = tpu.matmul %3, %4, %cst {dimension_numbers = #tpu.dot_dimension_numbers<[1], [0], [0], [1], [0, 0, 1, 1], [], []>} : vector<64x128xbf16>, vector<128x384xbf16>, vector<64x384xf32> -> vector<64x384xf32>
    %c0_4 = arith.constant 0 : index
    %c0_5 = arith.constant 0 : index
    %6 = vector.load %arg3[%c0_4, %c0_5] : memref<1x384xf32, #tpu.memory_space<vmem>>, vector<1x384xf32>
    %7 = vector.broadcast %6 : vector<1x384xf32> to vector<64x384xf32>
    %8 = arith.addf %5, %7 : vector<64x384xf32>
    %9 = vector.shape_cast %8 : vector<64x384xf32> to vector<8x8x384xf32>
    %c0_6 = arith.constant 0 : index
    %c0_7 = arith.constant 0 : index
    %c0_8 = arith.constant 0 : index
    %10 = vector.load %arg9[%c0_6, %c0_7, %c0_8] : memref<8x8x384xf32, #tpu.memory_space<vmem>>, vector<8x8x384xf32>
    tpu.vector_store %arg9[%c0_6, %c0_7, %c0_8], %9 {strides = array<i32>} : memref<8x8x384xf32, #tpu.memory_space<vmem>>, vector<8x8x384xf32>,
    %c0_9 = arith.constant 0 : index
    %c0_10 = arith.constant 0 : index
    %11 = vector.load %arg5[%c0_9, %c0_10] : memref<1x128xf32, #tpu.memory_space<vmem>>, vector<1x128xf32>
    %12 = vector.shape_cast %11 : vector<1x128xf32> to vector<1x128xf32>
    %13 = vector.broadcast %12 : vector<1x128xf32> to vector<8x128xf32>
    %c0_i32_11 = arith.constant 0 : i32
    %c0_12 = arith.constant 0 : index
    %c0_13 = arith.constant 0 : index
    %14 = vector.load %arg8[%c0_12, %c0_13] : memref<8x128xf32, #tpu.memory_space<vmem>>, vector<8x128xf32>
    %15 = arith.truncf %14 : vector<8x128xf32> to vector<8x128xbf16>
    %c0_14 = arith.constant 0 : index
    %c0_15 = arith.constant 0 : index
    %16 = vector.load %arg4[%c0_14, %c0_15] : memref<128x384xbf16, #tpu.memory_space<vmem>>, vector<128x384xbf16>
    %cst_16 = arith.constant dense<0.000000e+00> : vector<8x384xf32>
    %17 = tpu.matmul %15, %16, %cst_16 {dimension_numbers = #tpu.dot_dimension_numbers<[1], [0], [0], [1], [0, 0, 1, 1], [], []>} : vector<8x128xbf16>, vector<128x384xbf16>, vector<8x384xf32> -> vector<8x384xf32>
    %18 = arith.index_cast %c0_i32_11 : i32 to index
    %c0_17 = arith.constant 0 : index
    %c0_18 = arith.constant 0 : index
    %19 = vector.load %arg9[%18, %c0_17, %c0_18] : memref<8x8x384xf32, #tpu.memory_space<vmem>>, vector<1x8x384xf32>
    %20 = vector.shape_cast %19 : vector<1x8x384xf32> to vector<8x384xf32>
    %21 = vector.extract_strided_slice %20 {offsets = [0, 0], sizes = [8, 128], strides = [1, 1]} : vector<8x384xf32> to vector<8x128xf32>
    %22 = vector.extract_strided_slice %17 {offsets = [0, 0], sizes = [8, 128], strides = [1, 1]} : vector<8x384xf32> to vector<8x128xf32>
    %23 = arith.addf %21, %22 : vector<8x128xf32>
    %24 = arith.negf %23 : vector<8x128xf32>
    %25 = math.exp %24 : vector<8x128xf32>
    %cst_19 = arith.constant 1.000000e+00 : f32
    %26 = vector.broadcast %cst_19 : f32 to vector<8x128xf32>
    %27 = arith.addf %26, %25 : vector<8x128xf32>
    %28 = arith.divf %26, %27 : vector<8x128xf32>
    %29 = vector.extract_strided_slice %20 {offsets = [0, 128], sizes = [8, 128], strides = [1, 1]} : vector<8x384xf32> to vector<8x128xf32>
    %30 = vector.extract_strided_slice %17 {offsets = [0, 128], sizes = [8, 128], strides = [1, 1]} : vector<8x384xf32> to vector<8x128xf32>
    %31 = arith.addf %29, %30 : vector<8x128xf32>
    %32 = arith.negf %31 : vector<8x128xf32>
    %33 = math.exp %32 : vector<8x128xf32>
    %cst_20 = arith.constant 1.000000e+00 : f32
    %34 = vector.broadcast %cst_20 : f32 to vector<8x128xf32>
    %35 = arith.addf %34, %33 : vector<8x128xf32>
    %36 = arith.divf %34, %35 : vector<8x128xf32>
    %37 = vector.extract_strided_slice %20 {offsets = [0, 256], sizes = [8, 128], strides = [1, 1]} : vector<8x384xf32> to vector<8x128xf32>
    %38 = vector.extract_strided_slice %17 {offsets = [0, 256], sizes = [8, 128], strides = [1, 1]} : vector<8x384xf32> to vector<8x128xf32>
    %39 = arith.addf %38, %13 : vector<8x128xf32>
    %40 = arith.mulf %28, %39 : vector<8x128xf32>
    %41 = arith.addf %37, %40 : vector<8x128xf32>
    %42 = math.tanh %41 : vector<8x128xf32>
    %cst_21 = arith.constant 1.000000e+00 : f32
    %43 = vector.broadcast %cst_21 : f32 to vector<8x128xf32>
    %44 = arith.subf %43, %36 : vector<8x128xf32>
    %45 = arith.mulf %44, %42 : vector<8x128xf32>
    %46 = arith.mulf %36, %14 : vector<8x128xf32>
    %47 = arith.addf %45, %46 : vector<8x128xf32>
    %c0_22 = arith.constant 0 : index
    %c0_23 = arith.constant 0 : index
    %48 = vector.load %arg8[%c0_22, %c0_23] : memref<8x128xf32, #tpu.memory_space<vmem>>, vector<8x128xf32>
    tpu.vector_store %arg8[%c0_22, %c0_23], %47 {strides = array<i32>} : memref<8x128xf32, #tpu.memory_space<vmem>>, vector<8x128xf32>,
    %49 = arith.index_cast %c0_i32_11 : i32 to index
    %c0_24 = arith.constant 0 : index
    %c0_25 = arith.constant 0 : index
    %50 = vector.load %arg10[%49, %c0_24, %c0_25] : memref<8x8x128xf32, #tpu.memory_space<vmem>>, vector<1x8x128xf32>
    %51 = vector.shape_cast %50 : vector<1x8x128xf32> to vector<8x128xf32>
    %52 = vector.shape_cast %47 : vector<8x128xf32> to vector<1x8x128xf32>
    tpu.vector_store %arg10[%49, %c0_24, %c0_25], %52 {strides = array<i32>} : memref<8x8x128xf32, #tpu.memory_space<vmem>>, vector<1x8x128xf32>,
    %c1_i32 = arith.constant 1 : i32
    %c0_26 = arith.constant 0 : index
    %c0_27 = arith.constant 0 : index
    %53 = vector.load %arg8[%c0_26, %c0_27] : memref<8x128xf32, #tpu.memory_space<vmem>>, vector<8x128xf32>
    %54 = arith.truncf %53 : vector<8x128xf32> to vector<8x128xbf16>
    %c0_28 = arith.constant 0 : index
    %c0_29 = arith.constant 0 : index
    %55 = vector.load %arg4[%c0_28, %c0_29] : memref<128x384xbf16, #tpu.memory_space<vmem>>, vector<128x384xbf16>
    %cst_30 = arith.constant dense<0.000000e+00> : vector<8x384xf32>
    %56 = tpu.matmul %54, %55, %cst_30 {dimension_numbers = #tpu.dot_dimension_numbers<[1], [0], [0], [1], [0, 0, 1, 1], [], []>} : vector<8x128xbf16>, vector<128x384xbf16>, vector<8x384xf32> -> vector<8x384xf32>
    %57 = arith.index_cast %c1_i32 : i32 to index
    %c0_31 = arith.constant 0 : index
    %c0_32 = arith.constant 0 : index
    %58 = vector.load %arg9[%57, %c0_31, %c0_32] : memref<8x8x384xf32, #tpu.memory_space<vmem>>, vector<1x8x384xf32>
    %59 = vector.shape_cast %58 : vector<1x8x384xf32> to vector<8x384xf32>
    %60 = vector.extract_strided_slice %59 {offsets = [0, 0], sizes = [8, 128], strides = [1, 1]} : vector<8x384xf32> to vector<8x128xf32>
    %61 = vector.extract_strided_slice %56 {offsets = [0, 0], sizes = [8, 128], strides = [1, 1]} : vector<8x384xf32> to vector<8x128xf32>
    %62 = arith.addf %60, %61 : vector<8x128xf32>
    %63 = arith.negf %62 : vector<8x128xf32>
    %64 = math.exp %63 : vector<8x128xf32>
    %cst_33 = arith.constant 1.000000e+00 : f32
    %65 = vector.broadcast %cst_33 : f32 to vector<8x128xf32>
    %66 = arith.addf %65, %64 : vector<8x128xf32>
    %67 = arith.divf %65, %66 : vector<8x128xf32>
    %68 = vector.extract_strided_slice %59 {offsets = [0, 128], sizes = [8, 128], strides = [1, 1]} : vector<8x384xf32> to vector<8x128xf32>
    %69 = vector.extract_strided_slice %56 {offsets = [0, 128], sizes = [8, 128], strides = [1, 1]} : vector<8x384xf32> to vector<8x128xf32>
    %70 = arith.addf %68, %69 : vector<8x128xf32>
    %71 = arith.negf %70 : vector<8x128xf32>
    %72 = math.exp %71 : vector<8x128xf32>
    %cst_34 = arith.constant 1.000000e+00 : f32
    %73 = vector.broadcast %cst_34 : f32 to vector<8x128xf32>
    %74 = arith.addf %73, %72 : vector<8x128xf32>
    %75 = arith.divf %73, %74 : vector<8x128xf32>
    %76 = vector.extract_strided_slice %59 {offsets = [0, 256], sizes = [8, 128], strides = [1, 1]} : vector<8x384xf32> to vector<8x128xf32>
    %77 = vector.extract_strided_slice %56 {offsets = [0, 256], sizes = [8, 128], strides = [1, 1]} : vector<8x384xf32> to vector<8x128xf32>
    %78 = arith.addf %77, %13 : vector<8x128xf32>
    %79 = arith.mulf %67, %78 : vector<8x128xf32>
    %80 = arith.addf %76, %79 : vector<8x128xf32>
    %81 = math.tanh %80 : vector<8x128xf32>
    %cst_35 = arith.constant 1.000000e+00 : f32
    %82 = vector.broadcast %cst_35 : f32 to vector<8x128xf32>
    %83 = arith.subf %82, %75 : vector<8x128xf32>
    %84 = arith.mulf %83, %81 : vector<8x128xf32>
    %85 = arith.mulf %75, %53 : vector<8x128xf32>
    %86 = arith.addf %84, %85 : vector<8x128xf32>
    %c0_36 = arith.constant 0 : index
    %c0_37 = arith.constant 0 : index
    %87 = vector.load %arg8[%c0_36, %c0_37] : memref<8x128xf32, #tpu.memory_space<vmem>>, vector<8x128xf32>
    tpu.vector_store %arg8[%c0_36, %c0_37], %86 {strides = array<i32>} : memref<8x128xf32, #tpu.memory_space<vmem>>, vector<8x128xf32>,
    %88 = arith.index_cast %c1_i32 : i32 to index
    %c0_38 = arith.constant 0 : index
    %c0_39 = arith.constant 0 : index
    %89 = vector.load %arg10[%88, %c0_38, %c0_39] : memref<8x8x128xf32, #tpu.memory_space<vmem>>, vector<1x8x128xf32>
    %90 = vector.shape_cast %89 : vector<1x8x128xf32> to vector<8x128xf32>
    %91 = vector.shape_cast %86 : vector<8x128xf32> to vector<1x8x128xf32>
    tpu.vector_store %arg10[%88, %c0_38, %c0_39], %91 {strides = array<i32>} : memref<8x8x128xf32, #tpu.memory_space<vmem>>, vector<1x8x128xf32>,
    %c2_i32 = arith.constant 2 : i32
    %c0_40 = arith.constant 0 : index
    %c0_41 = arith.constant 0 : index
    %92 = vector.load %arg8[%c0_40, %c0_41] : memref<8x128xf32, #tpu.memory_space<vmem>>, vector<8x128xf32>
    %93 = arith.truncf %92 : vector<8x128xf32> to vector<8x128xbf16>
    %c0_42 = arith.constant 0 : index
    %c0_43 = arith.constant 0 : index
    %94 = vector.load %arg4[%c0_42, %c0_43] : memref<128x384xbf16, #tpu.memory_space<vmem>>, vector<128x384xbf16>
    %cst_44 = arith.constant dense<0.000000e+00> : vector<8x384xf32>
    %95 = tpu.matmul %93, %94, %cst_44 {dimension_numbers = #tpu.dot_dimension_numbers<[1], [0], [0], [1], [0, 0, 1, 1], [], []>} : vector<8x128xbf16>, vector<128x384xbf16>, vector<8x384xf32> -> vector<8x384xf32>
    %96 = arith.index_cast %c2_i32 : i32 to index
    %c0_45 = arith.constant 0 : index
    %c0_46 = arith.constant 0 : index
    %97 = vector.load %arg9[%96, %c0_45, %c0_46] : memref<8x8x384xf32, #tpu.memory_space<vmem>>, vector<1x8x384xf32>
    %98 = vector.shape_cast %97 : vector<1x8x384xf32> to vector<8x384xf32>
    %99 = vector.extract_strided_slice %98 {offsets = [0, 0], sizes = [8, 128], strides = [1, 1]} : vector<8x384xf32> to vector<8x128xf32>
    %100 = vector.extract_strided_slice %95 {offsets = [0, 0], sizes = [8, 128], strides = [1, 1]} : vector<8x384xf32> to vector<8x128xf32>
    %101 = arith.addf %99, %100 : vector<8x128xf32>
    %102 = arith.negf %101 : vector<8x128xf32>
    %103 = math.exp %102 : vector<8x128xf32>
    %cst_47 = arith.constant 1.000000e+00 : f32
    %104 = vector.broadcast %cst_47 : f32 to vector<8x128xf32>
    %105 = arith.addf %104, %103 : vector<8x128xf32>
    %106 = arith.divf %104, %105 : vector<8x128xf32>
    %107 = vector.extract_strided_slice %98 {offsets = [0, 128], sizes = [8, 128], strides = [1, 1]} : vector<8x384xf32> to vector<8x128xf32>
    %108 = vector.extract_strided_slice %95 {offsets = [0, 128], sizes = [8, 128], strides = [1, 1]} : vector<8x384xf32> to vector<8x128xf32>
    %109 = arith.addf %107, %108 : vector<8x128xf32>
    %110 = arith.negf %109 : vector<8x128xf32>
    %111 = math.exp %110 : vector<8x128xf32>
    %cst_48 = arith.constant 1.000000e+00 : f32
    %112 = vector.broadcast %cst_48 : f32 to vector<8x128xf32>
    %113 = arith.addf %112, %111 : vector<8x128xf32>
    %114 = arith.divf %112, %113 : vector<8x128xf32>
    %115 = vector.extract_strided_slice %98 {offsets = [0, 256], sizes = [8, 128], strides = [1, 1]} : vector<8x384xf32> to vector<8x128xf32>
    %116 = vector.extract_strided_slice %95 {offsets = [0, 256], sizes = [8, 128], strides = [1, 1]} : vector<8x384xf32> to vector<8x128xf32>
    %117 = arith.addf %116, %13 : vector<8x128xf32>
    %118 = arith.mulf %106, %117 : vector<8x128xf32>
    %119 = arith.addf %115, %118 : vector<8x128xf32>
    %120 = math.tanh %119 : vector<8x128xf32>
    %cst_49 = arith.constant 1.000000e+00 : f32
    %121 = vector.broadcast %cst_49 : f32 to vector<8x128xf32>
    %122 = arith.subf %121, %114 : vector<8x128xf32>
    %123 = arith.mulf %122, %120 : vector<8x128xf32>
    %124 = arith.mulf %114, %92 : vector<8x128xf32>
    %125 = arith.addf %123, %124 : vector<8x128xf32>
    %c0_50 = arith.constant 0 : index
    %c0_51 = arith.constant 0 : index
    %126 = vector.load %arg8[%c0_50, %c0_51] : memref<8x128xf32, #tpu.memory_space<vmem>>, vector<8x128xf32>
    tpu.vector_store %arg8[%c0_50, %c0_51], %125 {strides = array<i32>} : memref<8x128xf32, #tpu.memory_space<vmem>>, vector<8x128xf32>,
    %127 = arith.index_cast %c2_i32 : i32 to index
    %c0_52 = arith.constant 0 : index
    %c0_53 = arith.constant 0 : index
    %128 = vector.load %arg10[%127, %c0_52, %c0_53] : memref<8x8x128xf32, #tpu.memory_space<vmem>>, vector<1x8x128xf32>
    %129 = vector.shape_cast %128 : vector<1x8x128xf32> to vector<8x128xf32>
    %130 = vector.shape_cast %125 : vector<8x128xf32> to vector<1x8x128xf32>
    tpu.vector_store %arg10[%127, %c0_52, %c0_53], %130 {strides = array<i32>} : memref<8x8x128xf32, #tpu.memory_space<vmem>>, vector<1x8x128xf32>,
    %c3_i32 = arith.constant 3 : i32
    %c0_54 = arith.constant 0 : index
    %c0_55 = arith.constant 0 : index
    %131 = vector.load %arg8[%c0_54, %c0_55] : memref<8x128xf32, #tpu.memory_space<vmem>>, vector<8x128xf32>
    %132 = arith.truncf %131 : vector<8x128xf32> to vector<8x128xbf16>
    %c0_56 = arith.constant 0 : index
    %c0_57 = arith.constant 0 : index
    %133 = vector.load %arg4[%c0_56, %c0_57] : memref<128x384xbf16, #tpu.memory_space<vmem>>, vector<128x384xbf16>
    %cst_58 = arith.constant dense<0.000000e+00> : vector<8x384xf32>
    %134 = tpu.matmul %132, %133, %cst_58 {dimension_numbers = #tpu.dot_dimension_numbers<[1], [0], [0], [1], [0, 0, 1, 1], [], []>} : vector<8x128xbf16>, vector<128x384xbf16>, vector<8x384xf32> -> vector<8x384xf32>
    %135 = arith.index_cast %c3_i32 : i32 to index
    %c0_59 = arith.constant 0 : index
    %c0_60 = arith.constant 0 : index
    %136 = vector.load %arg9[%135, %c0_59, %c0_60] : memref<8x8x384xf32, #tpu.memory_space<vmem>>, vector<1x8x384xf32>
    %137 = vector.shape_cast %136 : vector<1x8x384xf32> to vector<8x384xf32>
    %138 = vector.extract_strided_slice %137 {offsets = [0, 0], sizes = [8, 128], strides = [1, 1]} : vector<8x384xf32> to vector<8x128xf32>
    %139 = vector.extract_strided_slice %134 {offsets = [0, 0], sizes = [8, 128], strides = [1, 1]} : vector<8x384xf32> to vector<8x128xf32>
    %140 = arith.addf %138, %139 : vector<8x128xf32>
    %141 = arith.negf %140 : vector<8x128xf32>
    %142 = math.exp %141 : vector<8x128xf32>
    %cst_61 = arith.constant 1.000000e+00 : f32
    %143 = vector.broadcast %cst_61 : f32 to vector<8x128xf32>
    %144 = arith.addf %143, %142 : vector<8x128xf32>
    %145 = arith.divf %143, %144 : vector<8x128xf32>
    %146 = vector.extract_strided_slice %137 {offsets = [0, 128], sizes = [8, 128], strides = [1, 1]} : vector<8x384xf32> to vector<8x128xf32>
    %147 = vector.extract_strided_slice %134 {offsets = [0, 128], sizes = [8, 128], strides = [1, 1]} : vector<8x384xf32> to vector<8x128xf32>
    %148 = arith.addf %146, %147 : vector<8x128xf32>
    %149 = arith.negf %148 : vector<8x128xf32>
    %150 = math.exp %149 : vector<8x128xf32>
    %cst_62 = arith.constant 1.000000e+00 : f32
    %151 = vector.broadcast %cst_62 : f32 to vector<8x128xf32>
    %152 = arith.addf %151, %150 : vector<8x128xf32>
    %153 = arith.divf %151, %152 : vector<8x128xf32>
    %154 = vector.extract_strided_slice %137 {offsets = [0, 256], sizes = [8, 128], strides = [1, 1]} : vector<8x384xf32> to vector<8x128xf32>
    %155 = vector.extract_strided_slice %134 {offsets = [0, 256], sizes = [8, 128], strides = [1, 1]} : vector<8x384xf32> to vector<8x128xf32>
    %156 = arith.addf %155, %13 : vector<8x128xf32>
    %157 = arith.mulf %145, %156 : vector<8x128xf32>
    %158 = arith.addf %154, %157 : vector<8x128xf32>
    %159 = math.tanh %158 : vector<8x128xf32>
    %cst_63 = arith.constant 1.000000e+00 : f32
    %160 = vector.broadcast %cst_63 : f32 to vector<8x128xf32>
    %161 = arith.subf %160, %153 : vector<8x128xf32>
    %162 = arith.mulf %161, %159 : vector<8x128xf32>
    %163 = arith.mulf %153, %131 : vector<8x128xf32>
    %164 = arith.addf %162, %163 : vector<8x128xf32>
    %c0_64 = arith.constant 0 : index
    %c0_65 = arith.constant 0 : index
    %165 = vector.load %arg8[%c0_64, %c0_65] : memref<8x128xf32, #tpu.memory_space<vmem>>, vector<8x128xf32>
    tpu.vector_store %arg8[%c0_64, %c0_65], %164 {strides = array<i32>} : memref<8x128xf32, #tpu.memory_space<vmem>>, vector<8x128xf32>,
    %166 = arith.index_cast %c3_i32 : i32 to index
    %c0_66 = arith.constant 0 : index
    %c0_67 = arith.constant 0 : index
    %167 = vector.load %arg10[%166, %c0_66, %c0_67] : memref<8x8x128xf32, #tpu.memory_space<vmem>>, vector<1x8x128xf32>
    %168 = vector.shape_cast %167 : vector<1x8x128xf32> to vector<8x128xf32>
    %169 = vector.shape_cast %164 : vector<8x128xf32> to vector<1x8x128xf32>
    tpu.vector_store %arg10[%166, %c0_66, %c0_67], %169 {strides = array<i32>} : memref<8x8x128xf32, #tpu.memory_space<vmem>>, vector<1x8x128xf32>,
    %c4_i32 = arith.constant 4 : i32
    %c0_68 = arith.constant 0 : index
    %c0_69 = arith.constant 0 : index
    %170 = vector.load %arg8[%c0_68, %c0_69] : memref<8x128xf32, #tpu.memory_space<vmem>>, vector<8x128xf32>
    %171 = arith.truncf %170 : vector<8x128xf32> to vector<8x128xbf16>
    %c0_70 = arith.constant 0 : index
    %c0_71 = arith.constant 0 : index
    %172 = vector.load %arg4[%c0_70, %c0_71] : memref<128x384xbf16, #tpu.memory_space<vmem>>, vector<128x384xbf16>
    %cst_72 = arith.constant dense<0.000000e+00> : vector<8x384xf32>
    %173 = tpu.matmul %171, %172, %cst_72 {dimension_numbers = #tpu.dot_dimension_numbers<[1], [0], [0], [1], [0, 0, 1, 1], [], []>} : vector<8x128xbf16>, vector<128x384xbf16>, vector<8x384xf32> -> vector<8x384xf32>
    %174 = arith.index_cast %c4_i32 : i32 to index
    %c0_73 = arith.constant 0 : index
    %c0_74 = arith.constant 0 : index
    %175 = vector.load %arg9[%174, %c0_73, %c0_74] : memref<8x8x384xf32, #tpu.memory_space<vmem>>, vector<1x8x384xf32>
    %176 = vector.shape_cast %175 : vector<1x8x384xf32> to vector<8x384xf32>
    %177 = vector.extract_strided_slice %176 {offsets = [0, 0], sizes = [8, 128], strides = [1, 1]} : vector<8x384xf32> to vector<8x128xf32>
    %178 = vector.extract_strided_slice %173 {offsets = [0, 0], sizes = [8, 128], strides = [1, 1]} : vector<8x384xf32> to vector<8x128xf32>
    %179 = arith.addf %177, %178 : vector<8x128xf32>
    %180 = arith.negf %179 : vector<8x128xf32>
    %181 = math.exp %180 : vector<8x128xf32>
    %cst_75 = arith.constant 1.000000e+00 : f32
    %182 = vector.broadcast %cst_75 : f32 to vector<8x128xf32>
    %183 = arith.addf %182, %181 : vector<8x128xf32>
    %184 = arith.divf %182, %183 : vector<8x128xf32>
    %185 = vector.extract_strided_slice %176 {offsets = [0, 128], sizes = [8, 128], strides = [1, 1]} : vector<8x384xf32> to vector<8x128xf32>
    %186 = vector.extract_strided_slice %173 {offsets = [0, 128], sizes = [8, 128], strides = [1, 1]} : vector<8x384xf32> to vector<8x128xf32>
    %187 = arith.addf %185, %186 : vector<8x128xf32>
    %188 = arith.negf %187 : vector<8x128xf32>
    %189 = math.exp %188 : vector<8x128xf32>
    %cst_76 = arith.constant 1.000000e+00 : f32
    %190 = vector.broadcast %cst_76 : f32 to vector<8x128xf32>
    %191 = arith.addf %190, %189 : vector<8x128xf32>
    %192 = arith.divf %190, %191 : vector<8x128xf32>
    %193 = vector.extract_strided_slice %176 {offsets = [0, 256], sizes = [8, 128], strides = [1, 1]} : vector<8x384xf32> to vector<8x128xf32>
    %194 = vector.extract_strided_slice %173 {offsets = [0, 256], sizes = [8, 128], strides = [1, 1]} : vector<8x384xf32> to vector<8x128xf32>
    %195 = arith.addf %194, %13 : vector<8x128xf32>
    %196 = arith.mulf %184, %195 : vector<8x128xf32>
    %197 = arith.addf %193, %196 : vector<8x128xf32>
    %198 = math.tanh %197 : vector<8x128xf32>
    %cst_77 = arith.constant 1.000000e+00 : f32
    %199 = vector.broadcast %cst_77 : f32 to vector<8x128xf32>
    %200 = arith.subf %199, %192 : vector<8x128xf32>
    %201 = arith.mulf %200, %198 : vector<8x128xf32>
    %202 = arith.mulf %192, %170 : vector<8x128xf32>
    %203 = arith.addf %201, %202 : vector<8x128xf32>
    %c0_78 = arith.constant 0 : index
    %c0_79 = arith.constant 0 : index
    %204 = vector.load %arg8[%c0_78, %c0_79] : memref<8x128xf32, #tpu.memory_space<vmem>>, vector<8x128xf32>
    tpu.vector_store %arg8[%c0_78, %c0_79], %203 {strides = array<i32>} : memref<8x128xf32, #tpu.memory_space<vmem>>, vector<8x128xf32>,
    %205 = arith.index_cast %c4_i32 : i32 to index
    %c0_80 = arith.constant 0 : index
    %c0_81 = arith.constant 0 : index
    %206 = vector.load %arg10[%205, %c0_80, %c0_81] : memref<8x8x128xf32, #tpu.memory_space<vmem>>, vector<1x8x128xf32>
    %207 = vector.shape_cast %206 : vector<1x8x128xf32> to vector<8x128xf32>
    %208 = vector.shape_cast %203 : vector<8x128xf32> to vector<1x8x128xf32>
    tpu.vector_store %arg10[%205, %c0_80, %c0_81], %208 {strides = array<i32>} : memref<8x8x128xf32, #tpu.memory_space<vmem>>, vector<1x8x128xf32>,
    %c5_i32 = arith.constant 5 : i32
    %c0_82 = arith.constant 0 : index
    %c0_83 = arith.constant 0 : index
    %209 = vector.load %arg8[%c0_82, %c0_83] : memref<8x128xf32, #tpu.memory_space<vmem>>, vector<8x128xf32>
    %210 = arith.truncf %209 : vector<8x128xf32> to vector<8x128xbf16>
    %c0_84 = arith.constant 0 : index
    %c0_85 = arith.constant 0 : index
    %211 = vector.load %arg4[%c0_84, %c0_85] : memref<128x384xbf16, #tpu.memory_space<vmem>>, vector<128x384xbf16>
    %cst_86 = arith.constant dense<0.000000e+00> : vector<8x384xf32>
    %212 = tpu.matmul %210, %211, %cst_86 {dimension_numbers = #tpu.dot_dimension_numbers<[1], [0], [0], [1], [0, 0, 1, 1], [], []>} : vector<8x128xbf16>, vector<128x384xbf16>, vector<8x384xf32> -> vector<8x384xf32>
    %213 = arith.index_cast %c5_i32 : i32 to index
    %c0_87 = arith.constant 0 : index
    %c0_88 = arith.constant 0 : index
    %214 = vector.load %arg9[%213, %c0_87, %c0_88] : memref<8x8x384xf32, #tpu.memory_space<vmem>>, vector<1x8x384xf32>
    %215 = vector.shape_cast %214 : vector<1x8x384xf32> to vector<8x384xf32>
    %216 = vector.extract_strided_slice %215 {offsets = [0, 0], sizes = [8, 128], strides = [1, 1]} : vector<8x384xf32> to vector<8x128xf32>
    %217 = vector.extract_strided_slice %212 {offsets = [0, 0], sizes = [8, 128], strides = [1, 1]} : vector<8x384xf32> to vector<8x128xf32>
    %218 = arith.addf %216, %217 : vector<8x128xf32>
    %219 = arith.negf %218 : vector<8x128xf32>
    %220 = math.exp %219 : vector<8x128xf32>
    %cst_89 = arith.constant 1.000000e+00 : f32
    %221 = vector.broadcast %cst_89 : f32 to vector<8x128xf32>
    %222 = arith.addf %221, %220 : vector<8x128xf32>
    %223 = arith.divf %221, %222 : vector<8x128xf32>
    %224 = vector.extract_strided_slice %215 {offsets = [0, 128], sizes = [8, 128], strides = [1, 1]} : vector<8x384xf32> to vector<8x128xf32>
    %225 = vector.extract_strided_slice %212 {offsets = [0, 128], sizes = [8, 128], strides = [1, 1]} : vector<8x384xf32> to vector<8x128xf32>
    %226 = arith.addf %224, %225 : vector<8x128xf32>
    %227 = arith.negf %226 : vector<8x128xf32>
    %228 = math.exp %227 : vector<8x128xf32>
    %cst_90 = arith.constant 1.000000e+00 : f32
    %229 = vector.broadcast %cst_90 : f32 to vector<8x128xf32>
    %230 = arith.addf %229, %228 : vector<8x128xf32>
    %231 = arith.divf %229, %230 : vector<8x128xf32>
    %232 = vector.extract_strided_slice %215 {offsets = [0, 256], sizes = [8, 128], strides = [1, 1]} : vector<8x384xf32> to vector<8x128xf32>
    %233 = vector.extract_strided_slice %212 {offsets = [0, 256], sizes = [8, 128], strides = [1, 1]} : vector<8x384xf32> to vector<8x128xf32>
    %234 = arith.addf %233, %13 : vector<8x128xf32>
    %235 = arith.mulf %223, %234 : vector<8x128xf32>
    %236 = arith.addf %232, %235 : vector<8x128xf32>
    %237 = math.tanh %236 : vector<8x128xf32>
    %cst_91 = arith.constant 1.000000e+00 : f32
    %238 = vector.broadcast %cst_91 : f32 to vector<8x128xf32>
    %239 = arith.subf %238, %231 : vector<8x128xf32>
    %240 = arith.mulf %239, %237 : vector<8x128xf32>
    %241 = arith.mulf %231, %209 : vector<8x128xf32>
    %242 = arith.addf %240, %241 : vector<8x128xf32>
    %c0_92 = arith.constant 0 : index
    %c0_93 = arith.constant 0 : index
    %243 = vector.load %arg8[%c0_92, %c0_93] : memref<8x128xf32, #tpu.memory_space<vmem>>, vector<8x128xf32>
    tpu.vector_store %arg8[%c0_92, %c0_93], %242 {strides = array<i32>} : memref<8x128xf32, #tpu.memory_space<vmem>>, vector<8x128xf32>,
    %244 = arith.index_cast %c5_i32 : i32 to index
    %c0_94 = arith.constant 0 : index
    %c0_95 = arith.constant 0 : index
    %245 = vector.load %arg10[%244, %c0_94, %c0_95] : memref<8x8x128xf32, #tpu.memory_space<vmem>>, vector<1x8x128xf32>
    %246 = vector.shape_cast %245 : vector<1x8x128xf32> to vector<8x128xf32>
    %247 = vector.shape_cast %242 : vector<8x128xf32> to vector<1x8x128xf32>
    tpu.vector_store %arg10[%244, %c0_94, %c0_95], %247 {strides = array<i32>} : memref<8x8x128xf32, #tpu.memory_space<vmem>>, vector<1x8x128xf32>,
    %c6_i32 = arith.constant 6 : i32
    %c0_96 = arith.constant 0 : index
    %c0_97 = arith.constant 0 : index
    %248 = vector.load %arg8[%c0_96, %c0_97] : memref<8x128xf32, #tpu.memory_space<vmem>>, vector<8x128xf32>
    %249 = arith.truncf %248 : vector<8x128xf32> to vector<8x128xbf16>
    %c0_98 = arith.constant 0 : index
    %c0_99 = arith.constant 0 : index
    %250 = vector.load %arg4[%c0_98, %c0_99] : memref<128x384xbf16, #tpu.memory_space<vmem>>, vector<128x384xbf16>
    %cst_100 = arith.constant dense<0.000000e+00> : vector<8x384xf32>
    %251 = tpu.matmul %249, %250, %cst_100 {dimension_numbers = #tpu.dot_dimension_numbers<[1], [0], [0], [1], [0, 0, 1, 1], [], []>} : vector<8x128xbf16>, vector<128x384xbf16>, vector<8x384xf32> -> vector<8x384xf32>
    %252 = arith.index_cast %c6_i32 : i32 to index
    %c0_101 = arith.constant 0 : index
    %c0_102 = arith.constant 0 : index
    %253 = vector.load %arg9[%252, %c0_101, %c0_102] : memref<8x8x384xf32, #tpu.memory_space<vmem>>, vector<1x8x384xf32>
    %254 = vector.shape_cast %253 : vector<1x8x384xf32> to vector<8x384xf32>
    %255 = vector.extract_strided_slice %254 {offsets = [0, 0], sizes = [8, 128], strides = [1, 1]} : vector<8x384xf32> to vector<8x128xf32>
    %256 = vector.extract_strided_slice %251 {offsets = [0, 0], sizes = [8, 128], strides = [1, 1]} : vector<8x384xf32> to vector<8x128xf32>
    %257 = arith.addf %255, %256 : vector<8x128xf32>
    %258 = arith.negf %257 : vector<8x128xf32>
    %259 = math.exp %258 : vector<8x128xf32>
    %cst_103 = arith.constant 1.000000e+00 : f32
    %260 = vector.broadcast %cst_103 : f32 to vector<8x128xf32>
    %261 = arith.addf %260, %259 : vector<8x128xf32>
    %262 = arith.divf %260, %261 : vector<8x128xf32>
    %263 = vector.extract_strided_slice %254 {offsets = [0, 128], sizes = [8, 128], strides = [1, 1]} : vector<8x384xf32> to vector<8x128xf32>
    %264 = vector.extract_strided_slice %251 {offsets = [0, 128], sizes = [8, 128], strides = [1, 1]} : vector<8x384xf32> to vector<8x128xf32>
    %265 = arith.addf %263, %264 : vector<8x128xf32>
    %266 = arith.negf %265 : vector<8x128xf32>
    %267 = math.exp %266 : vector<8x128xf32>
    %cst_104 = arith.constant 1.000000e+00 : f32
    %268 = vector.broadcast %cst_104 : f32 to vector<8x128xf32>
    %269 = arith.addf %268, %267 : vector<8x128xf32>
    %270 = arith.divf %268, %269 : vector<8x128xf32>
    %271 = vector.extract_strided_slice %254 {offsets = [0, 256], sizes = [8, 128], strides = [1, 1]} : vector<8x384xf32> to vector<8x128xf32>
    %272 = vector.extract_strided_slice %251 {offsets = [0, 256], sizes = [8, 128], strides = [1, 1]} : vector<8x384xf32> to vector<8x128xf32>
    %273 = arith.addf %272, %13 : vector<8x128xf32>
    %274 = arith.mulf %262, %273 : vector<8x128xf32>
    %275 = arith.addf %271, %274 : vector<8x128xf32>
    %276 = math.tanh %275 : vector<8x128xf32>
    %cst_105 = arith.constant 1.000000e+00 : f32
    %277 = vector.broadcast %cst_105 : f32 to vector<8x128xf32>
    %278 = arith.subf %277, %270 : vector<8x128xf32>
    %279 = arith.mulf %278, %276 : vector<8x128xf32>
    %280 = arith.mulf %270, %248 : vector<8x128xf32>
    %281 = arith.addf %279, %280 : vector<8x128xf32>
    %c0_106 = arith.constant 0 : index
    %c0_107 = arith.constant 0 : index
    %282 = vector.load %arg8[%c0_106, %c0_107] : memref<8x128xf32, #tpu.memory_space<vmem>>, vector<8x128xf32>
    tpu.vector_store %arg8[%c0_106, %c0_107], %281 {strides = array<i32>} : memref<8x128xf32, #tpu.memory_space<vmem>>, vector<8x128xf32>,
    %283 = arith.index_cast %c6_i32 : i32 to index
    %c0_108 = arith.constant 0 : index
    %c0_109 = arith.constant 0 : index
    %284 = vector.load %arg10[%283, %c0_108, %c0_109] : memref<8x8x128xf32, #tpu.memory_space<vmem>>, vector<1x8x128xf32>
    %285 = vector.shape_cast %284 : vector<1x8x128xf32> to vector<8x128xf32>
    %286 = vector.shape_cast %281 : vector<8x128xf32> to vector<1x8x128xf32>
    tpu.vector_store %arg10[%283, %c0_108, %c0_109], %286 {strides = array<i32>} : memref<8x8x128xf32, #tpu.memory_space<vmem>>, vector<1x8x128xf32>,
    %c7_i32 = arith.constant 7 : i32
    %c0_110 = arith.constant 0 : index
    %c0_111 = arith.constant 0 : index
    %287 = vector.load %arg8[%c0_110, %c0_111] : memref<8x128xf32, #tpu.memory_space<vmem>>, vector<8x128xf32>
    %288 = arith.truncf %287 : vector<8x128xf32> to vector<8x128xbf16>
    %c0_112 = arith.constant 0 : index
    %c0_113 = arith.constant 0 : index
    %289 = vector.load %arg4[%c0_112, %c0_113] : memref<128x384xbf16, #tpu.memory_space<vmem>>, vector<128x384xbf16>
    %cst_114 = arith.constant dense<0.000000e+00> : vector<8x384xf32>
    %290 = tpu.matmul %288, %289, %cst_114 {dimension_numbers = #tpu.dot_dimension_numbers<[1], [0], [0], [1], [0, 0, 1, 1], [], []>} : vector<8x128xbf16>, vector<128x384xbf16>, vector<8x384xf32> -> vector<8x384xf32>
    %291 = arith.index_cast %c7_i32 : i32 to index
    %c0_115 = arith.constant 0 : index
    %c0_116 = arith.constant 0 : index
    %292 = vector.load %arg9[%291, %c0_115, %c0_116] : memref<8x8x384xf32, #tpu.memory_space<vmem>>, vector<1x8x384xf32>
    %293 = vector.shape_cast %292 : vector<1x8x384xf32> to vector<8x384xf32>
    %294 = vector.extract_strided_slice %293 {offsets = [0, 0], sizes = [8, 128], strides = [1, 1]} : vector<8x384xf32> to vector<8x128xf32>
    %295 = vector.extract_strided_slice %290 {offsets = [0, 0], sizes = [8, 128], strides = [1, 1]} : vector<8x384xf32> to vector<8x128xf32>
    %296 = arith.addf %294, %295 : vector<8x128xf32>
    %297 = arith.negf %296 : vector<8x128xf32>
    %298 = math.exp %297 : vector<8x128xf32>
    %cst_117 = arith.constant 1.000000e+00 : f32
    %299 = vector.broadcast %cst_117 : f32 to vector<8x128xf32>
    %300 = arith.addf %299, %298 : vector<8x128xf32>
    %301 = arith.divf %299, %300 : vector<8x128xf32>
    %302 = vector.extract_strided_slice %293 {offsets = [0, 128], sizes = [8, 128], strides = [1, 1]} : vector<8x384xf32> to vector<8x128xf32>
    %303 = vector.extract_strided_slice %290 {offsets = [0, 128], sizes = [8, 128], strides = [1, 1]} : vector<8x384xf32> to vector<8x128xf32>
    %304 = arith.addf %302, %303 : vector<8x128xf32>
    %305 = arith.negf %304 : vector<8x128xf32>
    %306 = math.exp %305 : vector<8x128xf32>
    %cst_118 = arith.constant 1.000000e+00 : f32
    %307 = vector.broadcast %cst_118 : f32 to vector<8x128xf32>
    %308 = arith.addf %307, %306 : vector<8x128xf32>
    %309 = arith.divf %307, %308 : vector<8x128xf32>
    %310 = vector.extract_strided_slice %293 {offsets = [0, 256], sizes = [8, 128], strides = [1, 1]} : vector<8x384xf32> to vector<8x128xf32>
    %311 = vector.extract_strided_slice %290 {offsets = [0, 256], sizes = [8, 128], strides = [1, 1]} : vector<8x384xf32> to vector<8x128xf32>
    %312 = arith.addf %311, %13 : vector<8x128xf32>
    %313 = arith.mulf %301, %312 : vector<8x128xf32>
    %314 = arith.addf %310, %313 : vector<8x128xf32>
    %315 = math.tanh %314 : vector<8x128xf32>
    %cst_119 = arith.constant 1.000000e+00 : f32
    %316 = vector.broadcast %cst_119 : f32 to vector<8x128xf32>
    %317 = arith.subf %316, %309 : vector<8x128xf32>
    %318 = arith.mulf %317, %315 : vector<8x128xf32>
    %319 = arith.mulf %309, %287 : vector<8x128xf32>
    %320 = arith.addf %318, %319 : vector<8x128xf32>
    %c0_120 = arith.constant 0 : index
    %c0_121 = arith.constant 0 : index
    %321 = vector.load %arg8[%c0_120, %c0_121] : memref<8x128xf32, #tpu.memory_space<vmem>>, vector<8x128xf32>
    tpu.vector_store %arg8[%c0_120, %c0_121], %320 {strides = array<i32>} : memref<8x128xf32, #tpu.memory_space<vmem>>, vector<8x128xf32>,
    %322 = arith.index_cast %c7_i32 : i32 to index
    %c0_122 = arith.constant 0 : index
    %c0_123 = arith.constant 0 : index
    %323 = vector.load %arg10[%322, %c0_122, %c0_123] : memref<8x8x128xf32, #tpu.memory_space<vmem>>, vector<1x8x128xf32>
    %324 = vector.shape_cast %323 : vector<1x8x128xf32> to vector<8x128xf32>
    %325 = vector.shape_cast %320 : vector<8x128xf32> to vector<1x8x128xf32>
    tpu.vector_store %arg10[%322, %c0_122, %c0_123], %325 {strides = array<i32>} : memref<8x8x128xf32, #tpu.memory_space<vmem>>, vector<1x8x128xf32>,
    %c8_i32 = arith.constant 8 : i32
    %c0_124 = arith.constant 0 : index
    %c0_125 = arith.constant 0 : index
    %c0_126 = arith.constant 0 : index
    %326 = vector.load %arg10[%c0_124, %c0_125, %c0_126] : memref<8x8x128xf32, #tpu.memory_space<vmem>>, vector<8x8x128xf32>
    %327 = vector.shape_cast %326 : vector<8x8x128xf32> to vector<64x128xf32>
    %328 = arith.truncf %327 : vector<64x128xf32> to vector<64x128xbf16>
    %c0_127 = arith.constant 0 : index
    %c0_128 = arith.constant 0 : index
    %329 = vector.load %arg7[%c0_127, %c0_128] : memref<64x128xbf16, #tpu.memory_space<vmem>>, vector<64x128xbf16>
    tpu.vector_store %arg7[%c0_127, %c0_128], %328 {strides = array<i32>} : memref<64x128xbf16, #tpu.memory_space<vmem>>, vector<64x128xbf16>,
    return
  }
  func.func @transform_0(%arg0: i32) -> (i32, i32) {
    %c0_i32 = arith.constant 0 : i32
    %c0_i32_0 = arith.constant 0 : i32
    return %arg0, %c0_i32 : i32, i32
  }
  func.func @transform_1(%arg0: i32) -> (i32, i32) {
    %c0_i32 = arith.constant 0 : i32
    %c0_i32_0 = arith.constant 0 : i32
    %c0_i32_1 = arith.constant 0 : i32
    return %c0_i32, %c0_i32_0 : i32, i32
  }
  func.func @transform_2(%arg0: i32) -> (i32, i32) {
    %c0_i32 = arith.constant 0 : i32
    %c0_i32_0 = arith.constant 0 : i32
    %c0_i32_1 = arith.constant 0 : i32
    return %c0_i32, %c0_i32_0 : i32, i32
  }
  func.func @transform_3(%arg0: i32) -> (i32, i32) {
    %c0_i32 = arith.constant 0 : i32
    %c0_i32_0 = arith.constant 0 : i32
    %c0_i32_1 = arith.constant 0 : i32
    return %c0_i32, %c0_i32_0 : i32, i32
  }
  func.func @transform_4(%arg0: i32) -> (i32, i32) {
    %c0_i32 = arith.constant 0 : i32
    %c0_i32_0 = arith.constant 0 : i32
    %c0_i32_1 = arith.constant 0 : i32
    return %c0_i32, %c0_i32_0 : i32, i32
  }
  func.func @transform_5(%arg0: i32) -> (i32, i32) {
    %c0_i32 = arith.constant 0 : i32
    %c0_i32_0 = arith.constant 0 : i32
    %c0_i32_1 = arith.constant 0 : i32
    return %c0_i32, %c0_i32_0 : i32, i32
  }
  func.func @transform_6(%arg0: i32) -> (i32, i32) {
    %c0_i32 = arith.constant 0 : i32
    %c0_i32_0 = arith.constant 0 : i32
    return %arg0, %c0_i32 : i32, i32
  }
}

</mosaic_0001>

<bundles_post_ra>
// kernel: tpu_custom_call.1
= control target key start
LH: loop header
LB: loop body
LE: loop exit
PB: predicated region body
PF: predicated region fallthrough
CT: control target
= control target key end

     0   :  { %11 = vsyncpa [#allocation6], 0  ;;  %s4153_s0 = inlined_call_operand.hbm [shape: bf16[64,128], index: 0, kind: input, shape index: {}]   ;;  %s4154_s1 = inlined_call_operand.hbm [shape: bf16[128,384], index: 1, kind: input, shape index: {}]   ;;  %s4155_s2 = inlined_call_operand.hbm [shape: f32[1,384], index: 2, kind: input, shape index: {}]   ;;  %s4156_s3 = inlined_call_operand.hbm [shape: bf16[128,384], index: 3, kind: input, shape index: {}]   ;;  %s4157_s4 = inlined_call_operand.vmem [shape: f32[1,128], index: 4, kind: input, shape index: {}]   ;;  %s4158_s5 = inlined_call_operand.hbm [shape: f32[8,128], index: 5, kind: input, shape index: {}]   ;;  %s4159_s6 = inlined_call_operand.hbm [shape: bf16[64,128], index: 6, kind: output, shape index: {}]  }
   0x1   :  { %12 = vsyncpa [#allocation9], 0 }
   0x2   :  { %13 = vsyncpa [#allocation12], 0  ;;  %s32_s23 = sshll.u32 %s4154_s1, 4  ;;  %s33_s23 = int_to_ptr.hbm [resolvable:$true] %s32_s23 }
   0x3   :  { %14 = vsyncpa [#allocation7], 0  ;;  %s3893_s24 = smov [#allocation8]   ;;  %s56_s28 = sshll.u32 %s4156_s3, 4  ;;  %s57_s28 = int_to_ptr.hbm [resolvable:$true] %s56_s28 }
   0x4   :  { %s34_s25 = sshll.u32 %s3893_s24, 4  ;;  %s3894_s29 = smov 192   ;;  %s35_s25 = int_to_ptr.vmem [resolvable:$true] %s34_s25 }
   0x5   :  { %s3895_s30 = smov 12   ;;  %s3896_s7 = smov [#allocation11]  }
   0x6   :  { %40 = dma.hbm_to_vmem [thread:$0]  %s33_s23, 3072, %s35_s25, [#allocation9], %s3894_s29, %s3894_s29, %s3895_s30  }
   0x7   :  { %s58_s8 = sshll.u32 %s3896_s7, 4  ;;  %s19_s11 = sshll.u32 %s4153_s0, 4  ;;  %s59_s8 = int_to_ptr.vmem [resolvable:$true] %s58_s8  ;;  %s20_s11 = int_to_ptr.hbm [resolvable:$true] %s19_s11 }
   0x8   :  { %64 = dma.hbm_to_vmem [thread:$0]  %s57_s28, 3072, %s59_s8, [#allocation12], %s3894_s29, %s3894_s29, %s3895_s30  }
   0x9   :  { %s3897_s1 = smov [#allocation5]   ;;  %s46_s3 = sshll.u32 %s4155_s2, 4  ;;  %s47_s3 = int_to_ptr.hbm [resolvable:$true] %s46_s3 }
   0xa   :  { %s21_s12 = sshll.u32 %s3897_s1, 4  ;;  %s3898_s15 = smov 64   ;;  %s22_s12 = int_to_ptr.vmem [resolvable:$true] %s21_s12 }
   0xb   :  { %s3899_s16 = smov 4   ;;  %s3900_s17 = smov [#allocation10]  }
   0xc   :  { %27 = dma.hbm_to_vmem [thread:$0]  %s20_s11, 512, %s22_s12, [#allocation6], %s3898_s15, %s3898_s15, %s3899_s16  }
   0xd   :  { %s48_s18 = sshll.u32 %s3900_s17, 4  ;;  %s72_s20 = sshll.u32 %s4158_s5, 4  ;;  %s49_s18 = int_to_ptr.vmem [resolvable:$true] %s48_s18  ;;  %s73_s20 = int_to_ptr.hbm [resolvable:$true] %s72_s20 }
   0xe   :  { %51 = dma.hbm_to_vmem [thread:$0]  %s47_s3, 48, %s49_s18, [#allocation9]  }
   0xf   :  { %s3901_s21 = smov [#allocation13]  }
  0x10   :  { %s74_s22 = sshll.u32 %s3901_s21, 4  ;;  %s75_s22 = int_to_ptr.vmem [resolvable:$true] %s74_s22 }
  0x11   :  { %77 = dma.hbm_to_vmem [thread:$0]  %s73_s20, 128, %s75_s22, [#allocation12]  }
  0x12   :  { %3885 = dma.done.wait [#allocation6], 512  }
  0x13   :  { %3886 = vsyncadd [#allocation6], 4294966784 }
  0x14   :  { %3887 = dma.done.wait [#allocation9], 3120  }
  0x15   :  { %3888 = vsyncadd [#allocation9], 4294964176 }
  0x16   :  { %3889 = dma.done.wait [#allocation12], 3200  }
  0x17   :  { %3890 = vsyncadd [#allocation12], 4294964096  ;;  %v2612_v0 = vld [vmem:[#allocation8 + $0xa8] sm:$0xf]  ;;  %v3432_v1 = vld [vmem:[#allocation8 + $0xb0] sm:$0xf0] }
  0x18   :  { %v2708_v2 = vld [vmem:[#allocation11 + $0xa8] sm:$0xf]  ;;  %v2613_v3 = vor.u32 %v3432_v1, %v2612_v0  ;;  %v3456_v4 = vld [vmem:[#allocation11 + $0xb0] sm:$0xf0]  ;;  %v2600_v5 = vld [vmem:[#allocation8 + $0x90] sm:$0xf] }
  0x19   :  { %v3429_v6 = vld [vmem:[#allocation8 + $0x98] sm:$0xf0]  ;;  %v2709_v7 = vor.u32 %v3456_v4, %v2708_v2  ;;  %v2696_v8 = vld [vmem:[#allocation11 + $0x90] sm:$0xf]  ;;  %v3453_v9 = vld [vmem:[#allocation11 + $0x98] sm:$0xf0] }
  0x1a   :  { %304 = vmatpush.bf16.msra.mxu0 %v2613_v3  ;;  %v2601_v10 = vor.u32 %v3429_v6, %v2600_v5  ;;  %v2697_v11 = vor.u32 %v3453_v9, %v2696_v8  ;;  %v2588_v12 = vld [vmem:[#allocation8 + $0x78] sm:$0xf]  ;;  %v3426_v13 = vld [vmem:[#allocation8 + $0x80] sm:$0xf0]  ;;  %v2684_v14 = vld [vmem:[#allocation11 + $0x78] sm:$0xf] }
  0x1b   :  { %581 = vmatpush.bf16.msra.mxu3 %v2709_v7  ;;  %v3450_v15 = vld [vmem:[#allocation11 + $0x80] sm:$0xf0]  ;;  %v2589_v16 = vor.u32 %v3426_v13, %v2588_v12  ;;  %v2576_v18 = vld [vmem:[#allocation8 + $0x60] sm:$0xf]  ;;  %v3423_v19 = vld [vmem:[#allocation8 + $0x68] sm:$0xf0] }
  0x1c   :  { %v2685_v17 = vor.u32 %v3450_v15, %v2684_v14  ;;  %v2672_v20 = vld [vmem:[#allocation11 + $0x60] sm:$0xf]  ;;  %v3447_v21 = vld [vmem:[#allocation11 + $0x68] sm:$0xf0]  ;;  %v2577_v22 = vor.u32 %v3423_v19, %v2576_v18  ;;  %v2564_v24 = vld [vmem:[#allocation8 + $0x48] sm:$0xf] }
  0x1d   :  { %v2673_v23 = vor.u32 %v3447_v21, %v2672_v20  ;;  %v3420_v25 = vld [vmem:[#allocation8 + $0x50] sm:$0xf0]  ;;  %v3431_v26 = vld [vmem:[#allocation8 + $0xac] sm:$0xf]  ;;  %v3444_v28 = vld [vmem:[#allocation11 + $0x50] sm:$0xf0] }
  0x1e   :  { %305 = vmatpush.bf16.msra.mxu0 %v2601_v10  ;;  %v2660_v27 = vld [vmem:[#allocation11 + $0x48] sm:$0xf]  ;;  %v2614_v29 = vld [vmem:[#allocation8 + $0xb4] sm:$0xf0]  ;;  %v3428_v31 = vld [vmem:[#allocation8 + $0x94] sm:$0xf]  ;;  %v2565_v33 = vor.u32 %v3420_v25, %v2564_v24 }
  0x1f   :  { %582 = vmatpush.bf16.msra.mxu3 %v2697_v11  ;;  %v2617_v30 = vor.u32 %v3431_v26, %v2614_v29  ;;  %v2602_v32 = vld [vmem:[#allocation8 + $0x9c] sm:$0xf0]  ;;  %v2661_v34 = vor.u32 %v3444_v28, %v2660_v27  ;;  %v2552_v35 = vld [vmem:[#allocation8 + $0x30] sm:$0xf]  ;;  %v3417_v36 = vld [vmem:[#allocation8 + $0x38] sm:$0xf0] }
  0x20   :  { %v2648_v37 = vld [vmem:[#allocation11 + $0x30] sm:$0xf]  ;;  %v2605_v38 = vor.u32 %v3428_v31, %v2602_v32  ;;  %v3441_v39 = vld [vmem:[#allocation11 + $0x38] sm:$0xf0]  ;;  %v3425_v40 = vld [vmem:[#allocation8 + $0x7c] sm:$0xf]  ;;  %v2553_v42 = vor.u32 %v3417_v36, %v2552_v35 }
  0x21   :  { %333 = vmatpush.bf16.msra.mxu1 %v2617_v30  ;;  %v2590_v41 = vld [vmem:[#allocation8 + $0x84] sm:$0xf0]  ;;  %v2540_v43 = vld [vmem:[#allocation8 + $0x18] sm:$0xf]  ;;  %v3414_v44 = vld [vmem:[#allocation8 + $0x20] sm:$0xf0]  ;;  %v2649_v45 = vor.u32 %v3441_v39, %v2648_v37 }
  0x22   :  { %306 = vmatpush.bf16.msra.mxu0 %v2589_v16  ;;  %v2636_v46 = vld [vmem:[#allocation11 + $0x18] sm:$0xf]  ;;  %v3438_v47 = vld [vmem:[#allocation11 + $0x20] sm:$0xf0]  ;;  %v2593_v48 = vor.u32 %v3425_v40, %v2590_v41  ;;  %v3422_v49 = vld [vmem:[#allocation8 + $0x64] sm:$0xf]  ;;  %v2541_v55 = vor.u32 %v3414_v44, %v2540_v43 }
  0x23   :  { %583 = vmatpush.bf16.msra.mxu3 %v2685_v17  ;;  %v2578_v50 = vld [vmem:[#allocation8 + $0x6c] sm:$0xf0]  ;;  %v3433_v52 = vld [vmem:[#allocation8 + $0xb8] sm:$0xf0]  ;;  %v2528_v53 = vld [vmem:[#allocation8] sm:$0xf]  ;;  %v2637_v58 = vor.u32 %v3438_v47, %v2636_v46 }
  0x24   :  { %v2620_v51 = vld [vmem:[#allocation8 + $0xb0] sm:$0xf]  ;;  %v3411_v56 = vld [vmem:[#allocation8 + $0x8] sm:$0xf0]  ;;  %v2624_v57 = vld [vmem:[#allocation11] sm:$0xf]  ;;  %v2581_v62 = vor.u32 %v3422_v49, %v2578_v50 }
  0x25   :  { %334 = vmatpush.bf16.msra.mxu1 %v2605_v38  ;;  %v2621_v54 = vor.u32 %v3433_v52, %v2620_v51  ;;  %v3435_v59 = vld [vmem:[#allocation11 + $0x8] sm:$0xf0]  ;;  %v2710_v61 = vld [vmem:[#allocation11 + $0xb4] sm:$0xf0]  ;;  %v2716_v63 = vld [vmem:[#allocation11 + $0xb0] sm:$0xf]  ;;  %v2529_v5 = vor.u32 %v3411_v56, %v2528_v53 }
  0x26   :  { %307 = vmatpush.bf16.msra.mxu0 %v2577_v22  ;;  %v3455_v60 = vld [vmem:[#allocation11 + $0xac] sm:$0xf]  ;;  %v3457_v0 = vld [vmem:[#allocation11 + $0xb8] sm:$0xf0]  ;;  %v2608_v1 = vld [vmem:[#allocation8 + $0x98] sm:$0xf]  ;;  %v2625_v7 = vor.u32 %v3435_v59, %v2624_v57 }
  0x27   :  { %584 = vmatpush.bf16.msra.mxu3 %v2673_v23  ;;  %362 = vmatpush.bf16.msra.mxu2 %v2621_v54  ;;  %v3419_v2 = vld [vmem:[#allocation8 + $0x4c] sm:$0xf]  ;;  %v2566_v3 = vld [vmem:[#allocation8 + $0x54] sm:$0xf0]  ;;  %v3430_v4 = vld [vmem:[#allocation8 + $0xa0] sm:$0xf0]  ;;  %v2717_v10 = vor.u32 %v3457_v0, %v2716_v63  ;;  %v2713_v13 = vor.u32 %v3455_v60, %v2710_v61 }
  0x28   :  { %v2609_v6 = vor.u32 %v3430_v4, %v2608_v1  ;;  %v3956_v8 = vld [vmem:[#allocation5] sm:$0xff]  ;;  %v3452_v11 = vld [vmem:[#allocation11 + $0x94] sm:$0xf]  ;;  %v2704_v12 = vld [vmem:[#allocation11 + $0x98] sm:$0xf]  ;;  %v2569_v15 = vor.u32 %v3419_v2, %v2566_v3  ;;  %s2495_s28 = sshll.u32 %s4159_s6, 4  ;;  %s2496_s28 = int_to_ptr.hbm [resolvable:$true] %s2495_s28 }
  0x29   :  { %335 = vmatpush.bf16.msra.mxu1 %v2593_v48  ;;  %v3958_v9 = vld [vmem:[#allocation13] sm:$0xff]  ;;  %v2596_v16 = vld [vmem:[#allocation8 + $0x80] sm:$0xf]  ;;  %v3427_v17 = vld [vmem:[#allocation8 + $0x88] sm:$0xf0] }
  0x2a   :  { %308 = vmatpush.bf16.msra.mxu0 %v2565_v33  ;;  %v3454_v14 = vld [vmem:[#allocation11 + $0xa0] sm:$0xf0]  ;;  %v2698_v18 = vld [vmem:[#allocation11 + $0x9c] sm:$0xf0]  ;;  %v3416_v19 = vld [vmem:[#allocation8 + $0x34] sm:$0xf]  ;;  %v2597_v21 = vor.u32 %v3427_v17, %v2596_v16  ;;  %v3962_v22 = vpack.c.bf16 %v3958_v9, %v3958_v9 }
  0x2b   :  { %585 = vmatpush.bf16.msra.mxu3 %v2661_v34  ;;  %363 = vmatpush.bf16.msra.mxu2 %v2609_v6  ;;  %v2554_v20 = vld [vmem:[#allocation8 + $0x3c] sm:$0xf0]  ;;  %v2705_v24 = vor.u32 %v3454_v14, %v2704_v12  ;;  %v2692_v25 = vld [vmem:[#allocation11 + $0x80] sm:$0xf]  ;;  %v2701_v26 = vor.u32 %v3452_v11, %v2698_v18  ;;  %v3451_v27 = vld [vmem:[#allocation11 + $0x88] sm:$0xf0] }
  0x2c   :  { %v3449_v23 = vld [vmem:[#allocation11 + $0x7c] sm:$0xf]  ;;  %v2557_v28 = vor.u32 %v3416_v19, %v2554_v20  ;;  %v2584_v29 = vld [vmem:[#allocation8 + $0x68] sm:$0xf]  ;;  %v3424_v30 = vld [vmem:[#allocation8 + $0x70] sm:$0xf0]  ;;  %v2693_v37 = vor.u32 %v3451_v27, %v2692_v25 }
  0x2d   :  { %336 = vmatpush.bf16.msra.mxu1 %v2581_v62  ;;  %v2686_v31 = vld [vmem:[#allocation11 + $0x84] sm:$0xf0]  ;;  %v3413_v32 = vld [vmem:[#allocation8 + $0x1c] sm:$0xf]  ;;  %v2542_v33 = vld [vmem:[#allocation8 + $0x24] sm:$0xf0]  ;;  %v2585_v34 = vor.u32 %v3424_v30, %v2584_v29 }
  0x2e   :  { %309 = vmatpush.bf16.msra.mxu0 %v2553_v42  ;;  %v2572_v35 = vld [vmem:[#allocation8 + $0x50] sm:$0xf]  ;;  %v3421_v36 = vld [vmem:[#allocation8 + $0x58] sm:$0xf0]  ;;  %v2689_v38 = vor.u32 %v3449_v23, %v2686_v31  ;;  %v3446_v39 = vld [vmem:[#allocation11 + $0x64] sm:$0xf]  ;;  %v2545_v42 = vor.u32 %v3413_v32, %v2542_v33 }
  0x2f   :  { %586 = vmatpush.bf16.msra.mxu3 %v2649_v45  ;;  %364 = vmatpush.bf16.msra.mxu2 %v2597_v21  ;;  %v2680_v40 = vld [vmem:[#allocation11 + $0x68] sm:$0xf]  ;;  %v3448_v41 = vld [vmem:[#allocation11 + $0x70] sm:$0xf0]  ;;  %v2674_v43 = vld [vmem:[#allocation11 + $0x6c] sm:$0xf0]  ;;  %v2573_v46 = vor.u32 %v3421_v36, %v2572_v35 }
  0x30   :  { %v3410_v44 = vld [vmem:[#allocation8 + $0x4] sm:$0xf]  ;;  %v2530_v45 = vld [vmem:[#allocation8 + $0xc] sm:$0xf0]  ;;  %v2560_v47 = vld [vmem:[#allocation8 + $0x38] sm:$0xf]  ;;  %v2681_v49 = vor.u32 %v3448_v41, %v2680_v40  ;;  %v2677_v50 = vor.u32 %v3446_v39, %v2674_v43 }
  0x31   :  { %337 = vmatpush.bf16.msra.mxu1 %v2569_v15  ;;  %v3418_v48 = vld [vmem:[#allocation8 + $0x40] sm:$0xf0]  ;;  %v2533_v51 = vor.u32 %v3410_v44, %v2530_v45  ;;  %v2668_v52 = vld [vmem:[#allocation11 + $0x50] sm:$0xf]  ;;  %v3445_v53 = vld [vmem:[#allocation11 + $0x58] sm:$0xf0] }
  0x32   :  { %310 = vmatpush.bf16.msra.mxu0 %v2541_v55  ;;  %v3443_v54 = vld [vmem:[#allocation11 + $0x4c] sm:$0xf]  ;;  %v2662_v55 = vld [vmem:[#allocation11 + $0x54] sm:$0xf0]  ;;  %v2561_v56 = vor.u32 %v3418_v48, %v2560_v47  ;;  %v2548_v57 = vld [vmem:[#allocation8 + $0x20] sm:$0xf]  ;;  %v2669_v59 = vor.u32 %v3445_v53, %v2668_v52 }
  0x33   :  { %587 = vmatpush.bf16.msra.mxu3 %v2637_v58  ;;  %365 = vmatpush.bf16.msra.mxu2 %v2585_v34  ;;  %v3415_v58 = vld [vmem:[#allocation8 + $0x28] sm:$0xf0]  ;;  %v2665_v60 = vor.u32 %v3443_v54, %v2662_v55  ;;  %v2656_v61 = vld [vmem:[#allocation11 + $0x38] sm:$0xf]  ;;  %v3442_v62 = vld [vmem:[#allocation11 + $0x40] sm:$0xf0] }
  0x34   :  { %v3407_v63 = vld [vmem:[#allocation5 + $0x8] sm:$0xff]  ;;  %v3440_v0 = vld [vmem:[#allocation11 + $0x34] sm:$0xf]  ;;  %v2650_v1 = vld [vmem:[#allocation11 + $0x3c] sm:$0xf0]  ;;  %v2549_v2 = vor.u32 %v3415_v58, %v2548_v57  ;;  %v2657_v3 = vor.u32 %v3442_v62, %v2656_v61 }
  0x35   :  { %338 = vmatpush.bf16.msra.mxu1 %v2557_v28  ;;  %v2653_v4 = vor.u32 %v3440_v0, %v2650_v1  ;;  %v2536_v6 = vld [vmem:[#allocation8 + $0x8] sm:$0xf]  ;;  %v2644_v11 = vld [vmem:[#allocation11 + $0x20] sm:$0xf]  ;;  %v3439_v12 = vld [vmem:[#allocation11 + $0x28] sm:$0xf0] }
  0x36   :  { %311 = vmatpush.bf16.msra.mxu0 %v2529_v5  ;;  %v3437_v5 = vld [vmem:[#allocation11 + $0x1c] sm:$0xf]  ;;  %v2645_v14 = vor.u32 %v3439_v12, %v2644_v11  ;;  %v2632_v16 = vld [vmem:[#allocation11 + $0x8] sm:$0xf]  ;;  %v3436_v17 = vld [vmem:[#allocation11 + $0x10] sm:$0xf0] }
  0x37   :  { %588 = vmatpush.bf16.msra.mxu3 %v2625_v7  ;;  %366 = vmatpush.bf16.msra.mxu2 %v2573_v46  ;;  %v3412_v7 = vld [vmem:[#allocation8 + $0x10] sm:$0xf0]  ;;  %v3434_v18 = vld [vmem:[#allocation11 + $0x4] sm:$0xf]  ;;  %v2633_v20 = vor.u32 %v3436_v17, %v2632_v16  ;;  %v2806_v25 = vld [vmem:[#allocation11 + $0xa8] sm:$0xf] }
  0x38   :  { %v2626_v19 = vld [vmem:[#allocation11 + $0xc] sm:$0xf0]  ;;  %v3479_v27 = vld [vmem:[#allocation11 + $0xac] sm:$0xf]  ;;  %v2808_v28 = vld [vmem:[#allocation11 + $0xb4] sm:$0xf0] }
  0x39   :  { %312 = vmatmul.bf16.vlgmr.msra.gmra.mxu0 %v3956_v8  ;;  %339 = vmatpush.bf16.msra.mxu1 %v2545_v42  ;;  %v2629_v21 = vor.u32 %v3434_v18, %v2626_v19  ;;  %v3408_v23 = vld [vmem:[#allocation5 + $0x10] sm:$0xff]  ;;  %v2811_v29 = vor.u32 %v3479_v27, %v2808_v28  ;;  %v3477_v31 = vld [vmem:[#allocation11 + $0x98] sm:$0xf0]  ;;  %v3476_v32 = vld [vmem:[#allocation11 + $0x94] sm:$0xf] }
  0x3a   :  { %607 = vmatpush.bf16.msrb.mxu0 %v2717_v10  ;;  %589 = vmatmul.bf16.vlgmr.msra.gmra.mxu3 %v3962_v22  ;;  %v2638_v10 = vld [vmem:[#allocation11 + $0x24] sm:$0xf0]  ;;  %v2794_v30 = vld [vmem:[#allocation11 + $0x90] sm:$0xf]  ;;  %v2796_v34 = vld [vmem:[#allocation11 + $0x9c] sm:$0xf0] }
  0x3b   :  { %594 = vmatpush.bf16.msrb.mxu3 %v2713_v13  ;;  %367 = vmatpush.bf16.msra.mxu2 %v2561_v56  ;;  %v2537_v13 = vor.u32 %v3412_v7, %v2536_v6  ;;  %v2641_v15 = vor.u32 %v3437_v5, %v2638_v10  ;;  %v2795_v33 = vor.u32 %v3477_v31, %v2794_v30  ;;  %v2814_v46 = vld [vmem:[#allocation11 + $0xb0] sm:$0xf]  ;;  %v3481_v47 = vld [vmem:[#allocation11 + $0xb8] sm:$0xf0]  ;;  %v2782_v56 = vld [vmem:[#allocation11 + $0x78] sm:$0xf] }
  0x3c   :  { %v2799_v35 = vor.u32 %v3476_v32, %v2796_v34  ;;  %v2815_v48 = vor.u32 %v3481_v47, %v2814_v46  ;;  %v3474_v57 = vld [vmem:[#allocation11 + $0x80] sm:$0xf0]  ;;  %v3473_v58 = vld [vmem:[#allocation11 + $0x7c] sm:$0xf]  ;;  %v2790_v61 = vld [vmem:[#allocation11 + $0x80] sm:$0xf] }
  0x3d   :  { %340 = vmatpush.bf16.msra.mxu1 %v2533_v51  ;;  %v3478_v51 = vld [vmem:[#allocation11 + $0xa0] sm:$0xf0]  ;;  %v3475_v62 = vld [vmem:[#allocation11 + $0x88] sm:$0xf0]  ;;  %v2770_v0 = vld [vmem:[#allocation11 + $0x60] sm:$0xf] }
  0x3e   :  { %608 = vmatpush.bf16.msrb.mxu0 %v2705_v24  ;;  %v3409_v24 = vld [vmem:[#allocation5 + $0x18] sm:$0xff]  ;;  %v3471_v1 = vld [vmem:[#allocation11 + $0x68] sm:$0xf0]  ;;  %v2772_v7 = vld [vmem:[#allocation11 + $0x6c] sm:$0xf0] }
  0x3f   :  { %595 = vmatpush.bf16.msrb.mxu3 %v2701_v26  ;;  %368 = vmatpush.bf16.msra.mxu2 %v2549_v2  ;;  %v3480_v26 = vld [vmem:[#allocation11 + $0xb0] sm:$0xf0]  ;;  %v3470_v2 = vld [vmem:[#allocation11 + $0x64] sm:$0xf]  ;;  %v2771_v6 = vor.u32 %v3471_v1, %v2770_v0  ;;  %v2758_v12 = vld [vmem:[#allocation11 + $0x48] sm:$0xf] }
  0x40   :  { %341 = vmatmul.bf16.vlgmr.msra.gmra.mxu1 %v3956_v8  ;;  %v2775_v11 = vor.u32 %v3470_v2, %v2772_v7  ;;  %v2760_v16 = vld [vmem:[#allocation11 + $0x54] sm:$0xf0]  ;;  %v2778_v19 = vld [vmem:[#allocation11 + $0x68] sm:$0xf]  ;;  %v3465_v27 = vld [vmem:[#allocation11 + $0x38] sm:$0xf0] }
  0x41   :  { %v2748_v30 = vld [vmem:[#allocation11 + $0x3c] sm:$0xf0]  ;;  %v3469_v34 = vld [vmem:[#allocation11 + $0x58] sm:$0xf0]  ;;  %v2736_v46 = vld [vmem:[#allocation11 + $0x24] sm:$0xf0] }
  0x42   :  { %609 = vmatpush.bf16.msrb.mxu0 %v2693_v37  ;;  %v144_v37 = vld [vmem:[#allocation10] sm:$0x7]  ;;  %v2754_v47 = vld [vmem:[#allocation11 + $0x38] sm:$0xf]  ;;  %v2730_v1 = vld [vmem:[#allocation11 + $0x8] sm:$0xf] }
  0x43   :  { %596 = vmatpush.bf16.msrb.mxu3 %v2689_v38  ;;  %369 = vmatpush.bf16.msra.mxu2 %v2537_v13  ;;  %v3982_v55 = vperm.slane %v144_v37, 1  ;;  %v3468_v13 = vld [vmem:[#allocation11 + $0x50] sm:$0xf0] }
  0x44   :  { %v3460_v2 = vld [vmem:[#allocation11 + $0x10] sm:$0xf0] }
  0x46   :  { %610 = vmatpush.bf16.msrb.mxu0 %v2681_v49  ;;  %370 = vmatmul.bf16.vlgmr.msra.gmra.mxu2 %v3956_v8  ;;  %v2807_v8 = vor.u32 %v3480_v26, %v2806_v25  ;;  %v2746_v26 = vld [vmem:[#allocation11 + $0x30] sm:$0xf] }
  0x47   :  { %597 = vmatpush.bf16.msrb.mxu3 %v2677_v50  ;;  %848 = vmatpush.bf16.msrb.mxu2 %v2811_v29  ;;  %v2802_v50 = vld [vmem:[#allocation11 + $0x98] sm:$0xf]  ;;  %v3464_v29 = vld [vmem:[#allocation11 + $0x34] sm:$0xf] }
  0x48   :  { %835 = vmatpush.bf16.msrb.mxu1 %v2807_v8  ;;  %v2803_v53 = vor.u32 %v3478_v51, %v2802_v50 }
  0x49   :  { %317 = vmatmul.bf16.gmra.mxu0 %v3407_v63 }
  0x4a   :  { %611 = vmatpush.bf16.msrb.mxu0 %v2669_v59  ;;  %v2783_v59 = vor.u32 %v3474_v57, %v2782_v56  ;;  %v2722_v57 = vld [vmem:[#allocation11] sm:$0xf] }
  0x4b   :  { %598 = vmatpush.bf16.msrb.mxu3 %v2665_v60  ;;  %849 = vmatpush.bf16.msrb.mxu2 %v2799_v35  ;;  %v2784_v60 = vld [vmem:[#allocation11 + $0x84] sm:$0xf0]  ;;  %v2747_v35 = vor.u32 %v3465_v27, %v2746_v26 }
  0x4c   :  { %836 = vmatpush.bf16.msrb.mxu1 %v2795_v33  ;;  %v2766_v33 = vld [vmem:[#allocation11 + $0x50] sm:$0xf] }
  0x4e   :  { %612 = vmatpush.bf16.msrb.mxu0 %v2657_v3 }
  0x4f   :  { %599 = vmatpush.bf16.msrb.mxu3 %v2653_v4  ;;  %v2791_v4 = vor.u32 %v3475_v62, %v2790_v61  ;;  %v3458_v61 = vld [vmem:[#allocation11 + $0x4] sm:$0xf]  ;;  %v2724_v62 = vld [vmem:[#allocation11 + $0xc] sm:$0xf0] }
  0x50   :  { %346 = vmatmul.bf16.gmra.mxu1 %v3407_v63 }
  0x51   :  { %837 = vmatpush.bf16.msrb.mxu1 %v2783_v59 }
  0x52   :  { %613 = vmatpush.bf16.msrb.mxu0 %v2645_v14 }
  0x53   :  { %600 = vmatpush.bf16.msrb.mxu3 %v2641_v15  ;;  %v3467_v15 = vld [vmem:[#allocation11 + $0x4c] sm:$0xf] }
  0x54   :  { %v2763_v25 = vor.u32 %v3467_v15, %v2760_v16 }
  0x55   :  { %838 = vmatpush.bf16.msrb.mxu1 %v2771_v6  ;;  %v2727_v6 = vor.u32 %v3458_v61, %v2724_v62 }
  0x56   :  { %614 = vmatpush.bf16.msrb.mxu0 %v2633_v20  ;;  %375 = vmatmul.bf16.gmra.mxu2 %v3407_v63  ;;  %v2787_v63 = vor.u32 %v3473_v58, %v2784_v60  ;;  %v3459_v58 = vld [vmem:[#allocation11 + $0x8] sm:$0xf0] }
  0x57   :  { %601 = vmatpush.bf16.msrb.mxu3 %v2629_v21  ;;  %v2759_v21 = vor.u32 %v3468_v13, %v2758_v12  ;;  %v2723_v0 = vor.u32 %v3459_v58, %v2722_v57  ;;  %v2731_v12 = vor.u32 %v3460_v2, %v2730_v1 }
  0x58   :  { %850 = vmatpush.bf16.msrb.mxu2 %v2787_v63 }
  0x59   :  { %322 = vmatmul.bf16.gmra.mxu0 %v3408_v23  ;;  %839 = vmatpush.bf16.msrb.mxu1 %v2759_v21 }
  0x5a   :  { %602 = vmatmul.bf16.vlgmr.msrb.gmra.mxu3 %v3962_v22 }
  0x5b   :  { %861 = vmatpush.bf16.msra.mxu3 %v2815_v48 }
  0x5c   :  { %851 = vmatpush.bf16.msrb.mxu2 %v2775_v11 }
  0x5d   :  { %840 = vmatpush.bf16.msrb.mxu1 %v2747_v35 }
  0x5f   :  { %862 = vmatpush.bf16.msra.mxu3 %v2803_v53  ;;  %v3463_v53 = vld [vmem:[#allocation11 + $0x28] sm:$0xf0] }
  0x60   :  { %351 = vmatmul.bf16.gmra.mxu1 %v3408_v23  ;;  %852 = vmatpush.bf16.msrb.mxu2 %v2763_v25 }
  0x63   :  { %863 = vmatpush.bf16.msra.mxu3 %v2791_v4 }
  0x66   :  { %380 = vmatmul.bf16.gmra.mxu2 %v3408_v23  ;;  %v3992_v23 = vperm.slane %v144_v37, 2 }
  0x69   :  { %327 = vmatmul.bf16.gmra.mxu0 %v3409_v24 }
  0x70   :  { %356 = vmatmul.bf16.gmra.mxu1 %v3409_v24 }
  0x76   :  { %385 = vmatmul.bf16.gmra.mxu2 %v3409_v24  ;;  %v3472_v24 = vld [vmem:[#allocation11 + $0x70] sm:$0xf0] }
  0x77   :  { %v2779_v8 = vor.u32 %v3472_v24, %v2778_v19 }
  0x79   :  { %615 = vmatmul.bf16.vlgmr.msrb.gmra.mxu0 %v3962_v22  ;;  %v3970_v22 = vperm.slane %v144_v37, 0  ;;  %864 = vmatpush.bf16.msra.mxu3 %v2779_v8  ;;  %v2767_v37 = vor.u32 %v3469_v34, %v2766_v33  ;;  %v4015_v8 = vld [vmem:[%s4157_s4] ss:$0 sm:$0xff] }
  0x7d   :  { %865 = vmatpush.bf16.msra.mxu3 %v2767_v37 }
  0xb6   :  { %v313_v36 = vpop.f32.mrf.mxu0 }
  0xb7   :  { %v314_v41 = vadd.f32 %v313_v36, %v3970_v22 }
  0xbd   :  { %v590_v38 = vpop.f32.mrf.mxu3  ;;  %v342_v5 = vpop.f32.mrf.mxu1 }
  0xbe   :  { %v315_v39 = vpop.f32.mrf.mxu0  ;;  %v623_v44 = vadd.f32 %v590_v38, %v314_v41  ;;  %v343_v18 = vadd.f32 %v342_v5, %v3982_v55  ;;  %v2734_v41 = vld [vmem:[#allocation11 + $0x18] sm:$0xf] }
  0xbf   :  { %v3973_v40 = vadd.f32 %v315_v39, %v3970_v22  ;;  %v2751_v39 = vor.u32 %v3464_v29, %v2748_v30 }
  0xc0   :  { %v2718_v49 = vmul.f32 -1.442695, %v623_v44  ;;  %v3461_v44 = vld [vmem:[#allocation11 + $0x1c] sm:$0xf] }
  0xc1   :  { %853 = vmatpush.bf16.msrb.mxu2 %v2751_v39  ;;  %v2739_v56 = vor.u32 %v3461_v44, %v2736_v46 }
  0xc2   :  { %3660 = vpow2.f32 %v2718_v49  ;;  %v3466_v49 = vld [vmem:[#allocation11 + $0x40] sm:$0xf0] }
  0xc3   :  { %v2755_v51 = vor.u32 %v3466_v49, %v2754_v47 }
  0xc5   :  { %v592_v42 = vpop.f32.mrf.mxu3  ;;  %866 = vmatpush.bf16.msra.mxu3 %v2755_v51  ;;  %854 = vmatpush.bf16.msrb.mxu2 %v2739_v56  ;;  %v4039_v62 = vpop.f32.mrf.mxu1 }
  0xc6   :  { %v318_v43 = vpop.f32.mrf.mxu0  ;;  %v3462_v42 = vld [vmem:[#allocation11 + $0x20] sm:$0xf0] }
  0xc7   :  { %v3977_v45 = vadd.f32 %v318_v43, %v3970_v22  ;;  %v2735_v50 = vor.u32 %v3462_v42, %v2734_v41 }
  0xc8   :  { %v3661_v10 = vpop.eup %3660 }
  0xc9   :  { %v3984_v3 = vpop.f32.mrf.mxu2  ;;  %v3990_v20 = vadd.f32 1.0, %v3661_v10  ;;  %841 = vmatpush.bf16.msrb.mxu1 %v2735_v50  ;;  %855 = vmatpush.bf16.msrb.mxu2 %v2727_v6  ;;  %v3503_v6 = vld [vmem:[#allocation11 + $0xac] sm:$0xf] }
  0xca   :  { %v372_v34 = vadd.f32 %v3984_v3, %v3992_v23 }
  0xcb   :  { %3662 = vrcp.f32 %v3990_v20  ;;  %v639_v27 = vand.u32 2147483648, %v3990_v20  ;;  %vm633_vm1 = vweird.f32 %v3990_v20 }
  0xcd   :  { %842 = vmatpush.bf16.msrb.mxu1 %v2723_v0  ;;  %v640_v33 = vor.u32 1.1754944e-38, %v639_v27  ;;  %v2900_v27 = vld [vmem:[#allocation11 + $0x98] sm:$0xf] }
  0xce   :  { %v320_v52 = vpop.f32.mrf.mxu0 }
  0xcf   :  { %v3980_v54 = vadd.f32 %v320_v52, %v3970_v22  ;;  %v2742_v52 = vld [vmem:[#allocation11 + $0x20] sm:$0xf] }
  0xd0   :  { %v2743_v63 = vor.u32 %v3463_v53, %v2742_v52 }
  0xd1   :  { %v373_v32 = vpop.f32.mrf.mxu2  ;;  %v3663_v59 = vpop.eup %3662 }
  0xd2   :  { %v3996_v36 = vadd.f32 %v373_v32, %v3992_v23  ;;  %v629_v5 = vmul.f32 %v3663_v59, %v3990_v20  ;;  %867 = vmatpush.bf16.msra.mxu3 %v2743_v63  ;;  %vm634_vm0 = vweird.f32 %v3663_v59  ;;  %v4041_v63 = vpop.f32.mrf.mxu1 }
  0xd3   :  { %vm635_vm2 = vmor %vm633_vm1, %vm634_vm0 }
  0xd4   :  { %v630_v13 = vsub.f32 1.0, %v629_v5  ;;  %v3504_v5 = vld [vmem:[#allocation11 + $0xb0] sm:$0xf0] }
  0xd6   :  { %v323_v14 = vpop.f32.mrf.mxu0  ;;  %868 = vmatpush.bf16.msra.mxu3 %v2731_v12  ;;  %v631_v16 = vmul.f32 %v3663_v59, %v630_v13  ;;  %v2912_v12 = vld [vmem:[#allocation11 + $0xb0] sm:$0xf]  ;;  %v3505_v13 = vld [vmem:[#allocation11 + $0xb8] sm:$0xf0] }
  0xd7   :  { %v3987_v17 = vadd.f32 %v323_v14, %v3970_v22 }
  0xd8   :  { %v632_v26 = vadd.f32 %v3663_v59, %v631_v16  ;;  %v2913_v16 = vor.u32 %v3505_v13, %v2912_v12  ;;  %v3493_v12 = vld [vmem:[#allocation11 + $0x58] sm:$0xf0] }
  0xd9   :  { %v376_v14 = vpop.f32.mrf.mxu2 }
  0xda   :  { %v4006_v15 = vadd.f32 %v376_v14, %v3992_v23  ;;  %1117 = vmatpush.bf16.msra.mxu2 %v2913_v16 }
  0xdd   :  { %v603_v28 = vpop.f32.mrf.mxu3 }
  0xde   :  { %v643_v31 = vadd.f32 %v603_v28, %v343_v18  ;;  %v325_v43 = vpop.f32.mrf.mxu0  ;;  %v637_v28 = vand.u32 2147483647, %v3990_v20 }
  0xdf   :  { %v3999_v48 = vadd.f32 %v325_v43, %v3970_v22 }
  0xe0   :  { %v2719_v38 = vmul.f32 -1.442695, %v643_v31  ;;  %v636_v31 = vsel %vm635_vm2, %v3663_v59, %v632_v26  ;;  %vm638_vm3 = vcmp.eq.f32.partialorder %v637_v28, 8.507059e+37  ;;  %v2894_v26 = vld [vmem:[#allocation11 + $0x9c] sm:$0xf0] }
  0xe1   :  { %v378_v29 = vpop.f32.mrf.mxu2  ;;  %v641_v37 = vsel %vm638_vm3, %v640_v33, %v636_v31  ;;  %v3502_v28 = vld [vmem:[#allocation11 + $0xa0] sm:$0xf0] }
  0xe2   :  { %3664 = vpow2.f32 %v2719_v38  ;;  %v3498_v33 = vld [vmem:[#allocation11 + $0x80] sm:$0xf0] }
  0xe5   :  { %v605_v60 = vpop.f32.mrf.mxu3 }
  0xe6   :  { %v328_v10 = vpop.f32.mrf.mxu0 }
  0xe7   :  { %v4003_v11 = vadd.f32 %v328_v10, %v3970_v22  ;;  %v2906_v10 = vld [vmem:[#allocation11 + $0xb4] sm:$0xf0] }
  0xe8   :  { %v3665_v4 = vpop.eup %3664  ;;  %v2909_v14 = vor.u32 %v3503_v6, %v2906_v10  ;;  %v2864_v10 = vld [vmem:[#allocation11 + $0x50] sm:$0xf] }
  0xe9   :  { %v647_v7 = vadd.f32 1.0, %v3665_v4  ;;  %v381_v43 = vpop.f32.mrf.mxu2  ;;  %v2904_v4 = vld [vmem:[#allocation11 + $0xa8] sm:$0xf]  ;;  %v2865_v16 = vor.u32 %v3493_v12, %v2864_v10 }
  0xea   :  { %v4026_v46 = vadd.f32 %v381_v43, %v3992_v23  ;;  %1104 = vmatpush.bf16.msra.mxu1 %v2909_v14  ;;  %v3495_v43 = vld [vmem:[#allocation11 + $0x68] sm:$0xf0] }
  0xeb   :  { %3666 = vrcp.f32 %v647_v7  ;;  %vm653_vm4 = vweird.f32 %v647_v7  ;;  %v659_v20 = vand.u32 2147483648, %v647_v7  ;;  %v657_v41 = vand.u32 2147483647, %v647_v7 }
  0xed   :  { %v660_v47 = vor.u32 1.1754944e-38, %v659_v20  ;;  %vm658_vm7 = vcmp.eq.f32.partialorder %v657_v41, 8.507059e+37  ;;  %v3499_v20 = vld [vmem:[#allocation11 + $0x88] sm:$0xf0] }
  0xee   :  { %v330_v19 = vpop.f32.mrf.mxu0 }
  0xef   :  { %v4009_v24 = vadd.f32 %v330_v19, %v3970_v22  ;;  %v4020_v22 = vadd.f32 %v378_v29, %v3992_v23  ;;  %v3501_v19 = vld [vmem:[#allocation11 + $0x98] sm:$0xf0] }
  0xf1   :  { %v3667_v18 = vpop.eup %3666  ;;  %v383_v52 = vpop.f32.mrf.mxu2 }
  0xf2   :  { %v649_v21 = vmul.f32 %v3667_v18, %v647_v7  ;;  %vm654_vm5 = vweird.f32 %v3667_v18  ;;  %v4030_v57 = vadd.f32 %v383_v52, %v3992_v23  ;;  %v2905_v7 = vor.u32 %v3504_v5, %v2904_v4  ;;  %v3492_v4 = vld [vmem:[#allocation11 + $0x50] sm:$0xf0]  ;;  %v3491_v5 = vld [vmem:[#allocation11 + $0x4c] sm:$0xf] }
  0xf3   :  { %vm655_vm6 = vmor %vm653_vm4, %vm654_vm5 }
  0xf4   :  { %v650_v25 = vsub.f32 1.0, %v649_v21  ;;  %1091 = vmatpush.bf16.msra.mxu0 %v2905_v7  ;;  %v3500_v21 = vld [vmem:[#allocation11 + $0x94] sm:$0xf]  ;;  %v2858_v7 = vld [vmem:[#allocation11 + $0x54] sm:$0xf0] }
  0xf5   :  { %v2897_v29 = vor.u32 %v3500_v21, %v2894_v26  ;;  %v2861_v14 = vor.u32 %v3491_v5, %v2858_v7  ;;  %v3488_v21 = vld [vmem:[#allocation11 + $0x34] sm:$0xf] }
  0xf6   :  { %v651_v30 = vmul.f32 %v3667_v18, %v650_v25  ;;  %v616_v32 = vpop.f32.mrf.mxu0  ;;  %v3484_v5 = vld [vmem:[#allocation11 + $0x10] sm:$0xf0] }
  0xf7   :  { %v663_v35 = vadd.f32 %v4015_v8, %v616_v32  ;;  %1105 = vmatpush.bf16.msra.mxu1 %v2897_v29  ;;  %v2880_v32 = vld [vmem:[#allocation11 + $0x78] sm:$0xf]  ;;  %v3490_v29 = vld [vmem:[#allocation11 + $0x40] sm:$0xf0] }
  0xf8   :  { %v652_v38 = vadd.f32 %v3667_v18, %v651_v30  ;;  %v2901_v30 = vor.u32 %v3502_v28, %v2900_v27  ;;  %v2846_v27 = vld [vmem:[#allocation11 + $0x3c] sm:$0xf0]  ;;  %v2852_v28 = vld [vmem:[#allocation11 + $0x38] sm:$0xf] }
  0xf9   :  { %v664_v39 = vmul.f32 %v663_v35, %v641_v37  ;;  %v386_v60 = vpop.f32.mrf.mxu2  ;;  %v2881_v35 = vor.u32 %v3498_v33, %v2880_v32  ;;  %v2882_v37 = vld [vmem:[#allocation11 + $0x84] sm:$0xf0]  ;;  %v2849_v33 = vor.u32 %v3488_v21, %v2846_v27 }
  0xfa   :  { %v656_v44 = vsel %vm655_vm6, %v3667_v18, %v652_v38  ;;  %v4037_v61 = vadd.f32 %v386_v60, %v3992_v23  ;;  %v2892_v18 = vld [vmem:[#allocation11 + $0x90] sm:$0xf]  ;;  %1118 = vmatpush.bf16.msra.mxu2 %v2901_v30  ;;  %v2888_v38 = vld [vmem:[#allocation11 + $0x80] sm:$0xf]  ;;  %v2856_v60 = vld [vmem:[#allocation11 + $0x48] sm:$0xf] }
  0xfb   :  { %v665_v42 = vadd.f32 %v664_v39, %v372_v34  ;;  %v661_v49 = vsel %vm658_vm7, %v660_v47, %v656_v44  ;;  %v2893_v25 = vor.u32 %v3501_v19, %v2892_v18  ;;  %v3497_v34 = vld [vmem:[#allocation11 + $0x7c] sm:$0xf]  ;;  %v2889_v41 = vor.u32 %v3499_v20, %v2888_v38  ;;  %v3494_v44 = vld [vmem:[#allocation11 + $0x64] sm:$0xf] }
  0xfc   :  { %v667_v50 = vsub.f32 1.0, %v661_v49  ;;  %v669_v56 = vmul.f32 %v661_v49, %v3958_v9  ;;  %v4043_v9 = vpop.f32.mrf.mxu1  ;;  %v2885_v39 = vor.u32 %v3497_v34, %v2882_v37  ;;  %v2870_v49 = vld [vmem:[#allocation11 + $0x6c] sm:$0xf0]  ;;  %v2857_v6 = vor.u32 %v3492_v4, %v2856_v60  ;;  %v3489_v19 = vld [vmem:[#allocation11 + $0x38] sm:$0xf0] }
  0xfd   :  { %3668 = vtanh.f32 %v665_v42  ;;  %1092 = vmatpush.bf16.msra.mxu0 %v2893_v25  ;;  %v2868_v42 = vld [vmem:[#allocation11 + $0x60] sm:$0xf]  ;;  %v2873_v52 = vor.u32 %v3494_v44, %v2870_v49  ;;  %v345_v18 = vadd.f32 %v4039_v62, %v3982_v55  ;;  %v2853_v34 = vor.u32 %v3490_v29, %v2852_v28  ;;  %v2832_v62 = vld [vmem:[#allocation11 + $0x18] sm:$0xf]  ;;  %v3486_v38 = vld [vmem:[#allocation11 + $0x20] sm:$0xf0] }
  0xfe   :  { %v618_v3 = vpop.f32.mrf.mxu0  ;;  %1106 = vmatpush.bf16.msra.mxu1 %v2885_v39  ;;  %1119 = vmatpush.bf16.msra.mxu2 %v2889_v41  ;;  %v2833_v20 = vor.u32 %v3486_v38, %v2832_v62  ;;  %v3485_v39 = vld [vmem:[#allocation11 + $0x1c] sm:$0xf]  ;;  %v2834_v41 = vld [vmem:[#allocation11 + $0x24] sm:$0xf0]  ;;  %v2820_v49 = vld [vmem:[#allocation11] sm:$0xf] }
  0xff   :  { %v2869_v3 = vor.u32 %v3495_v43, %v2868_v42  ;;  %v2840_v42 = vld [vmem:[#allocation11 + $0x20] sm:$0xf]  ;;  %v2837_v44 = vor.u32 %v3485_v39, %v2834_v41  ;;  %v2828_v4 = vld [vmem:[#allocation11 + $0x8] sm:$0xf] }
 0x100   :  { %v2829_v10 = vor.u32 %v3484_v5, %v2828_v4  ;;  %v3010_v4 = vld [vmem:[#allocation11 + $0xb0] sm:$0xf]  ;;  %v3529_v5 = vld [vmem:[#allocation11 + $0xb8] sm:$0xf0] }
 0x101   :  { %1093 = vmatpush.bf16.msra.mxu0 %v2881_v35  ;;  %v4053_v47 = vpop.f32.mrf.mxu2 }
 0x102   :  { %1107 = vmatpush.bf16.msra.mxu1 %v2873_v52 }
 0x103   :  { %v3669_v51 = vpop.eup %3668 }
 0x104   :  { %v668_v53 = vmul.f32 %v3669_v51, %v667_v50  ;;  %v4045_v0 = vpop.f32.mrf.mxu1  ;;  %v2876_v50 = vld [vmem:[#allocation11 + $0x68] sm:$0xf]  ;;  %v3496_v51 = vld [vmem:[#allocation11 + $0x70] sm:$0xf0] }
 0x105   :  { %1094 = vmatpush.bf16.msra.mxu0 %v2869_v3  ;;  %v3487_v3 = vld [vmem:[#allocation11 + $0x28] sm:$0xf0] }
 0x106   :  { %v4032_v58 = vadd.f32 %v669_v56, %v668_v53  ;;  %v2877_v53 = vor.u32 %v3496_v51, %v2876_v50  ;;  %1108 = vmatpush.bf16.msra.mxu1 %v2861_v14  ;;  %v3483_v50 = vld [vmem:[#allocation11 + $0x8] sm:$0xf0]  ;;  %v2841_v52 = vor.u32 %v3487_v3, %v2840_v42 }
 0x108   :  { %v674_v59 = vpack.c.bf16 %v4032_v58, %v4032_v58  ;;  %1120 = vmatpush.bf16.msra.mxu2 %v2877_v53  ;;  %v2821_v53 = vor.u32 %v3483_v50, %v2820_v49 }
 0x109   :  { %1095 = vmatpush.bf16.msra.mxu0 %v2857_v6 }
 0x10a   :  { %843 = vmatmul.bf16.vlgmr.msrb.gmra.mxu1 %v674_v59  ;;  %856 = vmatmul.bf16.vlgmr.msrb.gmra.mxu2 %v674_v59 }
 0x10b   :  { %869 = vmatmul.bf16.vlgmr.msra.gmra.mxu3 %v674_v59  ;;  %1109 = vmatpush.bf16.msra.mxu1 %v2849_v33 }
 0x10c   :  { %v4047_v1 = vpop.f32.mrf.mxu1  ;;  %1121 = vmatpush.bf16.msra.mxu2 %v2865_v16 }
 0x10f   :  { %1110 = vmatpush.bf16.msra.mxu1 %v2837_v44 }
 0x110   :  { %1122 = vmatpush.bf16.msra.mxu2 %v2853_v34 }
 0x114   :  { %v4049_v2 = vpop.f32.mrf.mxu1  ;;  %1123 = vmatpush.bf16.msra.mxu2 %v2841_v52 }
 0x118   :  { %1124 = vmatpush.bf16.msra.mxu2 %v2829_v10  ;;  %v2990_v10 = vld [vmem:[#allocation11 + $0x90] sm:$0xf] }
 0x11c   :  { %v4051_v31 = vpop.f32.mrf.mxu1 }
 0x187   :  { %v844_v56 = vpop.f32.mrf.mxu1 }
 0x188   :  { %v878_v59 = vadd.f32 %v844_v56, %v3973_v40  ;;  %v2844_v40 = vld [vmem:[#allocation11 + $0x30] sm:$0xf]  ;;  %v3482_v56 = vld [vmem:[#allocation11 + $0x4] sm:$0xf] }
 0x189   :  { %v2845_v26 = vor.u32 %v3489_v19, %v2844_v40 }
 0x18a   :  { %v2816_v13 = vmul.f32 -1.442695, %v878_v59  ;;  %v2822_v59 = vld [vmem:[#allocation11 + $0xc] sm:$0xf0] }
 0x18b   :  { %1096 = vmatpush.bf16.msra.mxu0 %v2845_v26  ;;  %v2825_v60 = vor.u32 %v3482_v56, %v2822_v59  ;;  %v3527_v56 = vld [vmem:[#allocation11 + $0xac] sm:$0xf] }
 0x18c   :  { %3670 = vpow2.f32 %v2816_v13 }
 0x18d   :  { %v857_v25 = vpop.f32.mrf.mxu2  ;;  %1111 = vmatpush.bf16.msra.mxu1 %v2825_v60  ;;  %v3004_v60 = vld [vmem:[#allocation11 + $0xb4] sm:$0xf0] }
 0x18e   :  { %v898_v30 = vadd.f32 %v857_v25, %v345_v18  ;;  %v870_v32 = vpop.f32.mrf.mxu3 }
 0x18f   :  { %v846_v35 = vpop.f32.mrf.mxu1  ;;  %1097 = vmatpush.bf16.msra.mxu0 %v2833_v20  ;;  %v918_v33 = vadd.f32 %v4015_v8, %v870_v32 }
 0x190   :  { %v2817_v37 = vmul.f32 -1.442695, %v898_v30 }
 0x192   :  { %v3671_v43 = vpop.eup %3670  ;;  %3672 = vpow2.f32 %v2817_v37 }
 0x193   :  { %v882_v51 = vadd.f32 1.0, %v3671_v43  ;;  %1098 = vmatpush.bf16.msra.mxu0 %v2821_v53  ;;  %v3528_v53 = vld [vmem:[#allocation11 + $0xb0] sm:$0xf0] }
 0x195   :  { %3674 = vrcp.f32 %v882_v51  ;;  %v859_v6 = vpop.f32.mrf.mxu2  ;;  %v894_v40 = vand.u32 2147483648, %v882_v51  ;;  %v892_v21 = vand.u32 2147483647, %v882_v51  ;;  %vm888_vm9 = vweird.f32 %v882_v51 }
 0x196   :  { %v872_v7 = vpop.f32.mrf.mxu3  ;;  %v3007_v6 = vor.u32 %v3527_v56, %v3004_v60  ;;  %v2962_v60 = vld [vmem:[#allocation11 + $0x50] sm:$0xf] }
 0x197   :  { %v895_v28 = vor.u32 1.1754944e-38, %v894_v40  ;;  %vm893_vm11 = vcmp.eq.f32.partialorder %v892_v21, 8.507059e+37  ;;  %v3011_v7 = vor.u32 %v3529_v5, %v3010_v4  ;;  %v2978_v21 = vld [vmem:[#allocation11 + $0x78] sm:$0xf]  ;;  %v3517_v4 = vld [vmem:[#allocation11 + $0x58] sm:$0xf0] }
 0x198   :  { %v3673_v12 = vpop.eup %3672  ;;  %1360 = vmatpush.bf16.msrb.mxu0 %v3007_v6 }
 0x199   :  { %v902_v13 = vadd.f32 1.0, %v3673_v12  ;;  %1373 = vmatpush.bf16.msrb.mxu1 %v3011_v7  ;;  %v3525_v12 = vld [vmem:[#allocation11 + $0x98] sm:$0xf0]  ;;  %v2963_v7 = vor.u32 %v3517_v4, %v2962_v60 }
 0x19b   :  { %v3675_v14 = vpop.eup %3674  ;;  %3676 = vrcp.f32 %v902_v13  ;;  %v914_v37 = vand.u32 2147483648, %v902_v13  ;;  %v912_v38 = vand.u32 2147483647, %v902_v13  ;;  %vm908_vm13 = vweird.f32 %v902_v13 }
 0x19c   :  { %v884_v16 = vmul.f32 %v3675_v14, %v882_v51  ;;  %vm889_vm8 = vweird.f32 %v3675_v14 }
 0x19d   :  { %vm890_vm10 = vmor %vm888_vm9, %vm889_vm8  ;;  %v915_v41 = vor.u32 1.1754944e-38, %v914_v37  ;;  %vm913_vm15 = vcmp.eq.f32.partialorder %v912_v38, 8.507059e+37  ;;  %v3519_v37 = vld [vmem:[#allocation11 + $0x68] sm:$0xf0] }
 0x19e   :  { %v885_v18 = vsub.f32 1.0, %v884_v16  ;;  %v2998_v16 = vld [vmem:[#allocation11 + $0x98] sm:$0xf] }
 0x1a0   :  { %v886_v19 = vmul.f32 %v3675_v14, %v885_v18  ;;  %v3526_v18 = vld [vmem:[#allocation11 + $0xa0] sm:$0xf0] }
 0x1a1   :  { %v3677_v25 = vpop.eup %3676 }
 0x1a2   :  { %v904_v26 = vmul.f32 %v3677_v25, %v902_v13  ;;  %v887_v27 = vadd.f32 %v3675_v14, %v886_v19  ;;  %vm909_vm12 = vweird.f32 %v3677_v25  ;;  %v3524_v13 = vld [vmem:[#allocation11 + $0x94] sm:$0xf]  ;;  %v2999_v19 = vor.u32 %v3526_v18, %v2998_v16  ;;  %v3514_v16 = vld [vmem:[#allocation11 + $0x40] sm:$0xf0] }
 0x1a3   :  { %vm910_vm14 = vmor %vm908_vm13, %vm909_vm12 }
 0x1a4   :  { %v905_v29 = vsub.f32 1.0, %v904_v26  ;;  %v891_v30 = vsel %vm890_vm10, %v3675_v14, %v887_v27  ;;  %v2992_v14 = vld [vmem:[#allocation11 + $0x9c] sm:$0xf0]  ;;  %1374 = vmatpush.bf16.msrb.mxu1 %v2999_v19  ;;  %v3521_v26 = vld [vmem:[#allocation11 + $0x7c] sm:$0xf] }
 0x1a5   :  { %v896_v34 = vsel %vm893_vm11, %v895_v28, %v891_v30  ;;  %v2995_v40 = vor.u32 %v3524_v13, %v2992_v14  ;;  %v2980_v28 = vld [vmem:[#allocation11 + $0x84] sm:$0xf0]  ;;  %v3523_v30 = vld [vmem:[#allocation11 + $0x88] sm:$0xf0]  ;;  %v2950_v14 = vld [vmem:[#allocation11 + $0x38] sm:$0xf] }
 0x1a6   :  { %v906_v35 = vmul.f32 %v3677_v25, %v905_v29  ;;  %v919_v62 = vmul.f32 %v918_v33, %v896_v34  ;;  %v2986_v29 = vld [vmem:[#allocation11 + $0x80] sm:$0xf]  ;;  %v2983_v33 = vor.u32 %v3521_v26, %v2980_v28  ;;  %v2951_v19 = vor.u32 %v3514_v16, %v2950_v14  ;;  %v2930_v26 = vld [vmem:[#allocation11 + $0x18] sm:$0xf]  ;;  %v3509_v28 = vld [vmem:[#allocation11 + $0x1c] sm:$0xf] }
 0x1a7   :  { %1361 = vmatpush.bf16.msrb.mxu0 %v2995_v40  ;;  %v2987_v34 = vor.u32 %v3523_v30, %v2986_v29  ;;  %v2932_v30 = vld [vmem:[#allocation11 + $0x24] sm:$0xf0] }
 0x1a8   :  { %v907_v20 = vadd.f32 %v3677_v25, %v906_v35  ;;  %v920_v39 = vadd.f32 %v919_v62, %v3996_v36  ;;  %v3002_v36 = vld [vmem:[#allocation11 + $0xa8] sm:$0xf]  ;;  %v2966_v35 = vld [vmem:[#allocation11 + $0x60] sm:$0xf]  ;;  %v3518_v62 = vld [vmem:[#allocation11 + $0x64] sm:$0xf] }
 0x1a9   :  { %v3003_v59 = vor.u32 %v3528_v53, %v3002_v36  ;;  %1375 = vmatpush.bf16.msrb.mxu1 %v2987_v34  ;;  %v2967_v38 = vor.u32 %v3519_v37, %v2966_v35  ;;  %v3516_v36 = vld [vmem:[#allocation11 + $0x50] sm:$0xf0]  ;;  %v3515_v53 = vld [vmem:[#allocation11 + $0x4c] sm:$0xf]  ;;  %v2935_v37 = vor.u32 %v3509_v28, %v2932_v30 }
 0x1aa   :  { %v911_v42 = vsel %vm910_vm14, %v3677_v25, %v907_v20  ;;  %3678 = vtanh.f32 %v920_v39  ;;  %v3522_v25 = vld [vmem:[#allocation11 + $0x80] sm:$0xf0]  ;;  %v2968_v20 = vld [vmem:[#allocation11 + $0x6c] sm:$0xf0]  ;;  %v2974_v39 = vld [vmem:[#allocation11 + $0x68] sm:$0xf] }
 0x1ab   :  { %v916_v43 = vsel %vm913_vm15, %v915_v41, %v911_v42  ;;  %1347 = vmatpush.bf16.msrb.mxu3 %v3003_v59  ;;  %v2979_v27 = vor.u32 %v3522_v25, %v2978_v21  ;;  %1362 = vmatpush.bf16.msrb.mxu0 %v2983_v33  ;;  %v3520_v41 = vld [vmem:[#allocation11 + $0x70] sm:$0xf0]  ;;  %v348_v42 = vadd.f32 %v4041_v63, %v3982_v55  ;;  %v2956_v59 = vld [vmem:[#allocation11 + $0x54] sm:$0xf0]  ;;  %v2938_v33 = vld [vmem:[#allocation11 + $0x20] sm:$0xf] }
 0x1ac   :  { %v922_v44 = vsub.f32 1.0, %v916_v43  ;;  %v924_v32 = vmul.f32 %v916_v43, %v4032_v58  ;;  %v2971_v43 = vor.u32 %v3518_v62, %v2968_v20  ;;  %v2959_v63 = vor.u32 %v3515_v53, %v2956_v59  ;;  %v3511_v34 = vld [vmem:[#allocation11 + $0x28] sm:$0xf0] }
 0x1ad   :  { %v2939_v62 = vor.u32 %v3511_v34, %v2938_v33  ;;  %v3507_v20 = vld [vmem:[#allocation11 + $0x8] sm:$0xf0] }
 0x1af   :  { %1363 = vmatpush.bf16.msrb.mxu0 %v2971_v43 }
 0x1b0   :  { %v3679_v3 = vpop.eup %3678 }
 0x1b1   :  { %v923_v49 = vmul.f32 %v3679_v3, %v922_v44  ;;  %v2975_v44 = vor.u32 %v3520_v41, %v2974_v39  ;;  %v3506_v39 = vld [vmem:[#allocation11 + $0x4] sm:$0xf] }
 0x1b3   :  { %v4061_v50 = vadd.f32 %v924_v32, %v923_v49  ;;  %1376 = vmatpush.bf16.msrb.mxu1 %v2975_v44  ;;  %1364 = vmatpush.bf16.msrb.mxu0 %v2959_v63  ;;  %v2920_v44 = vld [vmem:[#allocation11 + $0xc] sm:$0xf0] }
 0x1b5   :  { %v930_v51 = vpack.c.bf16 %v4061_v50, %v4061_v50  ;;  %v3629_v52 = vpack.c.bf16 %v4061_v50, %v4032_v58  ;;  %v2991_v58 = vor.u32 %v3525_v12, %v2990_v10  ;;  %v2942_v10 = vld [vmem:[#allocation11 + $0x30] sm:$0xf]  ;;  %v3512_v12 = vld [vmem:[#allocation11 + $0x34] sm:$0xf] }
 0x1b7   :  { %1099 = vmatmul.bf16.vlgmr.msra.gmra.mxu0 %v930_v51  ;;  %1112 = vmatmul.bf16.vlgmr.msra.gmra.mxu1 %v930_v51  ;;  %3630 = vst [vmem:[#allocation14] sm:$0xff] %v3629_v52   ;;  %v2954_v52 = vld [vmem:[#allocation11 + $0x48] sm:$0xf] }
 0x1b8   :  { %1125 = vmatmul.bf16.vlgmr.msra.gmra.mxu2 %v930_v51  ;;  %1348 = vmatpush.bf16.msrb.mxu3 %v2991_v58  ;;  %v2955_v56 = vor.u32 %v3516_v36, %v2954_v52  ;;  %v2944_v58 = vld [vmem:[#allocation11 + $0x3c] sm:$0xf0] }
 0x1b9   :  { %1377 = vmatpush.bf16.msrb.mxu1 %v2963_v7  ;;  %v2947_v40 = vor.u32 %v3512_v12, %v2944_v58 }
 0x1bb   :  { %1365 = vmatpush.bf16.msrb.mxu0 %v2947_v40 }
 0x1bc   :  { %1349 = vmatpush.bf16.msrb.mxu3 %v2979_v27  ;;  %v3510_v27 = vld [vmem:[#allocation11 + $0x20] sm:$0xf0] }
 0x1bd   :  { %1378 = vmatpush.bf16.msrb.mxu1 %v2951_v19  ;;  %v2931_v29 = vor.u32 %v3510_v27, %v2930_v26 }
 0x1bf   :  { %1366 = vmatpush.bf16.msrb.mxu0 %v2935_v37  ;;  %v3100_v37 = vld [vmem:[#allocation11 + $0xa8] sm:$0xf] }
 0x1c0   :  { %1350 = vmatpush.bf16.msrb.mxu3 %v2967_v38  ;;  %v2918_v38 = vld [vmem:[#allocation11] sm:$0xf] }
 0x1c1   :  { %v2919_v43 = vor.u32 %v3507_v20, %v2918_v38  ;;  %1379 = vmatpush.bf16.msrb.mxu1 %v2939_v62  ;;  %v3551_v62 = vld [vmem:[#allocation11 + $0xac] sm:$0xf]  ;;  %v3102_v20 = vld [vmem:[#allocation11 + $0xb4] sm:$0xf0] }
 0x1c4   :  { %1351 = vmatpush.bf16.msrb.mxu3 %v2955_v56 }
 0x234   :  { %v1100_v3 = vpop.f32.mrf.mxu0  ;;  %v1113_v49 = vpop.f32.mrf.mxu1 }
 0x235   :  { %v1134_v32 = vadd.f32 %v1100_v3, %v3977_v45  ;;  %v1154_v51 = vadd.f32 %v1113_v49, %v348_v42  ;;  %v3513_v45 = vld [vmem:[#allocation11 + $0x38] sm:$0xf0]  ;;  %v2923_v49 = vor.u32 %v3506_v39, %v2920_v44  ;;  %v3108_v39 = vld [vmem:[#allocation11 + $0xb0] sm:$0xf] }
 0x236   :  { %v2943_v13 = vor.u32 %v3513_v45, %v2942_v10  ;;  %v3549_v44 = vld [vmem:[#allocation11 + $0x98] sm:$0xf0] }
 0x237   :  { %v2914_v5 = vmul.f32 -1.442695, %v1134_v32  ;;  %v2915_v6 = vmul.f32 -1.442695, %v1154_v51  ;;  %v2926_v32 = vld [vmem:[#allocation11 + $0x8] sm:$0xf]  ;;  %1367 = vmatpush.bf16.msrb.mxu0 %v2923_v49 }
 0x238   :  { %1352 = vmatpush.bf16.msrb.mxu3 %v2943_v13  ;;  %v3508_v51 = vld [vmem:[#allocation11 + $0x10] sm:$0xf0] }
 0x239   :  { %3680 = vpow2.f32 %v2914_v5  ;;  %v2927_v36 = vor.u32 %v3508_v51, %v2926_v32  ;;  %v3090_v32 = vld [vmem:[#allocation11 + $0x9c] sm:$0xf0]  ;;  %v3096_v51 = vld [vmem:[#allocation11 + $0x98] sm:$0xf] }
 0x23a   :  { %3682 = vpow2.f32 %v2915_v6 }
 0x23b   :  { %v1126_v18 = vpop.f32.mrf.mxu2  ;;  %1380 = vmatpush.bf16.msrb.mxu1 %v2927_v36 }
 0x23c   :  { %v1102_v21 = vpop.f32.mrf.mxu0  ;;  %v1115_v25 = vpop.f32.mrf.mxu1  ;;  %1353 = vmatpush.bf16.msrb.mxu3 %v2931_v29  ;;  %v1174_v58 = vadd.f32 %v4015_v8, %v1126_v18 }
 0x23f   :  { %v3681_v35 = vpop.eup %3680 }
 0x240   :  { %v3683_v41 = vpop.eup %3682  ;;  %v1138_v42 = vadd.f32 1.0, %v3681_v35  ;;  %1354 = vmatpush.bf16.msrb.mxu3 %v2919_v43 }
 0x241   :  { %v1158_v3 = vadd.f32 1.0, %v3683_v41  ;;  %v3553_v41 = vld [vmem:[#allocation11 + $0xb8] sm:$0xf0] }
 0x242   :  { %3684 = vrcp.f32 %v1138_v42  ;;  %v1150_v6 = vand.u32 2147483648, %v1138_v42  ;;  %v1148_v7 = vand.u32 2147483647, %v1138_v42  ;;  %vm1144_vm1 = vweird.f32 %v1138_v42 }
 0x243   :  { %3686 = vrcp.f32 %v1158_v3  ;;  %v1128_v52 = vpop.f32.mrf.mxu2  ;;  %v1170_v40 = vand.u32 2147483648, %v1158_v3  ;;  %vm1164_vm5 = vweird.f32 %v1158_v3  ;;  %v1168_v21 = vand.u32 2147483647, %v1158_v3 }
 0x244   :  { %v1151_v12 = vor.u32 1.1754944e-38, %v1150_v6  ;;  %vm1149_vm3 = vcmp.eq.f32.partialorder %v1148_v7, 8.507059e+37  ;;  %v3109_v43 = vor.u32 %v3553_v41, %v3108_v39  ;;  %v3550_v52 = vld [vmem:[#allocation11 + $0xa0] sm:$0xf0]  ;;  %v3084_v7 = vld [vmem:[#allocation11 + $0x80] sm:$0xf] }
 0x245   :  { %v1171_v27 = vor.u32 1.1754944e-38, %v1170_v40  ;;  %vm1169_vm7 = vcmp.eq.f32.partialorder %v1168_v21, 8.507059e+37  ;;  %v3066_v21 = vld [vmem:[#allocation11 + $0x6c] sm:$0xf0]  ;;  %v3537_v41 = vld [vmem:[#allocation11 + $0x38] sm:$0xf0] }
 0x246   :  { %1629 = vmatpush.bf16.msra.mxu0 %v3109_v43  ;;  %v3040_v39 = vld [vmem:[#allocation11 + $0x30] sm:$0xf] }
 0x248   :  { %v3685_v53 = vpop.eup %3684 }
 0x249   :  { %v3687_v56 = vpop.eup %3686  ;;  %v1140_v59 = vmul.f32 %v3685_v53, %v1138_v42  ;;  %vm1145_vm0 = vweird.f32 %v3685_v53  ;;  %v3105_v42 = vor.u32 %v3551_v62, %v3102_v20  ;;  %v3541_v20 = vld [vmem:[#allocation11 + $0x58] sm:$0xf0] }
 0x24a   :  { %v1160_v60 = vmul.f32 %v3687_v56, %v1158_v3  ;;  %vm1146_vm2 = vmor %vm1144_vm1, %vm1145_vm0  ;;  %vm1165_vm4 = vweird.f32 %v3687_v56  ;;  %v3548_v3 = vld [vmem:[#allocation11 + $0x94] sm:$0xf] }
 0x24b   :  { %v1141_v4 = vsub.f32 1.0, %v1140_v59  ;;  %vm1166_vm6 = vmor %vm1164_vm5, %vm1165_vm4  ;;  %1616 = vmatpush.bf16.msra.mxu3 %v3105_v42  ;;  %v3093_v36 = vor.u32 %v3548_v3, %v3090_v32  ;;  %v3076_v59 = vld [vmem:[#allocation11 + $0x78] sm:$0xf] }
 0x24c   :  { %v1161_v5 = vsub.f32 1.0, %v1160_v60  ;;  %v3546_v60 = vld [vmem:[#allocation11 + $0x80] sm:$0xf0]  ;;  %v3048_v32 = vld [vmem:[#allocation11 + $0x38] sm:$0xf] }
 0x24d   :  { %v1142_v63 = vmul.f32 %v3685_v53, %v1141_v4  ;;  %v3545_v4 = vld [vmem:[#allocation11 + $0x7c] sm:$0xf]  ;;  %v3077_v6 = vor.u32 %v3546_v60, %v3076_v59 }
 0x24e   :  { %v1162_v10 = vmul.f32 %v3687_v56, %v1161_v5 }
 0x24f   :  { %v1143_v45 = vadd.f32 %v3685_v53, %v1142_v63  ;;  %1617 = vmatpush.bf16.msra.mxu3 %v3093_v36  ;;  %v3078_v63 = vld [vmem:[#allocation11 + $0x84] sm:$0xf0] }
 0x250   :  { %v1163_v14 = vadd.f32 %v3687_v56, %v1162_v10  ;;  %v3547_v10 = vld [vmem:[#allocation11 + $0x88] sm:$0xf0] }
 0x251   :  { %v1147_v13 = vsel %vm1146_vm2, %v3685_v53, %v1143_v45  ;;  %v3097_v53 = vor.u32 %v3550_v52, %v3096_v51  ;;  %v3538_v51 = vld [vmem:[#allocation11 + $0x40] sm:$0xf0]  ;;  %v3041_v52 = vor.u32 %v3537_v41, %v3040_v39 }
 0x252   :  { %v1152_v16 = vsel %vm1149_vm3, %v1151_v12, %v1147_v13  ;;  %v1167_v26 = vsel %vm1166_vm6, %v3687_v56, %v1163_v14  ;;  %v350_v56 = vadd.f32 %v4043_v9, %v3982_v55  ;;  %v3081_v13 = vor.u32 %v3545_v4, %v3078_v63  ;;  %v3064_v9 = vld [vmem:[#allocation11 + $0x60] sm:$0xf]  ;;  %v3533_v4 = vld [vmem:[#allocation11 + $0x1c] sm:$0xf]  ;;  %v3535_v63 = vld [vmem:[#allocation11 + $0x28] sm:$0xf0] }
 0x253   :  { %v1175_v19 = vmul.f32 %v1174_v58, %v1152_v16  ;;  %v1172_v28 = vsel %vm1169_vm7, %v1171_v27, %v1167_v26  ;;  %1630 = vmatpush.bf16.msra.mxu0 %v3097_v53  ;;  %v3085_v58 = vor.u32 %v3547_v10, %v3084_v7  ;;  %v3543_v16 = vld [vmem:[#allocation11 + $0x68] sm:$0xf0]  ;;  %v3544_v27 = vld [vmem:[#allocation11 + $0x70] sm:$0xf0]  ;;  %v3028_v53 = vld [vmem:[#allocation11 + $0x18] sm:$0xf]  ;;  %v3049_v60 = vor.u32 %v3538_v51, %v3048_v32 }
 0x254   :  { %v1178_v29 = vsub.f32 1.0, %v1172_v28  ;;  %v1180_v18 = vmul.f32 %v1172_v28, %v4061_v50  ;;  %v3088_v50 = vld [vmem:[#allocation11 + $0x90] sm:$0xf]  ;;  %1618 = vmatpush.bf16.msra.mxu3 %v3081_v13  ;;  %v3065_v40 = vor.u32 %v3543_v16, %v3064_v9  ;;  %v3052_v28 = vld [vmem:[#allocation11 + $0x48] sm:$0xf] }
 0x255   :  { %v1176_v25 = vadd.f32 %v1175_v19, %v4006_v15  ;;  %v3552_v15 = vld [vmem:[#allocation11 + $0xb0] sm:$0xf0]  ;;  %v3089_v49 = vor.u32 %v3549_v44, %v3088_v50  ;;  %v3542_v19 = vld [vmem:[#allocation11 + $0x64] sm:$0xf]  ;;  %v3042_v44 = vld [vmem:[#allocation11 + $0x3c] sm:$0xf0] }
 0x256   :  { %v3101_v38 = vor.u32 %v3552_v15, %v3100_v37  ;;  %v3069_v26 = vor.u32 %v3542_v19, %v3066_v21  ;;  %v3054_v37 = vld [vmem:[#allocation11 + $0x54] sm:$0xf0]  ;;  %v3060_v15 = vld [vmem:[#allocation11 + $0x50] sm:$0xf]  ;;  %v3536_v50 = vld [vmem:[#allocation11 + $0x34] sm:$0xf] }
 0x257   :  { %3688 = vtanh.f32 %v1176_v25  ;;  %1631 = vmatpush.bf16.msra.mxu0 %v3085_v58  ;;  %v3072_v25 = vld [vmem:[#allocation11 + $0x68] sm:$0xf]  ;;  %v3061_v43 = vor.u32 %v3541_v20, %v3060_v15  ;;  %v3016_v13 = vld [vmem:[#allocation11] sm:$0xf]  ;;  %v3531_v58 = vld [vmem:[#allocation11 + $0x8] sm:$0xf0] }
 0x258   :  { %1603 = vmatpush.bf16.msrb.mxu2 %v3101_v38  ;;  %1619 = vmatpush.bf16.msra.mxu3 %v3069_v26  ;;  %v3530_v9 = vld [vmem:[#allocation11 + $0x4] sm:$0xf]  ;;  %v3018_v16 = vld [vmem:[#allocation11 + $0xc] sm:$0xf0]  ;;  %v3024_v19 = vld [vmem:[#allocation11 + $0x8] sm:$0xf]  ;;  %v3017_v26 = vor.u32 %v3531_v58, %v3016_v13 }
 0x259   :  { %v3532_v21 = vld [vmem:[#allocation11 + $0x10] sm:$0xf0] }
 0x25c   :  { %1604 = vmatpush.bf16.msrb.mxu2 %v3089_v49 }
 0x25d   :  { %v3689_v30 = vpop.eup %3688 }
 0x25e   :  { %v1179_v33 = vmul.f32 %v3689_v30, %v1178_v29  ;;  %v3540_v29 = vld [vmem:[#allocation11 + $0x50] sm:$0xf0] }
 0x260   :  { %v4073_v34 = vadd.f32 %v1180_v18, %v1179_v33  ;;  %1605 = vmatpush.bf16.msrb.mxu2 %v3077_v6  ;;  %v3073_v33 = vor.u32 %v3544_v27, %v3072_v25  ;;  %v3053_v18 = vor.u32 %v3540_v29, %v3052_v28  ;;  %v3036_v6 = vld [vmem:[#allocation11 + $0x20] sm:$0xf]  ;;  %v3021_v27 = vor.u32 %v3530_v9, %v3018_v16  ;;  %v3573_v9 = vld [vmem:[#allocation11 + $0x98] sm:$0xf0]  ;;  %v3572_v16 = vld [vmem:[#allocation11 + $0x94] sm:$0xf] }
 0x261   :  { %v3025_v28 = vor.u32 %v3532_v21, %v3024_v19  ;;  %v3194_v19 = vld [vmem:[#allocation11 + $0x98] sm:$0xf]  ;;  %v3574_v21 = vld [vmem:[#allocation11 + $0xa0] sm:$0xf0] }
 0x262   :  { %v1186_v35 = vpack.c.bf16 %v4073_v34, %v4073_v34  ;;  %1632 = vmatpush.bf16.msra.mxu0 %v3073_v33 }
 0x264   :  { %1355 = vmatmul.bf16.vlgmr.msrb.gmra.mxu3 %v1186_v35  ;;  %1368 = vmatmul.bf16.vlgmr.msrb.gmra.mxu0 %v1186_v35 }
 0x265   :  { %1381 = vmatmul.bf16.vlgmr.msrb.gmra.mxu1 %v1186_v35  ;;  %1606 = vmatpush.bf16.msrb.mxu2 %v3065_v40  ;;  %v3539_v35 = vld [vmem:[#allocation11 + $0x4c] sm:$0xf] }
 0x266   :  { %v3057_v38 = vor.u32 %v3539_v35, %v3054_v37  ;;  %1633 = vmatpush.bf16.msra.mxu0 %v3061_v43 }
 0x268   :  { %1620 = vmatpush.bf16.msra.mxu3 %v3057_v38 }
 0x269   :  { %1607 = vmatpush.bf16.msrb.mxu2 %v3053_v18 }
 0x26a   :  { %1634 = vmatpush.bf16.msra.mxu0 %v3049_v60 }
 0x26d   :  { %1608 = vmatpush.bf16.msrb.mxu2 %v3041_v52 }
 0x2e1   :  { %v1369_v5 = vpop.f32.mrf.mxu0 }
 0x2e2   :  { %v1410_v45 = vadd.f32 %v1369_v5, %v350_v56  ;;  %v4079_v12 = vpop.f32.mrf.mxu1  ;;  %v3534_v56 = vld [vmem:[#allocation11 + $0x20] sm:$0xf0]  ;;  %v3030_v5 = vld [vmem:[#allocation11 + $0x24] sm:$0xf0] }
 0x2e3   :  { %v3029_v10 = vor.u32 %v3534_v56, %v3028_v53 }
 0x2e4   :  { %v3013_v14 = vmul.f32 -1.442695, %v1410_v45  ;;  %v3033_v45 = vor.u32 %v3533_v4, %v3030_v5  ;;  %v3576_v5 = vld [vmem:[#allocation11 + $0xb0] sm:$0xf0] }
 0x2e5   :  { %1609 = vmatpush.bf16.msrb.mxu2 %v3029_v10  ;;  %v3206_v10 = vld [vmem:[#allocation11 + $0xb0] sm:$0xf] }
 0x2e6   :  { %3690 = vpow2.f32 %v3013_v14  ;;  %v3037_v14 = vor.u32 %v3535_v63, %v3036_v6  ;;  %v3575_v6 = vld [vmem:[#allocation11 + $0xac] sm:$0xf] }
 0x2e7   :  { %v1356_v30 = vpop.f32.mrf.mxu3 }
 0x2e8   :  { %v1390_v62 = vadd.f32 %v1356_v30, %v3980_v54  ;;  %v3045_v54 = vor.u32 %v3536_v50, %v3042_v44  ;;  %1635 = vmatpush.bf16.msra.mxu0 %v3037_v14  ;;  %v3186_v14 = vld [vmem:[#allocation11 + $0x90] sm:$0xf] }
 0x2e9   :  { %v1371_v42 = vpop.f32.mrf.mxu0  ;;  %1610 = vmatpush.bf16.msrb.mxu2 %v3017_v26  ;;  %v3195_v26 = vor.u32 %v3574_v21, %v3194_v19  ;;  %v3557_v19 = vld [vmem:[#allocation11 + $0x1c] sm:$0xf]  ;;  %v3128_v21 = vld [vmem:[#allocation11 + $0x24] sm:$0xf0] }
 0x2ea   :  { %v3012_v3 = vmul.f32 -1.442695, %v1390_v62  ;;  %v1384_v49 = vpop.f32.mrf.mxu1  ;;  %1621 = vmatpush.bf16.msra.mxu3 %v3045_v54  ;;  %v1430_v42 = vadd.f32 %v4015_v8, %v4079_v12 }
 0x2ec   :  { %v3691_v36 = vpop.eup %3690  ;;  %3692 = vpow2.f32 %v3012_v3  ;;  %1636 = vmatpush.bf16.msra.mxu0 %v3025_v28  ;;  %v3570_v28 = vld [vmem:[#allocation11 + $0x80] sm:$0xf0] }
 0x2ed   :  { %v4082_v59 = vadd.f32 1.0, %v3691_v36 }
 0x2ee   :  { %1622 = vmatpush.bf16.msra.mxu3 %v3033_v45  ;;  %v3577_v45 = vld [vmem:[#allocation11 + $0xb8] sm:$0xf0] }
 0x2ef   :  { %v1358_v7 = vpop.f32.mrf.mxu3  ;;  %3694 = vrcp.f32 %v4082_v59  ;;  %v1426_v3 = vand.u32 2147483648, %v4082_v59  ;;  %vm1420_vm13 = vweird.f32 %v4082_v59  ;;  %v1424_v32 = vand.u32 2147483647, %v4082_v59 }
 0x2f0   :  { %v3200_v7 = vld [vmem:[#allocation11 + $0xb4] sm:$0xf0]  ;;  %v3207_v58 = vor.u32 %v3577_v45, %v3206_v10  ;;  %v3562_v45 = vld [vmem:[#allocation11 + $0x40] sm:$0xf0] }
 0x2f1   :  { %v1427_v36 = vor.u32 1.1754944e-38, %v1426_v3  ;;  %vm1425_vm15 = vcmp.eq.f32.partialorder %v1424_v32, 8.507059e+37  ;;  %v3203_v13 = vor.u32 %v3575_v6, %v3200_v7  ;;  %v3150_v32 = vld [vmem:[#allocation11 + $0x48] sm:$0xf]  ;;  %v3560_v6 = vld [vmem:[#allocation11 + $0x34] sm:$0xf] }
 0x2f2   :  { %v3693_v40 = vpop.eup %3692  ;;  %1623 = vmatpush.bf16.msra.mxu3 %v3021_v27  ;;  %v3174_v27 = vld [vmem:[#allocation11 + $0x78] sm:$0xf]  ;;  %v3140_v7 = vld [vmem:[#allocation11 + $0x3c] sm:$0xf0] }
 0x2f3   :  { %v1394_v25 = vadd.f32 1.0, %v3693_v40  ;;  %1872 = vmatpush.bf16.msra.mxu2 %v3203_v13  ;;  %v3188_v40 = vld [vmem:[#allocation11 + $0x9c] sm:$0xf0]  ;;  %v3146_v10 = vld [vmem:[#allocation11 + $0x38] sm:$0xf] }
 0x2f5   :  { %3696 = vrcp.f32 %v1394_v25  ;;  %v3695_v29 = vpop.eup %3694  ;;  %v1406_v15 = vand.u32 2147483648, %v1394_v25  ;;  %v1404_v38 = vand.u32 2147483647, %v1394_v25  ;;  %vm1400_vm9 = vweird.f32 %v1394_v25 }
 0x2f6   :  { %v1416_v30 = vmul.f32 %v3695_v29, %v4082_v59  ;;  %vm1421_vm12 = vweird.f32 %v3695_v29  ;;  %1885 = vmatpush.bf16.msrb.mxu3 %v3207_v58 }
 0x2f7   :  { %v1407_v41 = vor.u32 1.1754944e-38, %v1406_v15  ;;  %vm1405_vm11 = vcmp.eq.f32.partialorder %v1404_v38, 8.507059e+37  ;;  %vm1422_vm14 = vmor %vm1420_vm13, %vm1421_vm12  ;;  %v3162_v38 = vld [vmem:[#allocation11 + $0x60] sm:$0xf] }
 0x2f8   :  { %v1417_v35 = vsub.f32 1.0, %v1416_v30  ;;  %v3175_v30 = vor.u32 %v3570_v28, %v3174_v27 }
 0x2fa   :  { %v1418_v20 = vmul.f32 %v3695_v29, %v1417_v35  ;;  %1886 = vmatpush.bf16.msrb.mxu3 %v3195_v26  ;;  %v3571_v35 = vld [vmem:[#allocation11 + $0x88] sm:$0xf0] }
 0x2fb   :  { %v3697_v33 = vpop.eup %3696  ;;  %v3559_v26 = vld [vmem:[#allocation11 + $0x28] sm:$0xf0] }
 0x2fc   :  { %v1396_v18 = vmul.f32 %v3697_v33, %v1394_v25  ;;  %vm1401_vm8 = vweird.f32 %v3697_v33  ;;  %v1419_v50 = vadd.f32 %v3695_v29, %v1418_v20  ;;  %v3191_v25 = vor.u32 %v3572_v16, %v3188_v40  ;;  %v3567_v20 = vld [vmem:[#allocation11 + $0x68] sm:$0xf0]  ;;  %v3558_v40 = vld [vmem:[#allocation11 + $0x20] sm:$0xf0] }
 0x2fd   :  { %vm1402_vm10 = vmor %vm1400_vm9, %vm1401_vm8  ;;  %v3147_v16 = vor.u32 %v3562_v45, %v3146_v10 }
 0x2fe   :  { %v1397_v37 = vsub.f32 1.0, %v1396_v18  ;;  %v1423_v52 = vsel %vm1422_vm14, %v3695_v29, %v1419_v50  ;;  %1873 = vmatpush.bf16.msra.mxu2 %v3191_v25  ;;  %v3569_v29 = vld [vmem:[#allocation11 + $0x7c] sm:$0xf]  ;;  %v3182_v18 = vld [vmem:[#allocation11 + $0x80] sm:$0xf] }
 0x2ff   :  { %v1428_v8 = vsel %vm1425_vm15, %v1427_v36, %v1423_v52  ;;  %v3568_v50 = vld [vmem:[#allocation11 + $0x70] sm:$0xf0]  ;;  %v3563_v52 = vld [vmem:[#allocation11 + $0x4c] sm:$0xf]  ;;  %v3134_v25 = vld [vmem:[#allocation11 + $0x20] sm:$0xf] }
 0x300   :  { %v1398_v62 = vmul.f32 %v3697_v33, %v1397_v37  ;;  %v1434_v12 = vsub.f32 1.0, %v1428_v8  ;;  %v1436_v56 = vmul.f32 %v1428_v8, %v4073_v34 }
 0x302   :  { %v1399_v39 = vadd.f32 %v3697_v33, %v1398_v62  ;;  %v3183_v62 = vor.u32 %v3571_v35, %v3182_v18  ;;  %v3114_v18 = vld [vmem:[#allocation11] sm:$0xf]  ;;  %v3555_v35 = vld [vmem:[#allocation11 + $0x8] sm:$0xf0] }
 0x304   :  { %v1403_v43 = vsel %vm1402_vm10, %v3697_v33, %v1399_v39  ;;  %v3176_v33 = vld [vmem:[#allocation11 + $0x84] sm:$0xf0]  ;;  %1887 = vmatpush.bf16.msrb.mxu3 %v3183_v62  ;;  %v3566_v39 = vld [vmem:[#allocation11 + $0x64] sm:$0xf]  ;;  %v3116_v62 = vld [vmem:[#allocation11 + $0xc] sm:$0xf0] }
 0x305   :  { %v1408_v44 = vsel %vm1405_vm11, %v1407_v41, %v1403_v43  ;;  %v3179_v15 = vor.u32 %v3569_v29, %v3176_v33  ;;  %v3163_v41 = vor.u32 %v3567_v20, %v3162_v38  ;;  %v3170_v43 = vld [vmem:[#allocation11 + $0x68] sm:$0xf]  ;;  %v3135_v33 = vor.u32 %v3559_v26, %v3134_v25  ;;  %v3556_v20 = vld [vmem:[#allocation11 + $0x10] sm:$0xf0]  ;;  %v3599_v25 = vld [vmem:[#allocation11 + $0xac] sm:$0xf] }
 0x306   :  { %v1431_v49 = vmul.f32 %v1430_v42, %v1408_v44  ;;  %v3164_v42 = vld [vmem:[#allocation11 + $0x6c] sm:$0xf0]  ;;  %v353_v44 = vadd.f32 %v4045_v0, %v3982_v55  ;;  %v3561_v0 = vld [vmem:[#allocation11 + $0x38] sm:$0xf0]  ;;  %v3122_v38 = vld [vmem:[#allocation11 + $0x8] sm:$0xf] }
 0x307   :  { %1874 = vmatpush.bf16.msra.mxu2 %v3179_v15  ;;  %v3167_v3 = vor.u32 %v3566_v39, %v3164_v42  ;;  %v3554_v15 = vld [vmem:[#allocation11 + $0x4] sm:$0xf] }
 0x308   :  { %v1432_v51 = vadd.f32 %v1431_v49, %v4020_v22  ;;  %v3198_v22 = vld [vmem:[#allocation11 + $0xa8] sm:$0xf]  ;;  %v3171_v49 = vor.u32 %v3568_v50, %v3170_v43  ;;  %v3115_v43 = vor.u32 %v3555_v35, %v3114_v18  ;;  %v3597_v18 = vld [vmem:[#allocation11 + $0x98] sm:$0xf0]  ;;  %v3596_v35 = vld [vmem:[#allocation11 + $0x94] sm:$0xf] }
 0x309   :  { %v3199_v63 = vor.u32 %v3576_v5, %v3198_v22  ;;  %v3138_v5 = vld [vmem:[#allocation11 + $0x30] sm:$0xf] }
 0x30a   :  { %3698 = vtanh.f32 %v1432_v51  ;;  %v3564_v51 = vld [vmem:[#allocation11 + $0x50] sm:$0xf0]  ;;  %1888 = vmatpush.bf16.msrb.mxu3 %v3171_v49 }
 0x30b   :  { %1859 = vmatpush.bf16.msra.mxu1 %v3199_v63  ;;  %1875 = vmatpush.bf16.msra.mxu2 %v3167_v3  ;;  %v3123_v3 = vor.u32 %v3556_v20, %v3122_v38  ;;  %v3292_v38 = vld [vmem:[#allocation11 + $0x98] sm:$0xf]  ;;  %v3598_v20 = vld [vmem:[#allocation11 + $0xa0] sm:$0xf0] }
 0x310   :  { %v3699_v54 = vpop.eup %3698 }
 0x311   :  { %v1435_v53 = vmul.f32 %v3699_v54, %v1434_v12  ;;  %v3151_v12 = vor.u32 %v3564_v51, %v3150_v32  ;;  %v3152_v54 = vld [vmem:[#allocation11 + $0x54] sm:$0xf0] }
 0x312   :  { %v3155_v22 = vor.u32 %v3563_v52, %v3152_v54 }
 0x313   :  { %v4093_v60 = vadd.f32 %v1436_v56, %v1435_v53  ;;  %v3158_v53 = vld [vmem:[#allocation11 + $0x50] sm:$0xf]  ;;  %v3565_v56 = vld [vmem:[#allocation11 + $0x58] sm:$0xf0] }
 0x314   :  { %v3159_v63 = vor.u32 %v3565_v56, %v3158_v53  ;;  %1876 = vmatpush.bf16.msra.mxu2 %v3155_v22  ;;  %v4107_v22 = vld [vmem:[%s4157_s4] ss:$0 sm:$0xff]  ;;  %s3902_s4 = smov [#allocation14]  }
 0x315   :  { %v1442_v4 = vpack.c.bf16 %v4093_v60, %v4093_v60  ;;  %v3634_v59 = vpack.c.bf16 %v4093_v60, %v4073_v34  ;;  %v3187_v34 = vor.u32 %v3573_v9, %v3186_v14  ;;  %v3139_v9 = vor.u32 %v3561_v0, %v3138_v5  ;;  %s2493_s25 = sshll.u32 %s3902_s4, 4  ;;  %s2494_s25 = int_to_ptr.vmem [resolvable:$true] %s2493_s25 }
 0x316   :  { %1889 = vmatpush.bf16.msrb.mxu3 %v3159_v63 }
 0x317   :  { %1611 = vmatmul.bf16.vlgmr.msrb.gmra.mxu2 %v1442_v4  ;;  %1624 = vmatmul.bf16.vlgmr.msra.gmra.mxu3 %v1442_v4  ;;  %3646 = vst [vmem:[#allocation14 + $0x8] sm:$0xff] %v3634_v59  }
 0x318   :  { %1637 = vmatmul.bf16.vlgmr.msra.gmra.mxu0 %v1442_v4  ;;  %1860 = vmatpush.bf16.msra.mxu1 %v3187_v34  ;;  %v3126_v34 = vld [vmem:[#allocation11 + $0x18] sm:$0xf] }
 0x319   :  { %v3127_v29 = vor.u32 %v3558_v40, %v3126_v34 }
 0x31a   :  { %1890 = vmatpush.bf16.msrb.mxu3 %v3147_v16 }
 0x31c   :  { %1861 = vmatpush.bf16.msra.mxu1 %v3175_v30  ;;  %v3131_v30 = vor.u32 %v3557_v19, %v3128_v21  ;;  %v3296_v21 = vld [vmem:[#allocation11 + $0xa8] sm:$0xf] }
 0x31e   :  { %1891 = vmatpush.bf16.msrb.mxu3 %v3135_v33 }
 0x320   :  { %1862 = vmatpush.bf16.msra.mxu1 %v3163_v41 }
 0x322   :  { %1892 = vmatpush.bf16.msrb.mxu3 %v3123_v3  ;;  %v3274_v3 = vld [vmem:[#allocation11 + $0x84] sm:$0xf0] }
 0x324   :  { %1863 = vmatpush.bf16.msra.mxu1 %v3151_v12 }
 0x328   :  { %1864 = vmatpush.bf16.msra.mxu1 %v3139_v9 }
 0x32c   :  { %1865 = vmatpush.bf16.msra.mxu1 %v3127_v29  ;;  %v3601_v29 = vld [vmem:[#allocation11 + $0xb8] sm:$0xf0] }
 0x330   :  { %1866 = vmatpush.bf16.msra.mxu1 %v3115_v43  ;;  %v3594_v43 = vld [vmem:[#allocation11 + $0x80] sm:$0xf0] }
 0x395   :  { %v4099_v37 = vpop.f32.mrf.mxu0 }
 0x396   :  { %v1686_v5 = vadd.f32 %v4107_v22, %v4099_v37 }
 0x39a   :  { %v1612_v36 = vpop.f32.mrf.mxu2  ;;  %v1625_v8 = vpop.f32.mrf.mxu3 }
 0x39b   :  { %v1646_v4 = vadd.f32 %v1612_v36, %v3987_v17  ;;  %v1666_v59 = vadd.f32 %v1625_v8, %v353_v44  ;;  %v3143_v17 = vor.u32 %v3560_v6, %v3140_v7  ;;  %v3119_v44 = vor.u32 %v3554_v15, %v3116_v62  ;;  %v3286_v62 = vld [vmem:[#allocation11 + $0x9c] sm:$0xf0] }
 0x39d   :  { %v3110_v13 = vmul.f32 -1.442695, %v1646_v4  ;;  %v3111_v58 = vmul.f32 -1.442695, %v1666_v59  ;;  %v1640_v14 = vpop.f32.mrf.mxu0  ;;  %1877 = vmatpush.bf16.msra.mxu2 %v3143_v17 }
 0x39f   :  { %3700 = vpow2.f32 %v3110_v13 }
 0x3a0   :  { %3702 = vpow2.f32 %v3111_v58 }
 0x3a1   :  { %1878 = vmatpush.bf16.msra.mxu2 %v3131_v30 }
 0x3a2   :  { %v1614_v27 = vpop.f32.mrf.mxu2  ;;  %v1627_v28 = vpop.f32.mrf.mxu3 }
 0x3a3   :  { %v3298_v27 = vld [vmem:[#allocation11 + $0xb4] sm:$0xf0]  ;;  %v3304_v28 = vld [vmem:[#allocation11 + $0xb0] sm:$0xf] }
 0x3a4   :  { %v3301_v30 = vor.u32 %v3599_v25, %v3298_v27  ;;  %v3305_v33 = vor.u32 %v3601_v29, %v3304_v28  ;;  %v3238_v25 = vld [vmem:[#allocation11 + $0x3c] sm:$0xf0]  ;;  %v3586_v27 = vld [vmem:[#allocation11 + $0x40] sm:$0xf0] }
 0x3a5   :  { %v3701_v39 = vpop.eup %3700  ;;  %1879 = vmatpush.bf16.msra.mxu2 %v3119_v44 }
 0x3a6   :  { %v3703_v41 = vpop.eup %3702  ;;  %v1650_v42 = vadd.f32 1.0, %v3701_v39  ;;  %2128 = vmatpush.bf16.msrb.mxu1 %v3301_v30  ;;  %v3289_v39 = vor.u32 %v3596_v35, %v3286_v62  ;;  %v3582_v35 = vld [vmem:[#allocation11 + $0x20] sm:$0xf0]  ;;  %v3581_v62 = vld [vmem:[#allocation11 + $0x1c] sm:$0xf] }
 0x3a7   :  { %v1670_v50 = vadd.f32 1.0, %v3703_v41  ;;  %v3293_v41 = vor.u32 %v3598_v20, %v3292_v38  ;;  %v3226_v38 = vld [vmem:[#allocation11 + $0x24] sm:$0xf0]  ;;  %v3232_v20 = vld [vmem:[#allocation11 + $0x20] sm:$0xf] }
 0x3a8   :  { %3704 = vrcp.f32 %v1650_v42  ;;  %v1662_v8 = vand.u32 2147483648, %v1650_v42  ;;  %v1660_v53 = vand.u32 2147483647, %v1650_v42  ;;  %vm1656_vm1 = vweird.f32 %v1650_v42 }
 0x3a9   :  { %3706 = vrcp.f32 %v1670_v50  ;;  %v1682_v10 = vand.u32 2147483648, %v1670_v50  ;;  %vm1676_vm5 = vweird.f32 %v1670_v50  ;;  %v1680_v45 = vand.u32 2147483647, %v1670_v50  ;;  %2141 = vmatpush.bf16.msrb.mxu2 %v3305_v33 }
 0x3aa   :  { %v1663_v59 = vor.u32 1.1754944e-38, %v1662_v8  ;;  %vm1661_vm3 = vcmp.eq.f32.partialorder %v1660_v53, 8.507059e+37  ;;  %2129 = vmatpush.bf16.msrb.mxu1 %v3289_v39  ;;  %v3591_v8 = vld [vmem:[#allocation11 + $0x68] sm:$0xf0]  ;;  %v3262_v53 = vld [vmem:[#allocation11 + $0x6c] sm:$0xf0] }
 0x3ab   :  { %v1683_v14 = vor.u32 1.1754944e-38, %v1682_v10  ;;  %vm1681_vm7 = vcmp.eq.f32.partialorder %v1680_v45, 8.507059e+37  ;;  %v3587_v10 = vld [vmem:[#allocation11 + $0x4c] sm:$0xf] }
 0x3ad   :  { %2142 = vmatpush.bf16.msrb.mxu2 %v3293_v41  ;;  %v3229_v41 = vor.u32 %v3581_v62, %v3226_v38  ;;  %v3396_v38 = vld [vmem:[#allocation11 + $0xb4] sm:$0xf0] }
 0x3ae   :  { %v3705_v49 = vpop.eup %3704 }
 0x3af   :  { %v3707_v32 = vpop.eup %3706  ;;  %v1652_v51 = vmul.f32 %v3705_v49, %v1650_v42  ;;  %vm1657_vm0 = vweird.f32 %v3705_v49  ;;  %v3272_v42 = vld [vmem:[#allocation11 + $0x78] sm:$0xf] }
 0x3b0   :  { %v1672_v52 = vmul.f32 %v3707_v32, %v1670_v50  ;;  %vm1658_vm2 = vmor %vm1656_vm1, %vm1657_vm0  ;;  %vm1677_vm4 = vweird.f32 %v3707_v32  ;;  %v3593_v50 = vld [vmem:[#allocation11 + $0x7c] sm:$0xf]  ;;  %v3273_v44 = vor.u32 %v3594_v43, %v3272_v42  ;;  %v3583_v42 = vld [vmem:[#allocation11 + $0x28] sm:$0xf0] }
 0x3b1   :  { %v1653_v36 = vsub.f32 1.0, %v1652_v51  ;;  %vm1678_vm6 = vmor %vm1676_vm5, %vm1677_vm4  ;;  %v3277_v51 = vor.u32 %v3593_v50, %v3274_v3  ;;  %v3212_v43 = vld [vmem:[#allocation11] sm:$0xf]  ;;  %v3579_v50 = vld [vmem:[#allocation11 + $0x8] sm:$0xf0]  ;;  %v3233_v3 = vor.u32 %v3583_v42, %v3232_v20 }
 0x3b2   :  { %v1673_v12 = vsub.f32 1.0, %v1672_v52  ;;  %v3402_v20 = vld [vmem:[#allocation11 + $0xb0] sm:$0xf] }
 0x3b3   :  { %v1654_v54 = vmul.f32 %v3705_v49, %v1653_v36  ;;  %2130 = vmatpush.bf16.msrb.mxu1 %v3277_v51  ;;  %v3260_v36 = vld [vmem:[#allocation11 + $0x60] sm:$0xf]  ;;  %v3214_v51 = vld [vmem:[#allocation11 + $0xc] sm:$0xf0] }
 0x3b4   :  { %v1674_v56 = vmul.f32 %v3707_v32, %v1673_v12  ;;  %v3590_v12 = vld [vmem:[#allocation11 + $0x64] sm:$0xf] }
 0x3b5   :  { %v1655_v4 = vadd.f32 %v3705_v49, %v1654_v54  ;;  %v3261_v54 = vor.u32 %v3591_v8, %v3260_v36  ;;  %v3220_v36 = vld [vmem:[#allocation11 + $0x8] sm:$0xf]  ;;  %v3580_v8 = vld [vmem:[#allocation11 + $0x10] sm:$0xf0] }
 0x3b6   :  { %v1675_v63 = vadd.f32 %v3707_v32, %v1674_v56  ;;  %v3268_v56 = vld [vmem:[#allocation11 + $0x68] sm:$0xf] }
 0x3b7   :  { %v1659_v0 = vsel %vm1658_vm2, %v3705_v49, %v1655_v4  ;;  %v3280_v49 = vld [vmem:[#allocation11 + $0x80] sm:$0xf]  ;;  %v3592_v4 = vld [vmem:[#allocation11 + $0x70] sm:$0xf0] }
 0x3b8   :  { %v1664_v6 = vsel %vm1661_vm3, %v1663_v59, %v1659_v0  ;;  %v1679_v58 = vsel %vm1678_vm6, %v3707_v32, %v1675_v63  ;;  %v3595_v32 = vld [vmem:[#allocation11 + $0x88] sm:$0xf0]  ;;  %v3265_v59 = vor.u32 %v3590_v12, %v3262_v53  ;;  %v3248_v63 = vld [vmem:[#allocation11 + $0x48] sm:$0xf]  ;;  %v3221_v53 = vor.u32 %v3580_v8, %v3220_v36  ;;  %v3370_v36 = vld [vmem:[#allocation11 + $0x78] sm:$0xf] }
 0x3b9   :  { %v1687_v7 = vmul.f32 %v1686_v5, %v1664_v6  ;;  %v1684_v9 = vsel %vm1681_vm7, %v1683_v14, %v1679_v58  ;;  %v3281_v52 = vor.u32 %v3595_v32, %v3280_v49  ;;  %v3269_v5 = vor.u32 %v3592_v4, %v3268_v56  ;;  %v3256_v58 = vld [vmem:[#allocation11 + $0x50] sm:$0xf]  ;;  %v3589_v14 = vld [vmem:[#allocation11 + $0x58] sm:$0xf0]  ;;  %v3578_v32 = vld [vmem:[#allocation11 + $0x4] sm:$0xf] }
 0x3ba   :  { %v1690_v17 = vsub.f32 1.0, %v1684_v9  ;;  %v1692_v34 = vmul.f32 %v1684_v9, %v4093_v60  ;;  %v3284_v60 = vld [vmem:[#allocation11 + $0x90] sm:$0xf]  ;;  %2131 = vmatpush.bf16.msrb.mxu1 %v3265_v59  ;;  %v3213_v49 = vor.u32 %v3579_v50, %v3212_v43  ;;  %v3621_v50 = vld [vmem:[#allocation11 + $0x98] sm:$0xf0] }
 0x3bb   :  { %v1688_v13 = vadd.f32 %v1687_v7, %v4026_v46  ;;  %v3600_v46 = vld [vmem:[#allocation11 + $0xb0] sm:$0xf0]  ;;  %v3285_v15 = vor.u32 %v3597_v18, %v3284_v60  ;;  %2143 = vmatpush.bf16.msrb.mxu2 %v3281_v52  ;;  %v3217_v52 = vor.u32 %v3578_v32, %v3214_v51  ;;  %v3382_v43 = vld [vmem:[#allocation11 + $0x90] sm:$0xf]  ;;  %v3622_v32 = vld [vmem:[#allocation11 + $0xa0] sm:$0xf0] }
 0x3bc   :  { %v3297_v26 = vor.u32 %v3600_v46, %v3296_v21  ;;  %v3588_v7 = vld [vmem:[#allocation11 + $0x50] sm:$0xf0]  ;;  %v3618_v8 = vld [vmem:[#allocation11 + $0x80] sm:$0xf0] }
 0x3bd   :  { %3708 = vtanh.f32 %v1688_v13  ;;  %v3249_v45 = vor.u32 %v3588_v7, %v3248_v63  ;;  %v3250_v13 = vld [vmem:[#allocation11 + $0x54] sm:$0xf0] }
 0x3be   :  { %2115 = vmatpush.bf16.msrb.mxu0 %v3297_v26  ;;  %v3244_v26 = vld [vmem:[#allocation11 + $0x38] sm:$0xf] }
 0x3bf   :  { %2144 = vmatpush.bf16.msrb.mxu2 %v3269_v5  ;;  %v3245_v33 = vor.u32 %v3586_v27, %v3244_v26 }
 0x3c2   :  { %2116 = vmatpush.bf16.msrb.mxu0 %v3285_v15 }
 0x3c3   :  { %v3709_v16 = vpop.eup %3708 }
 0x3c4   :  { %v1691_v37 = vmul.f32 %v3709_v16, %v1690_v17  ;;  %v3253_v17 = vor.u32 %v3587_v10, %v3250_v13  ;;  %v3257_v16 = vor.u32 %v3589_v14, %v3256_v58 }
 0x3c6   :  { %v4113_v40 = vadd.f32 %v1692_v34, %v1691_v37  ;;  %2117 = vmatpush.bf16.msrb.mxu0 %v3273_v44  ;;  %v355_v37 = vadd.f32 %v4047_v1, %v3982_v55  ;;  %2132 = vmatpush.bf16.msrb.mxu1 %v3253_v17  ;;  %v3585_v34 = vld [vmem:[#allocation11 + $0x38] sm:$0xf0]  ;;  %v3224_v1 = vld [vmem:[#allocation11 + $0x18] sm:$0xf] }
 0x3c7   :  { %2145 = vmatpush.bf16.msrb.mxu2 %v3257_v16  ;;  %v3225_v15 = vor.u32 %v3582_v35, %v3224_v1  ;;  %v3624_v35 = vld [vmem:[#allocation11 + $0xb0] sm:$0xf0] }
 0x3c8   :  { %v1698_v19 = vpack.c.bf16 %v4113_v40, %v4113_v40 }
 0x3ca   :  { %1867 = vmatmul.bf16.vlgmr.msra.gmra.mxu1 %v1698_v19  ;;  %1880 = vmatmul.bf16.vlgmr.msra.gmra.mxu2 %v1698_v19 }
 0x3cb   :  { %1893 = vmatmul.bf16.vlgmr.msrb.gmra.mxu3 %v1698_v19  ;;  %2118 = vmatpush.bf16.msrb.mxu0 %v3261_v54  ;;  %v3584_v19 = vld [vmem:[#allocation11 + $0x34] sm:$0xf] }
 0x3cc   :  { %v3241_v30 = vor.u32 %v3584_v19, %v3238_v25  ;;  %2146 = vmatpush.bf16.msrb.mxu2 %v3245_v33 }
 0x3ce   :  { %2133 = vmatpush.bf16.msrb.mxu1 %v3241_v30 }
 0x3cf   :  { %2119 = vmatpush.bf16.msrb.mxu0 %v3249_v45 }
 0x3d0   :  { %2147 = vmatpush.bf16.msrb.mxu2 %v3233_v3  ;;  %v3384_v3 = vld [vmem:[#allocation11 + $0x9c] sm:$0xf0] }
 0x3d2   :  { %2134 = vmatpush.bf16.msrb.mxu1 %v3229_v41 }
 0x3d4   :  { %2148 = vmatpush.bf16.msrb.mxu2 %v3221_v53  ;;  %v3372_v53 = vld [vmem:[#allocation11 + $0x84] sm:$0xf0] }
 0x3d6   :  { %2135 = vmatpush.bf16.msrb.mxu1 %v3217_v52 }
 0x447   :  { %v1868_v0 = vpop.f32.mrf.mxu1 }
 0x448   :  { %v1902_v6 = vadd.f32 %v1868_v0, %v3999_v48  ;;  %v3236_v48 = vld [vmem:[#allocation11 + $0x30] sm:$0xf] }
 0x449   :  { %v3237_v46 = vor.u32 %v3585_v34, %v3236_v48 }
 0x44a   :  { %v3208_v9 = vmul.f32 -1.442695, %v1902_v6 }
 0x44b   :  { %2120 = vmatpush.bf16.msrb.mxu0 %v3237_v46 }
 0x44c   :  { %3710 = vpow2.f32 %v3208_v9 }
 0x44d   :  { %v1881_v21 = vpop.f32.mrf.mxu2 }
 0x44e   :  { %v1922_v28 = vadd.f32 %v1881_v21, %v355_v37  ;;  %v1894_v29 = vpop.f32.mrf.mxu3 }
 0x44f   :  { %v1870_v60 = vpop.f32.mrf.mxu1  ;;  %2121 = vmatpush.bf16.msrb.mxu0 %v3225_v15  ;;  %v1942_v17 = vadd.f32 %v4107_v22, %v1894_v29  ;;  %v3623_v15 = vld [vmem:[#allocation11 + $0xac] sm:$0xf] }
 0x450   :  { %v3209_v18 = vmul.f32 -1.442695, %v1922_v28  ;;  %v3399_v41 = vor.u32 %v3623_v15, %v3396_v38  ;;  %v3610_v15 = vld [vmem:[#allocation11 + $0x40] sm:$0xf0] }
 0x452   :  { %v3711_v39 = vpop.eup %3710  ;;  %3712 = vpow2.f32 %v3209_v18 }
 0x453   :  { %v1906_v44 = vadd.f32 1.0, %v3711_v39  ;;  %2122 = vmatpush.bf16.msrb.mxu0 %v3213_v49  ;;  %v3625_v39 = vld [vmem:[#allocation11 + $0xb8] sm:$0xf0]  ;;  %v3390_v49 = vld [vmem:[#allocation11 + $0x98] sm:$0xf] }
 0x454   :  { %v3403_v42 = vor.u32 %v3625_v39, %v3402_v20  ;;  %v3391_v52 = vor.u32 %v3622_v32, %v3390_v49  ;;  %v3607_v49 = vld [vmem:[#allocation11 + $0x28] sm:$0xf0] }
 0x455   :  { %3714 = vrcp.f32 %v1906_v44  ;;  %v1883_v12 = vpop.f32.mrf.mxu2  ;;  %v1918_v6 = vand.u32 2147483648, %v1906_v44  ;;  %v1916_v7 = vand.u32 2147483647, %v1906_v44  ;;  %vm1912_vm9 = vweird.f32 %v1906_v44 }
 0x456   :  { %v1896_v54 = vpop.f32.mrf.mxu3  ;;  %2397 = vmatpush.bf16.msra.mxu1 %v3403_v42  ;;  %v3617_v12 = vld [vmem:[#allocation11 + $0x7c] sm:$0xf]  ;;  %v3322_v42 = vld [vmem:[#allocation11 + $0x18] sm:$0xf] }
 0x457   :  { %v1919_v58 = vor.u32 1.1754944e-38, %v1918_v6  ;;  %vm1917_vm11 = vcmp.eq.f32.partialorder %v1916_v7, 8.507059e+37  ;;  %2384 = vmatpush.bf16.msra.mxu0 %v3399_v41  ;;  %v3371_v54 = vor.u32 %v3618_v8, %v3370_v36  ;;  %v3615_v6 = vld [vmem:[#allocation11 + $0x68] sm:$0xf0]  ;;  %v3310_v36 = vld [vmem:[#allocation11] sm:$0xf] }
 0x458   :  { %v3713_v56 = vpop.eup %3712  ;;  %v3603_v8 = vld [vmem:[#allocation11 + $0x8] sm:$0xf0] }
 0x459   :  { %v1926_v4 = vadd.f32 1.0, %v3713_v56  ;;  %v3378_v56 = vld [vmem:[#allocation11 + $0x80] sm:$0xf] }
 0x45a   :  { %2398 = vmatpush.bf16.msra.mxu1 %v3391_v52 }
 0x45b   :  { %v3715_v59 = vpop.eup %3714  ;;  %3716 = vrcp.f32 %v1926_v4  ;;  %v1938_v48 = vand.u32 2147483648, %v1926_v4  ;;  %v1936_v19 = vand.u32 2147483647, %v1926_v4  ;;  %vm1932_vm13 = vweird.f32 %v1926_v4 }
 0x45c   :  { %v1908_v5 = vmul.f32 %v3715_v59, %v1906_v44  ;;  %vm1913_vm8 = vweird.f32 %v3715_v59  ;;  %v3620_v44 = vld [vmem:[#allocation11 + $0x94] sm:$0xf] }
 0x45d   :  { %vm1914_vm10 = vmor %vm1912_vm9, %vm1913_vm8  ;;  %v1939_v25 = vor.u32 1.1754944e-38, %v1938_v48  ;;  %vm1937_vm15 = vcmp.eq.f32.partialorder %v1936_v19, 8.507059e+37  ;;  %v3387_v51 = vor.u32 %v3620_v44, %v3384_v3  ;;  %v3612_v19 = vld [vmem:[#allocation11 + $0x50] sm:$0xf0]  ;;  %v3330_v3 = vld [vmem:[#allocation11 + $0x20] sm:$0xf] }
 0x45e   :  { %v1909_v0 = vsub.f32 1.0, %v1908_v5  ;;  %v3331_v52 = vor.u32 %v3607_v49, %v3330_v3 }
 0x45f   :  { %2385 = vmatpush.bf16.msra.mxu0 %v3387_v51 }
 0x460   :  { %v1910_v63 = vmul.f32 %v3715_v59, %v1909_v0  ;;  %v3358_v0 = vld [vmem:[#allocation11 + $0x60] sm:$0xf] }
 0x461   :  { %v3717_v10 = vpop.eup %3716  ;;  %v3359_v7 = vor.u32 %v3615_v6, %v3358_v0  ;;  %v3318_v0 = vld [vmem:[#allocation11 + $0x8] sm:$0xf]  ;;  %v3604_v6 = vld [vmem:[#allocation11 + $0x10] sm:$0xf0] }
 0x462   :  { %v1928_v45 = vmul.f32 %v3717_v10, %v1926_v4  ;;  %v1911_v13 = vadd.f32 %v3715_v59, %v1910_v63  ;;  %vm1933_vm12 = vweird.f32 %v3717_v10  ;;  %v3619_v4 = vld [vmem:[#allocation11 + $0x88] sm:$0xf0]  ;;  %v3614_v63 = vld [vmem:[#allocation11 + $0x64] sm:$0xf] }
 0x463   :  { %vm1934_vm14 = vmor %vm1932_vm13, %vm1933_vm12  ;;  %v3379_v5 = vor.u32 %v3619_v4, %v3378_v56  ;;  %v3311_v56 = vor.u32 %v3603_v8, %v3310_v36  ;;  %v3312_v4 = vld [vmem:[#allocation11 + $0xc] sm:$0xf0] }
 0x464   :  { %v1929_v14 = vsub.f32 1.0, %v1928_v45  ;;  %v1915_v9 = vsel %vm1914_vm10, %v3715_v59, %v1911_v13  ;;  %v3375_v59 = vor.u32 %v3617_v12, %v3372_v53  ;;  %v3366_v45 = vld [vmem:[#allocation11 + $0x68] sm:$0xf]  ;;  %v3616_v13 = vld [vmem:[#allocation11 + $0x70] sm:$0xf0] }
 0x465   :  { %v1920_v16 = vsel %vm1917_vm11, %v1919_v58, %v1915_v9  ;;  %2399 = vmatpush.bf16.msra.mxu1 %v3379_v5  ;;  %v358_v58 = vadd.f32 %v4049_v2, %v3982_v55  ;;  %v3367_v9 = vor.u32 %v3616_v13, %v3366_v45  ;;  %v3602_v12 = vld [vmem:[#allocation11 + $0x4] sm:$0xf] }
 0x466   :  { %v1930_v37 = vmul.f32 %v3717_v10, %v1929_v14  ;;  %v1943_v34 = vmul.f32 %v1942_v17, %v1920_v16  ;;  %2386 = vmatpush.bf16.msra.mxu0 %v3375_v59  ;;  %v3315_v5 = vor.u32 %v3602_v12, %v3312_v4 }
 0x468   :  { %v1931_v21 = vadd.f32 %v3717_v10, %v1930_v37  ;;  %v1944_v46 = vadd.f32 %v1943_v34, %v4030_v57  ;;  %v3394_v57 = vld [vmem:[#allocation11 + $0xa8] sm:$0xf] }
 0x469   :  { %v3395_v62 = vor.u32 %v3624_v35, %v3394_v57  ;;  %2400 = vmatpush.bf16.msra.mxu1 %v3367_v9  ;;  %v3346_v34 = vld [vmem:[#allocation11 + $0x48] sm:$0xf]  ;;  %v3336_v57 = vld [vmem:[#allocation11 + $0x3c] sm:$0xf0]  ;;  %v3342_v35 = vld [vmem:[#allocation11 + $0x38] sm:$0xf] }
 0x46a   :  { %v1935_v26 = vsel %vm1934_vm14, %v3717_v10, %v1931_v21  ;;  %3718 = vtanh.f32 %v1944_v46  ;;  %v3360_v10 = vld [vmem:[#allocation11 + $0x6c] sm:$0xf0]  ;;  %v3611_v21 = vld [vmem:[#allocation11 + $0x4c] sm:$0xf]  ;;  %v3347_v46 = vor.u32 %v3612_v19, %v3346_v34  ;;  %v3343_v20 = vor.u32 %v3610_v15, %v3342_v35 }
 0x46b   :  { %v1940_v27 = vsel %vm1937_vm15, %v1939_v25, %v1935_v26  ;;  %2371 = vmatpush.bf16.msra.mxu3 %v3395_v62  ;;  %v3363_v14 = vor.u32 %v3614_v63, %v3360_v10  ;;  %v3348_v25 = vld [vmem:[#allocation11 + $0x54] sm:$0xf0]  ;;  %v3354_v26 = vld [vmem:[#allocation11 + $0x50] sm:$0xf] }
 0x46c   :  { %v1946_v28 = vsub.f32 1.0, %v1940_v27  ;;  %v1948_v29 = vmul.f32 %v1940_v27, %v4113_v40  ;;  %v3613_v27 = vld [vmem:[#allocation11 + $0x58] sm:$0xf0]  ;;  %v3351_v2 = vor.u32 %v3611_v21, %v3348_v25 }
 0x46d   :  { %2387 = vmatpush.bf16.msra.mxu0 %v3363_v14 }
 0x470   :  { %v3719_v30 = vpop.eup %3718 }
 0x471   :  { %v1947_v33 = vmul.f32 %v3719_v30, %v1946_v28  ;;  %2388 = vmatpush.bf16.msra.mxu0 %v3351_v2 }
 0x473   :  { %v4123_v60 = vadd.f32 %v1948_v29, %v1947_v33  ;;  %v3355_v33 = vor.u32 %v3613_v27, %v3354_v26  ;;  %v3334_v29 = vld [vmem:[#allocation11 + $0x30] sm:$0xf] }
 0x475   :  { %v1954_v18 = vpack.c.bf16 %v4123_v60, %v4123_v60  ;;  %v3639_v1 = vpack.c.bf16 %v4123_v60, %v4113_v40  ;;  %v3383_v40 = vor.u32 %v3621_v50, %v3382_v43  ;;  %2401 = vmatpush.bf16.msra.mxu1 %v3355_v33  ;;  %v3606_v43 = vld [vmem:[#allocation11 + $0x20] sm:$0xf0]  ;;  %v3605_v50 = vld [vmem:[#allocation11 + $0x1c] sm:$0xf] }
 0x476   :  { %v3323_v44 = vor.u32 %v3606_v43, %v3322_v42 }
 0x477   :  { %2123 = vmatmul.bf16.vlgmr.msrb.gmra.mxu0 %v1954_v18  ;;  %2136 = vmatmul.bf16.vlgmr.msrb.gmra.mxu1 %v1954_v18  ;;  %3647 = vst [vmem:[#allocation14 + $0x10] sm:$0xff] %v3639_v1  }
 0x478   :  { %2149 = vmatmul.bf16.vlgmr.msrb.gmra.mxu2 %v1954_v18  ;;  %2372 = vmatpush.bf16.msra.mxu3 %v3383_v40  ;;  %v3608_v18 = vld [vmem:[#allocation11 + $0x34] sm:$0xf]  ;;  %v3324_v40 = vld [vmem:[#allocation11 + $0x24] sm:$0xf0] }
 0x479   :  { %v3339_v38 = vor.u32 %v3608_v18, %v3336_v57  ;;  %2402 = vmatpush.bf16.msra.mxu1 %v3343_v20  ;;  %v3327_v51 = vor.u32 %v3605_v50, %v3324_v40 }
 0x47b   :  { %2389 = vmatpush.bf16.msra.mxu0 %v3339_v38 }
 0x47c   :  { %2373 = vmatpush.bf16.msra.mxu3 %v3371_v54 }
 0x47d   :  { %2403 = vmatpush.bf16.msra.mxu1 %v3331_v52 }
 0x47f   :  { %2390 = vmatpush.bf16.msra.mxu0 %v3327_v51 }
 0x480   :  { %2374 = vmatpush.bf16.msra.mxu3 %v3359_v7  ;;  %v3319_v7 = vor.u32 %v3604_v6, %v3318_v0 }
 0x482   :  { %2404 = vmatpush.bf16.msra.mxu1 %v3319_v7  ;;  %v389_v7 = vadd.f32 %v4053_v47, %v3992_v23 }
 0x483   :  { %2391 = vmatpush.bf16.msra.mxu0 %v3315_v5 }
 0x484   :  { %2375 = vmatpush.bf16.msra.mxu3 %v3347_v46 }
 0x4f4   :  { %v2124_v17 = vpop.f32.mrf.mxu0  ;;  %v2137_v16 = vpop.f32.mrf.mxu1 }
 0x4f5   :  { %v2158_v37 = vadd.f32 %v2124_v17, %v4003_v11  ;;  %v2178_v48 = vadd.f32 %v2137_v16, %v358_v58  ;;  %v3609_v11 = vld [vmem:[#allocation11 + $0x38] sm:$0xf0] }
 0x4f6   :  { %v3335_v1 = vor.u32 %v3609_v11, %v3334_v29 }
 0x4f7   :  { %v3306_v28 = vmul.f32 -1.442695, %v2158_v37  ;;  %v3307_v30 = vmul.f32 -1.442695, %v2178_v48 }
 0x4f8   :  { %2376 = vmatpush.bf16.msra.mxu3 %v3335_v1 }
 0x4f9   :  { %3720 = vpow2.f32 %v3306_v28 }
 0x4fa   :  { %3722 = vpow2.f32 %v3307_v30 }
 0x4fb   :  { %v2150_v62 = vpop.f32.mrf.mxu2 }
 0x4fc   :  { %v2126_v39 = vpop.f32.mrf.mxu0  ;;  %v2139_v41 = vpop.f32.mrf.mxu1  ;;  %2377 = vmatpush.bf16.msra.mxu3 %v3323_v44  ;;  %v2198_v46 = vadd.f32 %v4107_v22, %v2150_v62 }
 0x4ff   :  { %v3721_v32 = vpop.eup %3720 }
 0x500   :  { %v3723_v54 = vpop.eup %3722  ;;  %v2162_v53 = vadd.f32 1.0, %v3721_v32  ;;  %2378 = vmatpush.bf16.msra.mxu3 %v3311_v56 }
 0x501   :  { %v2182_v59 = vadd.f32 1.0, %v3723_v54 }
 0x502   :  { %3724 = vrcp.f32 %v2162_v53  ;;  %v2174_v17 = vand.u32 2147483648, %v2162_v53  ;;  %v2172_v37 = vand.u32 2147483647, %v2162_v53  ;;  %vm2168_vm1 = vweird.f32 %v2162_v53 }
 0x503   :  { %3726 = vrcp.f32 %v2182_v59  ;;  %v2152_v63 = vpop.f32.mrf.mxu2  ;;  %v2194_v27 = vand.u32 2147483648, %v2182_v59  ;;  %vm2188_vm5 = vweird.f32 %v2182_v59  ;;  %v2192_v30 = vand.u32 2147483647, %v2182_v59 }
 0x504   :  { %v2175_v19 = vor.u32 1.1754944e-38, %v2174_v17  ;;  %vm2173_vm3 = vcmp.eq.f32.partialorder %v2172_v37, 8.507059e+37 }
 0x505   :  { %v2195_v29 = vor.u32 1.1754944e-38, %v2194_v27  ;;  %vm2193_vm7 = vcmp.eq.f32.partialorder %v2192_v30, 8.507059e+37 }
 0x508   :  { %v3725_v10 = vpop.eup %3724 }
 0x509   :  { %v3727_v45 = vpop.eup %3726  ;;  %v2164_v13 = vmul.f32 %v3725_v10, %v2162_v53  ;;  %vm2169_vm0 = vweird.f32 %v3725_v10 }
 0x50a   :  { %v2184_v58 = vmul.f32 %v3727_v45, %v2182_v59  ;;  %vm2170_vm2 = vmor %vm2168_vm1, %vm2169_vm0  ;;  %vm2189_vm4 = vweird.f32 %v3727_v45 }
 0x50b   :  { %v2165_v14 = vsub.f32 1.0, %v2164_v13  ;;  %vm2190_vm6 = vmor %vm2188_vm5, %vm2189_vm4 }
 0x50c   :  { %v2185_v9 = vsub.f32 1.0, %v2184_v58 }
 0x50d   :  { %v2166_v16 = vmul.f32 %v3725_v10, %v2165_v14 }
 0x50e   :  { %v2186_v48 = vmul.f32 %v3727_v45, %v2185_v9 }
 0x50f   :  { %v2167_v34 = vadd.f32 %v3725_v10, %v2166_v16 }
 0x510   :  { %v2187_v25 = vadd.f32 %v3727_v45, %v2186_v48 }
 0x511   :  { %v2171_v21 = vsel %vm2170_vm2, %v3725_v10, %v2167_v34 }
 0x512   :  { %v2176_v26 = vsel %vm2173_vm3, %v2175_v19, %v2171_v21  ;;  %v2191_v33 = vsel %vm2190_vm6, %v3727_v45, %v2187_v25 }
 0x513   :  { %v2199_v28 = vmul.f32 %v2198_v46, %v2176_v26  ;;  %v2196_v11 = vsel %vm2193_vm7, %v2195_v29, %v2191_v33 }
 0x514   :  { %v2202_v18 = vsub.f32 1.0, %v2196_v11  ;;  %v2204_v35 = vmul.f32 %v2196_v11, %v4123_v60 }
 0x515   :  { %v2200_v2 = vadd.f32 %v2199_v28, %v4037_v61  ;;  %v360_v61 = vadd.f32 %v4051_v31, %v3982_v55 }
 0x517   :  { %3728 = vtanh.f32 %v2200_v2 }
 0x51d   :  { %v3729_v1 = vpop.eup %3728 }
 0x51e   :  { %v2203_v57 = vmul.f32 %v3729_v1, %v2202_v18 }
 0x520   :  { %v4135_v15 = vadd.f32 %v2204_v35, %v2203_v57 }
 0x522   :  { %v2210_v62 = vpack.c.bf16 %v4135_v15, %v4135_v15 }
 0x524   :  { %2379 = vmatmul.bf16.vlgmr.msra.gmra.mxu3 %v2210_v62  ;;  %2392 = vmatmul.bf16.vlgmr.msra.gmra.mxu0 %v2210_v62 }
 0x525   :  { %2405 = vmatmul.bf16.vlgmr.msra.gmra.mxu1 %v2210_v62 }
 0x5a1   :  { %v2393_v38 = vpop.f32.mrf.mxu0 }
 0x5a2   :  { %v2434_v20 = vadd.f32 %v2393_v38, %v360_v61  ;;  %v2406_v39 = vpop.f32.mrf.mxu1 }
 0x5a3   :  { %v2454_v5 = vadd.f32 %v4107_v22, %v2406_v39 }
 0x5a4   :  { %v3405_v41 = vmul.f32 -1.442695, %v2434_v20 }
 0x5a6   :  { %3730 = vpow2.f32 %v3405_v41 }
 0x5a7   :  { %v2380_v42 = vpop.f32.mrf.mxu3 }
 0x5a8   :  { %v2414_v43 = vadd.f32 %v2380_v42, %v4009_v24 }
 0x5a9   :  { %v2395_v60 = vpop.f32.mrf.mxu0 }
 0x5aa   :  { %v3404_v50 = vmul.f32 -1.442695, %v2414_v43  ;;  %v2408_v44 = vpop.f32.mrf.mxu1 }
 0x5ac   :  { %v3731_v40 = vpop.eup %3730  ;;  %3732 = vpow2.f32 %v3404_v50 }
 0x5ad   :  { %v2438_v3 = vadd.f32 1.0, %v3731_v40 }
 0x5af   :  { %v2382_v49 = vpop.f32.mrf.mxu3  ;;  %3734 = vrcp.f32 %v2438_v3  ;;  %v2450_v10 = vand.u32 2147483648, %v2438_v3  ;;  %vm2444_vm13 = vweird.f32 %v2438_v3  ;;  %v2448_v13 = vand.u32 2147483647, %v2438_v3 }
 0x5b1   :  { %v2451_v9 = vor.u32 1.1754944e-38, %v2450_v10  ;;  %vm2449_vm15 = vcmp.eq.f32.partialorder %v2448_v13, 8.507059e+37 }
 0x5b2   :  { %v3733_v32 = vpop.eup %3732 }
 0x5b3   :  { %v2418_v51 = vadd.f32 1.0, %v3733_v32 }
 0x5b5   :  { %3736 = vrcp.f32 %v2418_v51  ;;  %v3735_v55 = vpop.eup %3734  ;;  %v2430_v54 = vand.u32 2147483648, %v2418_v51  ;;  %v2428_v24 = vand.u32 2147483647, %v2418_v51  ;;  %vm2424_vm9 = vweird.f32 %v2418_v51 }
 0x5b6   :  { %v2440_v31 = vmul.f32 %v3735_v55, %v2438_v3  ;;  %vm2445_vm12 = vweird.f32 %v3735_v55 }
 0x5b7   :  { %v2431_v59 = vor.u32 1.1754944e-38, %v2430_v54  ;;  %vm2429_vm11 = vcmp.eq.f32.partialorder %v2428_v24, 8.507059e+37  ;;  %vm2446_vm14 = vmor %vm2444_vm13, %vm2445_vm12 }
 0x5b8   :  { %v2441_v8 = vsub.f32 1.0, %v2440_v31 }
 0x5ba   :  { %v2442_v56 = vmul.f32 %v3735_v55, %v2441_v8 }
 0x5bb   :  { %v3737_v52 = vpop.eup %3736 }
 0x5bc   :  { %v2420_v36 = vmul.f32 %v3737_v52, %v2418_v51  ;;  %vm2425_vm8 = vweird.f32 %v3737_v52  ;;  %v2443_v6 = vadd.f32 %v3735_v55, %v2442_v56 }
 0x5bd   :  { %vm2426_vm10 = vmor %vm2424_vm9, %vm2425_vm8 }
 0x5be   :  { %v2421_v12 = vsub.f32 1.0, %v2420_v36  ;;  %v2447_v14 = vsel %vm2446_vm14, %v3735_v55, %v2443_v6 }
 0x5bf   :  { %v2452_v17 = vsel %vm2449_vm15, %v2451_v9, %v2447_v14 }
 0x5c0   :  { %v2422_v53 = vmul.f32 %v3737_v52, %v2421_v12  ;;  %v2458_v22 = vsub.f32 1.0, %v2452_v17  ;;  %v2460_v48 = vmul.f32 %v2452_v17, %v4135_v15 }
 0x5c2   :  { %v2423_v4 = vadd.f32 %v3737_v52, %v2422_v53 }
 0x5c4   :  { %v2427_v0 = vsel %vm2426_vm10, %v3737_v52, %v2423_v4 }
 0x5c5   :  { %v2432_v63 = vsel %vm2429_vm11, %v2431_v59, %v2427_v0 }
 0x5c6   :  { %v2455_v45 = vmul.f32 %v2454_v5, %v2432_v63 }
 0x5c8   :  { %v2456_v58 = vadd.f32 %v2455_v45, %v389_v7 }
 0x5ca   :  { %3738 = vtanh.f32 %v2456_v58 }
 0x5d0   :  { %v3739_v16 = vpop.eup %3738 }
 0x5d1   :  { %v2459_v37 = vmul.f32 %v3739_v16, %v2458_v22 }
 0x5d3   :  { %v2461_v23 = vadd.f32 %v2460_v48, %v2459_v37 }
 0x5d5   :  { %v3644_v47 = vpack.c.bf16 %v2461_v23, %v4135_v15 }
 0x5d7   :  { %3648 = vst [vmem:[#allocation14 + $0x18] sm:$0xff] %v3644_v47  }
 0x5d8   :  { %2501 = dma.vmem_to_hbm [thread:$0]  %s2494_s25, 512, %s2496_s28, [#allocation7], %s3898_s15, %s3898_s15, %s3899_s16  }
 0x5d9   :  { %3891 = dma.done.wait [#allocation7], 512  }
 0x5da   :  { %3892 = vsyncadd [#allocation7], 4294966784 }
 0x5db   :  { %2506 = vsyncpa [#allocation6], 1 }
 0x5dc   :  { %2507 = vsyncpa [#allocation9], 1 }
 0x5dd   :  { %2508 = vsyncpa [#allocation12], 1 }
 0x5de   :  { %2509 = vsyncpa [#allocation7], 1 }

</bundles_post_ra>
